<compile_context>
chip_gen: v7x
topology: tpu7x:2x2x1
jax: 0.10.0
libtpu: 0.0.40
codegen_flags: <defaults>
</compile_context>

<pallas_src>
import jax
import jax.numpy as jnp
from jax import lax
from jax.experimental import pallas as pl
from jax.experimental.pallas import tpu as pltpu


# ----------------------------------------------------------------------------
# Fused encoder + decoder kernel factory (all shapes static at trace time)
# ----------------------------------------------------------------------------
def _make_seq2seq_kernel(T, B, E, H, V, T_tgt, sos_id):
    Hd = 2 * H              # decoder hidden size
    steps = T_tgt - 1
    f32 = jnp.float32

    def lstm_act(gates, c, hd):
        # PyTorch gate order: i, f, g, o.  One sigmoid over the full 4*hd gate
        # vector (single EUP push), tanh only on the g sub-range.
        sig = jax.nn.sigmoid(gates)
        i = sig[:, 0:hd]
        f = sig[:, hd:2 * hd]
        o = sig[:, 3 * hd:4 * hd]
        g = jnp.tanh(gates[:, 2 * hd:3 * hd])
        c_new = f * c + i * g
        return o * jnp.tanh(c_new), c_new

    def kernel(x_ref,
               e_wih0_ref, e_b0_ref, e_whh0f_ref, e_whh0b_ref,
               e_wih1_yf_ref, e_wih1_yb_ref, e_b1_ref, e_whh1f_ref, e_whh1b_ref,
               d_emb_ref, d_wih0_ref, d_b0_ref, d_whh0_ref,
               d_wih1_ref, d_b1_ref, d_whh1_ref,
               w_out_ref, b_out_ref,
               out_ref,
               y0f_sc, y0b_sc):
        # ================= encoder: bidirectional 2-layer LSTM =================
        # Hoisted layer-0 input projection: one big matmul for all T steps and
        # both directions, bias folded in.  (T*B, E) @ (E, 8H) -> (T, B, 8H)
        x2d = x_ref[...].reshape(T * B, E)
        p0 = (jnp.dot(x2d, e_wih0_ref[...], preferred_element_type=f32)
              + e_b0_ref[...]).reshape(T, B, 8 * H)

        whh0f = e_whh0f_ref[...]          # hoisted weight loads
        whh0b = e_whh0b_ref[...]
        zero = jnp.zeros((B, H), f32)

        # ---- layer 0, forward (fully unrolled; chain only carries h @ Whh) ----
        h, c = zero, zero
        for t in range(T):
            gates = p0[t][:, 0:4 * H] + jnp.dot(h, whh0f, preferred_element_type=f32)
            h, c = lstm_act(gates, c, H)
            y0f_sc[t] = h
        h0f, c0f = h, c

        # ---- layer 0, backward ----
        h, c = zero, zero
        for s in range(T):
            t = T - 1 - s
            gates = p0[t][:, 4 * H:8 * H] + jnp.dot(h, whh0b, preferred_element_type=f32)
            h, c = lstm_act(gates, c, H)
            y0b_sc[t] = h
        h0b, c0b = h, c

        # Hoisted layer-1 input projection over [y0f | y0b]; weights pre-split
        # per input half on the host (no in-kernel concat of the scratch).
        y0f2 = y0f_sc[...].reshape(T * B, H)
        y0b2 = y0b_sc[...].reshape(T * B, H)
        p1 = (jnp.dot(y0f2, e_wih1_yf_ref[...], preferred_element_type=f32)
              + jnp.dot(y0b2, e_wih1_yb_ref[...], preferred_element_type=f32)
              + e_b1_ref[...]).reshape(T, B, 8 * H)

        whh1f = e_whh1f_ref[...]
        whh1b = e_whh1b_ref[...]

        # ---- layer 1, forward ----
        h, c = zero, zero
        for t in range(T):
            gates = p1[t][:, 0:4 * H] + jnp.dot(h, whh1f, preferred_element_type=f32)
            h, c = lstm_act(gates, c, H)
        h1f, c1f = h, c

        # ---- layer 1, backward ----
        h, c = zero, zero
        for s in range(T):
            t = T - 1 - s
            gates = p1[t][:, 4 * H:8 * H] + jnp.dot(h, whh1b, preferred_element_type=f32)
            h, c = lstm_act(gates, c, H)
        h1b, c1b = h, c

        # Decoder initial state: torch.cat([each[0::2], each[1::2]], 2).
        # Stays in VMEM (no HBM writeback of 8 tiny states, no XLA concats).
        h0 = jnp.concatenate([h0f, h0b], axis=-1)
        c0 = jnp.concatenate([c0f, c0b], axis=-1)
        h1 = jnp.concatenate([h1f, h1b], axis=-1)
        c1 = jnp.concatenate([c1f, c1b], axis=-1)

        # ================= decoder: greedy, fully unrolled =================
        # Pre-project the embedding table through the layer-0 input weights
        # (+ bias folded): feedback path per step is one one-hot @ E_proj.
        e_proj = (jnp.dot(d_emb_ref[...], d_wih0_ref[...], preferred_element_type=f32)
                  + d_b0_ref[...])                                    # (V, 4*Hd)

        d_whh0 = d_whh0_ref[...]          # hoisted weight loads / broadcasts
        d_wih1 = d_wih1_ref[...]
        d_whh1 = d_whh1_ref[...]
        d_b1 = jnp.broadcast_to(d_b1_ref[...], (B, 4 * Hd))
        w_out = w_out_ref[...]
        b_out = jnp.broadcast_to(b_out_ref[...], (B, V))

        iota = lax.broadcasted_iota(jnp.int32, (B, V), 1)
        oh = (iota == sos_id).astype(f32)
        out_ref[0] = oh                                               # SOS one-hot row

        # TODO(synk): teacher-forcing / test-mode early-EOS paths not implemented.
        for s in range(steps):
            xg = jnp.dot(oh, e_proj, preferred_element_type=f32)     # emb@Wih0 + b0
            g0 = xg + jnp.dot(h0, d_whh0, preferred_element_type=f32)
            h0, c0 = lstm_act(g0, c0, Hd)
            g1 = (jnp.dot(h0, d_wih1, preferred_element_type=f32)
                  + jnp.dot(h1, d_whh1, preferred_element_type=f32) + d_b1)
            h1, c1 = lstm_act(g1, c1, Hd)
            logits = jnp.dot(h1, w_out, preferred_element_type=f32) + b_out
            m = jnp.max(logits, axis=1, keepdims=True)
            lse = jnp.log(jnp.sum(jnp.exp(logits - m), axis=1, keepdims=True)) + m
            logp = logits - lse
            out_ref[s + 1] = logp
            # greedy feedback: first index achieving the max (== torch.argmax)
            mx = jnp.max(logp, axis=1, keepdims=True)
            idx = jnp.min(jnp.where(logp == mx, iota, V), axis=1, keepdims=True)
            oh = (iota == idx).astype(f32)

    return kernel


# ----------------------------------------------------------------------------
# Model wrapper (parameter setup + glue)
# ----------------------------------------------------------------------------
def _xavier(key, shape):
    std = (2.0 / (shape[0] + shape[1])) ** 0.5
    return std * jax.random.normal(key, shape, dtype=jnp.float32)


class ModelPallas:
    def __init__(self, key, *, input_vocab, output_vocab, emb_size, hidden_size,
                 num_layers=2, sos_id=2, eos_id=3, pad_id=0):
        assert num_layers == 2, \
            "Linear(hidden*num_layers) in the reference requires num_layers == 2"
        self.H, self.E = hidden_size, emb_size
        self.V_in, self.V_out = input_vocab, output_vocab
        self.sos_id, self.eos_id, self.pad_id = sos_id, eos_id, pad_id

        keys = iter(jax.random.split(key, 64))
        H, E = hidden_size, emb_size

        # Encoder: bidirectional 2-layer LSTM (hidden H per direction)
        self.enc_emb = _xavier(next(keys), (input_vocab, E))
        self.enc_layers = []
        for layer in range(2):
            in_size = E if layer == 0 else 2 * H
            layer_p = {}
            for d in ("fw", "bw"):
                layer_p[d] = (_xavier(next(keys), (in_size, 4 * H)),
                              _xavier(next(keys), (H, 4 * H)),
                              0.05 * jax.random.normal(next(keys), (1, 4 * H),
                                                       jnp.float32))
            self.enc_layers.append(layer_p)

        # Fused / pre-split encoder weight layouts for the kernel
        wih0f, whh0f, b0f = self.enc_layers[0]["fw"]
        wih0b, whh0b, b0b = self.enc_layers[0]["bw"]
        wih1f, whh1f, b1f = self.enc_layers[1]["fw"]
        wih1b, whh1b, b1b = self.enc_layers[1]["bw"]
        self.enc_wih0 = jnp.concatenate([wih0f, wih0b], axis=1)   # (E, 8H) fw|bw cols
        self.enc_b0 = jnp.concatenate([b0f, b0b], axis=1)         # (1, 8H)
        self.enc_whh0f, self.enc_whh0b = whh0f, whh0b
        w1 = jnp.concatenate([wih1f, wih1b], axis=1)              # (2H, 8H)
        self.enc_wih1_yf = w1[:H]                                 # rows multiplying y0f
        self.enc_wih1_yb = w1[H:]                                 # rows multiplying y0b
        self.enc_b1 = jnp.concatenate([b1f, b1b], axis=1)         # (1, 8H)
        self.enc_whh1f, self.enc_whh1b = whh1f, whh1b

        # Decoder: 2-layer unidirectional LSTM with hidden 2H, Linear(2H, V)
        Hd = 2 * H
        self.dec_emb = _xavier(next(keys), (output_vocab, H))
        self.dec_l0 = (_xavier(next(keys), (H, 4 * Hd)),
                       _xavier(next(keys), (Hd, 4 * Hd)),
                       0.05 * jax.random.normal(next(keys), (1, 4 * Hd), jnp.float32))
        self.dec_l1 = (_xavier(next(keys), (Hd, 4 * Hd)),
                       _xavier(next(keys), (Hd, 4 * Hd)),
                       0.05 * jax.random.normal(next(keys), (1, 4 * Hd), jnp.float32))
        self.w_out = _xavier(next(keys), (Hd, output_vocab))
        self.b_out = 0.05 * jax.random.normal(next(keys), (1, output_vocab),
                                              jnp.float32)

    def forward(self, input_tokens, target_tokens):
        B, T_in = input_tokens.shape
        T_tgt = target_tokens.shape[1]
        H, V = self.H, self.V_out

        # Encoder embedding lookup (dropout = identity), time-major input.
        x = jnp.take(self.enc_emb, input_tokens, axis=0)   # (B, T, E)
        x = jnp.transpose(x, (1, 0, 2))                    # (T, B, E)

        d_wih0, d_whh0, d_b0 = self.dec_l0
        d_wih1, d_whh1, d_b1 = self.dec_l1

        kernel = _make_seq2seq_kernel(T_in, B, self.E, H, V, T_tgt, self.sos_id)
        pred = pl.pallas_call(
            kernel,
            out_shape=jax.ShapeDtypeStruct((T_tgt, B, V), jnp.float32),
            scratch_shapes=[pltpu.VMEM((T_in, B, H), jnp.float32),
                            pltpu.VMEM((T_in, B, H), jnp.float32)],
        )(x,
          self.enc_wih0, self.enc_b0, self.enc_whh0f, self.enc_whh0b,
          self.enc_wih1_yf, self.enc_wih1_yb, self.enc_b1,
          self.enc_whh1f, self.enc_whh1b,
          self.dec_emb, d_wih0, d_b0, d_whh0,
          d_wih1, d_b1, d_whh1,
          self.w_out, self.b_out)
        return jnp.transpose(pred, (1, 0, 2))              # (B, T_tgt, V)


# ----------------------------------------------------------------------------
# Pure-JAX reference (same math, no Pallas) for correctness check
# ----------------------------------------------------------------------------
def reference_forward(m, input_tokens, target_tokens):
    prec = lax.Precision.HIGHEST

    def cell(x, h, c, wih, whh, b):
        gates = (jnp.dot(x, wih, precision=prec) + b
                 + jnp.dot(h, whh, precision=prec))
        hd = h.shape[-1]
        i = jax.nn.sigmoid(gates[:, :hd])
        f = jax.nn.sigmoid(gates[:, hd:2 * hd])
        g = jnp.tanh(gates[:, 2 * hd:3 * hd])
        o = jax.nn.sigmoid(gates[:, 3 * hd:])
        c = f * c + i * g
        return o * jnp.tanh(c), c

    def run_layer(x_tbf, params, reverse):
        wih, whh, b = params
        T, B, _ = x_tbf.shape
        h = jnp.zeros((B, m.H), jnp.float32)
        c = jnp.zeros((B, m.H), jnp.float32)
        ys = [None] * T
        order = range(T - 1, -1, -1) if reverse else range(T)
        for t in order:
            h, c = cell(x_tbf[t], h, c, wih, whh, b)
            ys[t] = h
        return jnp.stack(ys, 0), h, c

    B, _ = input_tokens.shape
    T_tgt = target_tokens.shape[1]
    x = jnp.transpose(jnp.take(m.enc_emb, input_tokens, axis=0), (1, 0, 2))
    y0f, h0f, c0f = run_layer(x, m.enc_layers[0]["fw"], False)
    y0b, h0b, c0b = run_layer(x, m.enc_layers[0]["bw"], True)
    x1 = jnp.concatenate([y0f, y0b], -1)
    _, h1f, c1f = run_layer(x1, m.enc_layers[1]["fw"], False)
    _, h1b, c1b = run_layer(x1, m.enc_layers[1]["bw"], True)

    dh = [jnp.concatenate([h0f, h0b], -1), jnp.concatenate([h1f, h1b], -1)]
    dc = [jnp.concatenate([c0f, c0b], -1), jnp.concatenate([c1f, c1b], -1)]

    V = m.V_out
    rows = [jnp.broadcast_to((jnp.arange(V)[None, :] == m.sos_id).astype(jnp.float32),
                             (B, V))]
    tok = jnp.full((B,), m.sos_id, jnp.int32)
    for _ in range(T_tgt - 1):
        emb = jnp.take(m.dec_emb, tok, axis=0)
        h0, c0 = cell(emb, dh[0], dc[0], *m.dec_l0)
        h1, c1 = cell(h0, dh[1], dc[1], *m.dec_l1)
        dh, dc = [h0, h1], [c0, c1]
        logits = jnp.dot(h1, m.w_out, precision=prec) + m.b_out
        logp = jax.nn.log_softmax(logits, axis=1)
        rows.append(logp)
        tok = jnp.argmax(logp, axis=1).astype(jnp.int32)
    return jnp.transpose(jnp.stack(rows, 0), (1, 0, 2))


if __name__ == "__main__":
    B, T_in, T_tgt = 2, 8, 6
    H, E, V_in, V_out = 32, 16, 16, 16

    model = ModelPallas(jax.random.PRNGKey(0), input_vocab=V_in, output_vocab=V_out,
                        emb_size=E, hidden_size=H)

    kin, ktg = jax.random.split(jax.random.PRNGKey(1))
    input_tokens = jax.random.randint(kin, (B, T_in), 0, V_in, dtype=jnp.int32)
    target_tokens = jax.random.randint(ktg, (B, T_tgt), 0, V_out, dtype=jnp.int32)

    out = model.forward(input_tokens, target_tokens)
    out = jax.block_until_ready(out)
    assert out.shape == (B, T_tgt, V_out), out.shape
    assert bool(jnp.all(jnp.isfinite(out)))

    ref = reference_forward(model, input_tokens, target_tokens)
    max_diff = float(jnp.max(jnp.abs(out - ref)))
    assert jnp.allclose(out, ref, atol=2e-2, rtol=2e-2), f"max abs diff {max_diff}"

    print("KERNEL_OK")
</pallas_src>

<mosaic_0001>
module attributes {stable_mosaic.version = 11 : i64} {
  func.func @kernel(%arg0: memref<8x2x16xf32, #tpu.memory_space<vmem>>, %arg1: memref<16x256xf32, #tpu.memory_space<vmem>>, %arg2: memref<1x256xf32, #tpu.memory_space<vmem>>, %arg3: memref<32x128xf32, #tpu.memory_space<vmem>>, %arg4: memref<32x128xf32, #tpu.memory_space<vmem>>, %arg5: memref<32x256xf32, #tpu.memory_space<vmem>>, %arg6: memref<32x256xf32, #tpu.memory_space<vmem>>, %arg7: memref<1x256xf32, #tpu.memory_space<vmem>>, %arg8: memref<32x128xf32, #tpu.memory_space<vmem>>, %arg9: memref<32x128xf32, #tpu.memory_space<vmem>>, %arg10: memref<16x32xf32, #tpu.memory_space<vmem>>, %arg11: memref<32x256xf32, #tpu.memory_space<vmem>>, %arg12: memref<1x256xf32, #tpu.memory_space<vmem>>, %arg13: memref<64x256xf32, #tpu.memory_space<vmem>>, %arg14: memref<64x256xf32, #tpu.memory_space<vmem>>, %arg15: memref<1x256xf32, #tpu.memory_space<vmem>>, %arg16: memref<64x256xf32, #tpu.memory_space<vmem>>, %arg17: memref<64x16xf32, #tpu.memory_space<vmem>>, %arg18: memref<1x16xf32, #tpu.memory_space<vmem>>, %arg19: memref<6x2x16xf32, #tpu.memory_space<vmem>>, %arg20: memref<8x2x32xf32, #tpu.memory_space<vmem>>, %arg21: memref<8x2x32xf32, #tpu.memory_space<vmem>>) attributes {dimension_semantics = [], scalar_prefetch = 0 : i64, scratch_operands = 2 : i64, tpu.core_type = #tpu.core_type<tc>} {
    %c0 = arith.constant 0 : index
    %c0_0 = arith.constant 0 : index
    %c0_1 = arith.constant 0 : index
    %0 = vector.load %arg0[%c0, %c0_0, %c0_1] : memref<8x2x16xf32, #tpu.memory_space<vmem>>, vector<8x2x16xf32>
    %1 = vector.shape_cast %0 : vector<8x2x16xf32> to vector<16x16xf32>
    %c0_2 = arith.constant 0 : index
    %c0_3 = arith.constant 0 : index
    %2 = vector.load %arg1[%c0_2, %c0_3] : memref<16x256xf32, #tpu.memory_space<vmem>>, vector<16x256xf32>
    %cst = arith.constant dense<0.000000e+00> : vector<16x256xf32>
    %3 = tpu.matmul %1, %2, %cst {dimension_numbers = #tpu.dot_dimension_numbers<[1], [0], [0], [1], [0, 0, 1, 1], [], []>} : vector<16x16xf32>, vector<16x256xf32>, vector<16x256xf32> -> vector<16x256xf32>
    %c0_4 = arith.constant 0 : index
    %c0_5 = arith.constant 0 : index
    %4 = vector.load %arg2[%c0_4, %c0_5] : memref<1x256xf32, #tpu.memory_space<vmem>>, vector<1x256xf32>
    %5 = vector.broadcast %4 : vector<1x256xf32> to vector<16x256xf32>
    %6 = arith.addf %3, %5 : vector<16x256xf32>
    %7 = vector.shape_cast %6 : vector<16x256xf32> to vector<8x2x256xf32>
    %c0_6 = arith.constant 0 : index
    %c0_7 = arith.constant 0 : index
    %8 = vector.load %arg3[%c0_6, %c0_7] : memref<32x128xf32, #tpu.memory_space<vmem>>, vector<32x128xf32>
    %c0_8 = arith.constant 0 : index
    %c0_9 = arith.constant 0 : index
    %9 = vector.load %arg4[%c0_8, %c0_9] : memref<32x128xf32, #tpu.memory_space<vmem>>, vector<32x128xf32>
    %cst_10 = arith.constant 0.000000e+00 : f32
    %10 = vector.broadcast %cst_10 : f32 to vector<2x32xf32>
    %11 = vector.extract_strided_slice %7 {offsets = [0, 0, 0], sizes = [1, 2, 256], strides = [1, 1, 1]} : vector<8x2x256xf32> to vector<1x2x256xf32>
    %12 = vector.shape_cast %11 : vector<1x2x256xf32> to vector<2x256xf32>
    %13 = vector.extract_strided_slice %12 {offsets = [0, 0], sizes = [2, 128], strides = [1, 1]} : vector<2x256xf32> to vector<2x128xf32>
    %cst_11 = arith.constant dense<0.000000e+00> : vector<2x128xf32>
    %14 = tpu.matmul %10, %8, %cst_11 {dimension_numbers = #tpu.dot_dimension_numbers<[1], [0], [0], [1], [0, 0, 1, 1], [], []>} : vector<2x32xf32>, vector<32x128xf32>, vector<2x128xf32> -> vector<2x128xf32>
    %15 = arith.addf %13, %14 : vector<2x128xf32>
    %16 = arith.negf %15 : vector<2x128xf32>
    %17 = math.exp %16 : vector<2x128xf32>
    %cst_12 = arith.constant 1.000000e+00 : f32
    %18 = vector.broadcast %cst_12 : f32 to vector<2x128xf32>
    %19 = arith.addf %18, %17 : vector<2x128xf32>
    %20 = arith.divf %18, %19 : vector<2x128xf32>
    %21 = vector.extract_strided_slice %20 {offsets = [0, 0], sizes = [2, 32], strides = [1, 1]} : vector<2x128xf32> to vector<2x32xf32>
    %22 = vector.extract_strided_slice %20 {offsets = [0, 32], sizes = [2, 32], strides = [1, 1]} : vector<2x128xf32> to vector<2x32xf32>
    %23 = vector.extract_strided_slice %20 {offsets = [0, 96], sizes = [2, 32], strides = [1, 1]} : vector<2x128xf32> to vector<2x32xf32>
    %24 = vector.extract_strided_slice %15 {offsets = [0, 64], sizes = [2, 32], strides = [1, 1]} : vector<2x128xf32> to vector<2x32xf32>
    %25 = math.tanh %24 : vector<2x32xf32>
    %26 = arith.mulf %22, %10 : vector<2x32xf32>
    %27 = arith.mulf %21, %25 : vector<2x32xf32>
    %28 = arith.addf %26, %27 : vector<2x32xf32>
    %29 = math.tanh %28 : vector<2x32xf32>
    %30 = arith.mulf %23, %29 : vector<2x32xf32>
    %c0_13 = arith.constant 0 : index
    %c0_14 = arith.constant 0 : index
    %c0_15 = arith.constant 0 : index
    %31 = vector.load %arg20[%c0_13, %c0_14, %c0_15] : memref<8x2x32xf32, #tpu.memory_space<vmem>>, vector<1x2x32xf32>
    %32 = vector.shape_cast %31 : vector<1x2x32xf32> to vector<2x32xf32>
    %33 = vector.shape_cast %30 : vector<2x32xf32> to vector<1x2x32xf32>
    tpu.vector_store %arg20[%c0_13, %c0_14, %c0_15], %33 {strides = array<i32>} : memref<8x2x32xf32, #tpu.memory_space<vmem>>, vector<1x2x32xf32>,
    %34 = vector.extract_strided_slice %7 {offsets = [1, 0, 0], sizes = [1, 2, 256], strides = [1, 1, 1]} : vector<8x2x256xf32> to vector<1x2x256xf32>
    %35 = vector.shape_cast %34 : vector<1x2x256xf32> to vector<2x256xf32>
    %36 = vector.extract_strided_slice %35 {offsets = [0, 0], sizes = [2, 128], strides = [1, 1]} : vector<2x256xf32> to vector<2x128xf32>
    %cst_16 = arith.constant dense<0.000000e+00> : vector<2x128xf32>
    %37 = tpu.matmul %30, %8, %cst_16 {dimension_numbers = #tpu.dot_dimension_numbers<[1], [0], [0], [1], [0, 0, 1, 1], [], []>} : vector<2x32xf32>, vector<32x128xf32>, vector<2x128xf32> -> vector<2x128xf32>
    %38 = arith.addf %36, %37 : vector<2x128xf32>
    %39 = arith.negf %38 : vector<2x128xf32>
    %40 = math.exp %39 : vector<2x128xf32>
    %cst_17 = arith.constant 1.000000e+00 : f32
    %41 = vector.broadcast %cst_17 : f32 to vector<2x128xf32>
    %42 = arith.addf %41, %40 : vector<2x128xf32>
    %43 = arith.divf %41, %42 : vector<2x128xf32>
    %44 = vector.extract_strided_slice %43 {offsets = [0, 0], sizes = [2, 32], strides = [1, 1]} : vector<2x128xf32> to vector<2x32xf32>
    %45 = vector.extract_strided_slice %43 {offsets = [0, 32], sizes = [2, 32], strides = [1, 1]} : vector<2x128xf32> to vector<2x32xf32>
    %46 = vector.extract_strided_slice %43 {offsets = [0, 96], sizes = [2, 32], strides = [1, 1]} : vector<2x128xf32> to vector<2x32xf32>
    %47 = vector.extract_strided_slice %38 {offsets = [0, 64], sizes = [2, 32], strides = [1, 1]} : vector<2x128xf32> to vector<2x32xf32>
    %48 = math.tanh %47 : vector<2x32xf32>
    %49 = arith.mulf %45, %28 : vector<2x32xf32>
    %50 = arith.mulf %44, %48 : vector<2x32xf32>
    %51 = arith.addf %49, %50 : vector<2x32xf32>
    %52 = math.tanh %51 : vector<2x32xf32>
    %53 = arith.mulf %46, %52 : vector<2x32xf32>
    %c1 = arith.constant 1 : index
    %c0_18 = arith.constant 0 : index
    %c0_19 = arith.constant 0 : index
    %54 = vector.load %arg20[%c1, %c0_18, %c0_19] : memref<8x2x32xf32, #tpu.memory_space<vmem>>, vector<1x2x32xf32>
    %55 = vector.shape_cast %54 : vector<1x2x32xf32> to vector<2x32xf32>
    %56 = vector.shape_cast %53 : vector<2x32xf32> to vector<1x2x32xf32>
    tpu.vector_store %arg20[%c1, %c0_18, %c0_19], %56 {strides = array<i32>} : memref<8x2x32xf32, #tpu.memory_space<vmem>>, vector<1x2x32xf32>,
    %57 = vector.extract_strided_slice %7 {offsets = [2, 0, 0], sizes = [1, 2, 256], strides = [1, 1, 1]} : vector<8x2x256xf32> to vector<1x2x256xf32>
    %58 = vector.shape_cast %57 : vector<1x2x256xf32> to vector<2x256xf32>
    %59 = vector.extract_strided_slice %58 {offsets = [0, 0], sizes = [2, 128], strides = [1, 1]} : vector<2x256xf32> to vector<2x128xf32>
    %cst_20 = arith.constant dense<0.000000e+00> : vector<2x128xf32>
    %60 = tpu.matmul %53, %8, %cst_20 {dimension_numbers = #tpu.dot_dimension_numbers<[1], [0], [0], [1], [0, 0, 1, 1], [], []>} : vector<2x32xf32>, vector<32x128xf32>, vector<2x128xf32> -> vector<2x128xf32>
    %61 = arith.addf %59, %60 : vector<2x128xf32>
    %62 = arith.negf %61 : vector<2x128xf32>
    %63 = math.exp %62 : vector<2x128xf32>
    %cst_21 = arith.constant 1.000000e+00 : f32
    %64 = vector.broadcast %cst_21 : f32 to vector<2x128xf32>
    %65 = arith.addf %64, %63 : vector<2x128xf32>
    %66 = arith.divf %64, %65 : vector<2x128xf32>
    %67 = vector.extract_strided_slice %66 {offsets = [0, 0], sizes = [2, 32], strides = [1, 1]} : vector<2x128xf32> to vector<2x32xf32>
    %68 = vector.extract_strided_slice %66 {offsets = [0, 32], sizes = [2, 32], strides = [1, 1]} : vector<2x128xf32> to vector<2x32xf32>
    %69 = vector.extract_strided_slice %66 {offsets = [0, 96], sizes = [2, 32], strides = [1, 1]} : vector<2x128xf32> to vector<2x32xf32>
    %70 = vector.extract_strided_slice %61 {offsets = [0, 64], sizes = [2, 32], strides = [1, 1]} : vector<2x128xf32> to vector<2x32xf32>
    %71 = math.tanh %70 : vector<2x32xf32>
    %72 = arith.mulf %68, %51 : vector<2x32xf32>
    %73 = arith.mulf %67, %71 : vector<2x32xf32>
    %74 = arith.addf %72, %73 : vector<2x32xf32>
    %75 = math.tanh %74 : vector<2x32xf32>
    %76 = arith.mulf %69, %75 : vector<2x32xf32>
    %c2 = arith.constant 2 : index
    %c0_22 = arith.constant 0 : index
    %c0_23 = arith.constant 0 : index
    %77 = vector.load %arg20[%c2, %c0_22, %c0_23] : memref<8x2x32xf32, #tpu.memory_space<vmem>>, vector<1x2x32xf32>
    %78 = vector.shape_cast %77 : vector<1x2x32xf32> to vector<2x32xf32>
    %79 = vector.shape_cast %76 : vector<2x32xf32> to vector<1x2x32xf32>
    tpu.vector_store %arg20[%c2, %c0_22, %c0_23], %79 {strides = array<i32>} : memref<8x2x32xf32, #tpu.memory_space<vmem>>, vector<1x2x32xf32>,
    %80 = vector.extract_strided_slice %7 {offsets = [3, 0, 0], sizes = [1, 2, 256], strides = [1, 1, 1]} : vector<8x2x256xf32> to vector<1x2x256xf32>
    %81 = vector.shape_cast %80 : vector<1x2x256xf32> to vector<2x256xf32>
    %82 = vector.extract_strided_slice %81 {offsets = [0, 0], sizes = [2, 128], strides = [1, 1]} : vector<2x256xf32> to vector<2x128xf32>
    %cst_24 = arith.constant dense<0.000000e+00> : vector<2x128xf32>
    %83 = tpu.matmul %76, %8, %cst_24 {dimension_numbers = #tpu.dot_dimension_numbers<[1], [0], [0], [1], [0, 0, 1, 1], [], []>} : vector<2x32xf32>, vector<32x128xf32>, vector<2x128xf32> -> vector<2x128xf32>
    %84 = arith.addf %82, %83 : vector<2x128xf32>
    %85 = arith.negf %84 : vector<2x128xf32>
    %86 = math.exp %85 : vector<2x128xf32>
    %cst_25 = arith.constant 1.000000e+00 : f32
    %87 = vector.broadcast %cst_25 : f32 to vector<2x128xf32>
    %88 = arith.addf %87, %86 : vector<2x128xf32>
    %89 = arith.divf %87, %88 : vector<2x128xf32>
    %90 = vector.extract_strided_slice %89 {offsets = [0, 0], sizes = [2, 32], strides = [1, 1]} : vector<2x128xf32> to vector<2x32xf32>
    %91 = vector.extract_strided_slice %89 {offsets = [0, 32], sizes = [2, 32], strides = [1, 1]} : vector<2x128xf32> to vector<2x32xf32>
    %92 = vector.extract_strided_slice %89 {offsets = [0, 96], sizes = [2, 32], strides = [1, 1]} : vector<2x128xf32> to vector<2x32xf32>
    %93 = vector.extract_strided_slice %84 {offsets = [0, 64], sizes = [2, 32], strides = [1, 1]} : vector<2x128xf32> to vector<2x32xf32>
    %94 = math.tanh %93 : vector<2x32xf32>
    %95 = arith.mulf %91, %74 : vector<2x32xf32>
    %96 = arith.mulf %90, %94 : vector<2x32xf32>
    %97 = arith.addf %95, %96 : vector<2x32xf32>
    %98 = math.tanh %97 : vector<2x32xf32>
    %99 = arith.mulf %92, %98 : vector<2x32xf32>
    %c3 = arith.constant 3 : index
    %c0_26 = arith.constant 0 : index
    %c0_27 = arith.constant 0 : index
    %100 = vector.load %arg20[%c3, %c0_26, %c0_27] : memref<8x2x32xf32, #tpu.memory_space<vmem>>, vector<1x2x32xf32>
    %101 = vector.shape_cast %100 : vector<1x2x32xf32> to vector<2x32xf32>
    %102 = vector.shape_cast %99 : vector<2x32xf32> to vector<1x2x32xf32>
    tpu.vector_store %arg20[%c3, %c0_26, %c0_27], %102 {strides = array<i32>} : memref<8x2x32xf32, #tpu.memory_space<vmem>>, vector<1x2x32xf32>,
    %103 = vector.extract_strided_slice %7 {offsets = [4, 0, 0], sizes = [1, 2, 256], strides = [1, 1, 1]} : vector<8x2x256xf32> to vector<1x2x256xf32>
    %104 = vector.shape_cast %103 : vector<1x2x256xf32> to vector<2x256xf32>
    %105 = vector.extract_strided_slice %104 {offsets = [0, 0], sizes = [2, 128], strides = [1, 1]} : vector<2x256xf32> to vector<2x128xf32>
    %cst_28 = arith.constant dense<0.000000e+00> : vector<2x128xf32>
    %106 = tpu.matmul %99, %8, %cst_28 {dimension_numbers = #tpu.dot_dimension_numbers<[1], [0], [0], [1], [0, 0, 1, 1], [], []>} : vector<2x32xf32>, vector<32x128xf32>, vector<2x128xf32> -> vector<2x128xf32>
    %107 = arith.addf %105, %106 : vector<2x128xf32>
    %108 = arith.negf %107 : vector<2x128xf32>
    %109 = math.exp %108 : vector<2x128xf32>
    %cst_29 = arith.constant 1.000000e+00 : f32
    %110 = vector.broadcast %cst_29 : f32 to vector<2x128xf32>
    %111 = arith.addf %110, %109 : vector<2x128xf32>
    %112 = arith.divf %110, %111 : vector<2x128xf32>
    %113 = vector.extract_strided_slice %112 {offsets = [0, 0], sizes = [2, 32], strides = [1, 1]} : vector<2x128xf32> to vector<2x32xf32>
    %114 = vector.extract_strided_slice %112 {offsets = [0, 32], sizes = [2, 32], strides = [1, 1]} : vector<2x128xf32> to vector<2x32xf32>
    %115 = vector.extract_strided_slice %112 {offsets = [0, 96], sizes = [2, 32], strides = [1, 1]} : vector<2x128xf32> to vector<2x32xf32>
    %116 = vector.extract_strided_slice %107 {offsets = [0, 64], sizes = [2, 32], strides = [1, 1]} : vector<2x128xf32> to vector<2x32xf32>
    %117 = math.tanh %116 : vector<2x32xf32>
    %118 = arith.mulf %114, %97 : vector<2x32xf32>
    %119 = arith.mulf %113, %117 : vector<2x32xf32>
    %120 = arith.addf %118, %119 : vector<2x32xf32>
    %121 = math.tanh %120 : vector<2x32xf32>
    %122 = arith.mulf %115, %121 : vector<2x32xf32>
    %c4 = arith.constant 4 : index
    %c0_30 = arith.constant 0 : index
    %c0_31 = arith.constant 0 : index
    %123 = vector.load %arg20[%c4, %c0_30, %c0_31] : memref<8x2x32xf32, #tpu.memory_space<vmem>>, vector<1x2x32xf32>
    %124 = vector.shape_cast %123 : vector<1x2x32xf32> to vector<2x32xf32>
    %125 = vector.shape_cast %122 : vector<2x32xf32> to vector<1x2x32xf32>
    tpu.vector_store %arg20[%c4, %c0_30, %c0_31], %125 {strides = array<i32>} : memref<8x2x32xf32, #tpu.memory_space<vmem>>, vector<1x2x32xf32>,
    %126 = vector.extract_strided_slice %7 {offsets = [5, 0, 0], sizes = [1, 2, 256], strides = [1, 1, 1]} : vector<8x2x256xf32> to vector<1x2x256xf32>
    %127 = vector.shape_cast %126 : vector<1x2x256xf32> to vector<2x256xf32>
    %128 = vector.extract_strided_slice %127 {offsets = [0, 0], sizes = [2, 128], strides = [1, 1]} : vector<2x256xf32> to vector<2x128xf32>
    %cst_32 = arith.constant dense<0.000000e+00> : vector<2x128xf32>
    %129 = tpu.matmul %122, %8, %cst_32 {dimension_numbers = #tpu.dot_dimension_numbers<[1], [0], [0], [1], [0, 0, 1, 1], [], []>} : vector<2x32xf32>, vector<32x128xf32>, vector<2x128xf32> -> vector<2x128xf32>
    %130 = arith.addf %128, %129 : vector<2x128xf32>
    %131 = arith.negf %130 : vector<2x128xf32>
    %132 = math.exp %131 : vector<2x128xf32>
    %cst_33 = arith.constant 1.000000e+00 : f32
    %133 = vector.broadcast %cst_33 : f32 to vector<2x128xf32>
    %134 = arith.addf %133, %132 : vector<2x128xf32>
    %135 = arith.divf %133, %134 : vector<2x128xf32>
    %136 = vector.extract_strided_slice %135 {offsets = [0, 0], sizes = [2, 32], strides = [1, 1]} : vector<2x128xf32> to vector<2x32xf32>
    %137 = vector.extract_strided_slice %135 {offsets = [0, 32], sizes = [2, 32], strides = [1, 1]} : vector<2x128xf32> to vector<2x32xf32>
    %138 = vector.extract_strided_slice %135 {offsets = [0, 96], sizes = [2, 32], strides = [1, 1]} : vector<2x128xf32> to vector<2x32xf32>
    %139 = vector.extract_strided_slice %130 {offsets = [0, 64], sizes = [2, 32], strides = [1, 1]} : vector<2x128xf32> to vector<2x32xf32>
    %140 = math.tanh %139 : vector<2x32xf32>
    %141 = arith.mulf %137, %120 : vector<2x32xf32>
    %142 = arith.mulf %136, %140 : vector<2x32xf32>
    %143 = arith.addf %141, %142 : vector<2x32xf32>
    %144 = math.tanh %143 : vector<2x32xf32>
    %145 = arith.mulf %138, %144 : vector<2x32xf32>
    %c5 = arith.constant 5 : index
    %c0_34 = arith.constant 0 : index
    %c0_35 = arith.constant 0 : index
    %146 = vector.load %arg20[%c5, %c0_34, %c0_35] : memref<8x2x32xf32, #tpu.memory_space<vmem>>, vector<1x2x32xf32>
    %147 = vector.shape_cast %146 : vector<1x2x32xf32> to vector<2x32xf32>
    %148 = vector.shape_cast %145 : vector<2x32xf32> to vector<1x2x32xf32>
    tpu.vector_store %arg20[%c5, %c0_34, %c0_35], %148 {strides = array<i32>} : memref<8x2x32xf32, #tpu.memory_space<vmem>>, vector<1x2x32xf32>,
    %149 = vector.extract_strided_slice %7 {offsets = [6, 0, 0], sizes = [1, 2, 256], strides = [1, 1, 1]} : vector<8x2x256xf32> to vector<1x2x256xf32>
    %150 = vector.shape_cast %149 : vector<1x2x256xf32> to vector<2x256xf32>
    %151 = vector.extract_strided_slice %150 {offsets = [0, 0], sizes = [2, 128], strides = [1, 1]} : vector<2x256xf32> to vector<2x128xf32>
    %cst_36 = arith.constant dense<0.000000e+00> : vector<2x128xf32>
    %152 = tpu.matmul %145, %8, %cst_36 {dimension_numbers = #tpu.dot_dimension_numbers<[1], [0], [0], [1], [0, 0, 1, 1], [], []>} : vector<2x32xf32>, vector<32x128xf32>, vector<2x128xf32> -> vector<2x128xf32>
    %153 = arith.addf %151, %152 : vector<2x128xf32>
    %154 = arith.negf %153 : vector<2x128xf32>
    %155 = math.exp %154 : vector<2x128xf32>
    %cst_37 = arith.constant 1.000000e+00 : f32
    %156 = vector.broadcast %cst_37 : f32 to vector<2x128xf32>
    %157 = arith.addf %156, %155 : vector<2x128xf32>
    %158 = arith.divf %156, %157 : vector<2x128xf32>
    %159 = vector.extract_strided_slice %158 {offsets = [0, 0], sizes = [2, 32], strides = [1, 1]} : vector<2x128xf32> to vector<2x32xf32>
    %160 = vector.extract_strided_slice %158 {offsets = [0, 32], sizes = [2, 32], strides = [1, 1]} : vector<2x128xf32> to vector<2x32xf32>
    %161 = vector.extract_strided_slice %158 {offsets = [0, 96], sizes = [2, 32], strides = [1, 1]} : vector<2x128xf32> to vector<2x32xf32>
    %162 = vector.extract_strided_slice %153 {offsets = [0, 64], sizes = [2, 32], strides = [1, 1]} : vector<2x128xf32> to vector<2x32xf32>
    %163 = math.tanh %162 : vector<2x32xf32>
    %164 = arith.mulf %160, %143 : vector<2x32xf32>
    %165 = arith.mulf %159, %163 : vector<2x32xf32>
    %166 = arith.addf %164, %165 : vector<2x32xf32>
    %167 = math.tanh %166 : vector<2x32xf32>
    %168 = arith.mulf %161, %167 : vector<2x32xf32>
    %c6 = arith.constant 6 : index
    %c0_38 = arith.constant 0 : index
    %c0_39 = arith.constant 0 : index
    %169 = vector.load %arg20[%c6, %c0_38, %c0_39] : memref<8x2x32xf32, #tpu.memory_space<vmem>>, vector<1x2x32xf32>
    %170 = vector.shape_cast %169 : vector<1x2x32xf32> to vector<2x32xf32>
    %171 = vector.shape_cast %168 : vector<2x32xf32> to vector<1x2x32xf32>
    tpu.vector_store %arg20[%c6, %c0_38, %c0_39], %171 {strides = array<i32>} : memref<8x2x32xf32, #tpu.memory_space<vmem>>, vector<1x2x32xf32>,
    %172 = vector.extract_strided_slice %7 {offsets = [7, 0, 0], sizes = [1, 2, 256], strides = [1, 1, 1]} : vector<8x2x256xf32> to vector<1x2x256xf32>
    %173 = vector.shape_cast %172 : vector<1x2x256xf32> to vector<2x256xf32>
    %174 = vector.extract_strided_slice %173 {offsets = [0, 0], sizes = [2, 128], strides = [1, 1]} : vector<2x256xf32> to vector<2x128xf32>
    %cst_40 = arith.constant dense<0.000000e+00> : vector<2x128xf32>
    %175 = tpu.matmul %168, %8, %cst_40 {dimension_numbers = #tpu.dot_dimension_numbers<[1], [0], [0], [1], [0, 0, 1, 1], [], []>} : vector<2x32xf32>, vector<32x128xf32>, vector<2x128xf32> -> vector<2x128xf32>
    %176 = arith.addf %174, %175 : vector<2x128xf32>
    %177 = arith.negf %176 : vector<2x128xf32>
    %178 = math.exp %177 : vector<2x128xf32>
    %cst_41 = arith.constant 1.000000e+00 : f32
    %179 = vector.broadcast %cst_41 : f32 to vector<2x128xf32>
    %180 = arith.addf %179, %178 : vector<2x128xf32>
    %181 = arith.divf %179, %180 : vector<2x128xf32>
    %182 = vector.extract_strided_slice %181 {offsets = [0, 0], sizes = [2, 32], strides = [1, 1]} : vector<2x128xf32> to vector<2x32xf32>
    %183 = vector.extract_strided_slice %181 {offsets = [0, 32], sizes = [2, 32], strides = [1, 1]} : vector<2x128xf32> to vector<2x32xf32>
    %184 = vector.extract_strided_slice %181 {offsets = [0, 96], sizes = [2, 32], strides = [1, 1]} : vector<2x128xf32> to vector<2x32xf32>
    %185 = vector.extract_strided_slice %176 {offsets = [0, 64], sizes = [2, 32], strides = [1, 1]} : vector<2x128xf32> to vector<2x32xf32>
    %186 = math.tanh %185 : vector<2x32xf32>
    %187 = arith.mulf %183, %166 : vector<2x32xf32>
    %188 = arith.mulf %182, %186 : vector<2x32xf32>
    %189 = arith.addf %187, %188 : vector<2x32xf32>
    %190 = math.tanh %189 : vector<2x32xf32>
    %191 = arith.mulf %184, %190 : vector<2x32xf32>
    %c7 = arith.constant 7 : index
    %c0_42 = arith.constant 0 : index
    %c0_43 = arith.constant 0 : index
    %192 = vector.load %arg20[%c7, %c0_42, %c0_43] : memref<8x2x32xf32, #tpu.memory_space<vmem>>, vector<1x2x32xf32>
    %193 = vector.shape_cast %192 : vector<1x2x32xf32> to vector<2x32xf32>
    %194 = vector.shape_cast %191 : vector<2x32xf32> to vector<1x2x32xf32>
    tpu.vector_store %arg20[%c7, %c0_42, %c0_43], %194 {strides = array<i32>} : memref<8x2x32xf32, #tpu.memory_space<vmem>>, vector<1x2x32xf32>,
    %195 = vector.extract_strided_slice %7 {offsets = [7, 0, 0], sizes = [1, 2, 256], strides = [1, 1, 1]} : vector<8x2x256xf32> to vector<1x2x256xf32>
    %196 = vector.shape_cast %195 : vector<1x2x256xf32> to vector<2x256xf32>
    %197 = vector.extract_strided_slice %196 {offsets = [0, 128], sizes = [2, 128], strides = [1, 1]} : vector<2x256xf32> to vector<2x128xf32>
    %cst_44 = arith.constant dense<0.000000e+00> : vector<2x128xf32>
    %198 = tpu.matmul %10, %9, %cst_44 {dimension_numbers = #tpu.dot_dimension_numbers<[1], [0], [0], [1], [0, 0, 1, 1], [], []>} : vector<2x32xf32>, vector<32x128xf32>, vector<2x128xf32> -> vector<2x128xf32>
    %199 = arith.addf %197, %198 : vector<2x128xf32>
    %200 = arith.negf %199 : vector<2x128xf32>
    %201 = math.exp %200 : vector<2x128xf32>
    %cst_45 = arith.constant 1.000000e+00 : f32
    %202 = vector.broadcast %cst_45 : f32 to vector<2x128xf32>
    %203 = arith.addf %202, %201 : vector<2x128xf32>
    %204 = arith.divf %202, %203 : vector<2x128xf32>
    %205 = vector.extract_strided_slice %204 {offsets = [0, 0], sizes = [2, 32], strides = [1, 1]} : vector<2x128xf32> to vector<2x32xf32>
    %206 = vector.extract_strided_slice %204 {offsets = [0, 32], sizes = [2, 32], strides = [1, 1]} : vector<2x128xf32> to vector<2x32xf32>
    %207 = vector.extract_strided_slice %204 {offsets = [0, 96], sizes = [2, 32], strides = [1, 1]} : vector<2x128xf32> to vector<2x32xf32>
    %208 = vector.extract_strided_slice %199 {offsets = [0, 64], sizes = [2, 32], strides = [1, 1]} : vector<2x128xf32> to vector<2x32xf32>
    %209 = math.tanh %208 : vector<2x32xf32>
    %210 = arith.mulf %206, %10 : vector<2x32xf32>
    %211 = arith.mulf %205, %209 : vector<2x32xf32>
    %212 = arith.addf %210, %211 : vector<2x32xf32>
    %213 = math.tanh %212 : vector<2x32xf32>
    %214 = arith.mulf %207, %213 : vector<2x32xf32>
    %c7_46 = arith.constant 7 : index
    %c0_47 = arith.constant 0 : index
    %c0_48 = arith.constant 0 : index
    %215 = vector.load %arg21[%c7_46, %c0_47, %c0_48] : memref<8x2x32xf32, #tpu.memory_space<vmem>>, vector<1x2x32xf32>
    %216 = vector.shape_cast %215 : vector<1x2x32xf32> to vector<2x32xf32>
    %217 = vector.shape_cast %214 : vector<2x32xf32> to vector<1x2x32xf32>
    tpu.vector_store %arg21[%c7_46, %c0_47, %c0_48], %217 {strides = array<i32>} : memref<8x2x32xf32, #tpu.memory_space<vmem>>, vector<1x2x32xf32>,
    %218 = vector.extract_strided_slice %7 {offsets = [6, 0, 0], sizes = [1, 2, 256], strides = [1, 1, 1]} : vector<8x2x256xf32> to vector<1x2x256xf32>
    %219 = vector.shape_cast %218 : vector<1x2x256xf32> to vector<2x256xf32>
    %220 = vector.extract_strided_slice %219 {offsets = [0, 128], sizes = [2, 128], strides = [1, 1]} : vector<2x256xf32> to vector<2x128xf32>
    %cst_49 = arith.constant dense<0.000000e+00> : vector<2x128xf32>
    %221 = tpu.matmul %214, %9, %cst_49 {dimension_numbers = #tpu.dot_dimension_numbers<[1], [0], [0], [1], [0, 0, 1, 1], [], []>} : vector<2x32xf32>, vector<32x128xf32>, vector<2x128xf32> -> vector<2x128xf32>
    %222 = arith.addf %220, %221 : vector<2x128xf32>
    %223 = arith.negf %222 : vector<2x128xf32>
    %224 = math.exp %223 : vector<2x128xf32>
    %cst_50 = arith.constant 1.000000e+00 : f32
    %225 = vector.broadcast %cst_50 : f32 to vector<2x128xf32>
    %226 = arith.addf %225, %224 : vector<2x128xf32>
    %227 = arith.divf %225, %226 : vector<2x128xf32>
    %228 = vector.extract_strided_slice %227 {offsets = [0, 0], sizes = [2, 32], strides = [1, 1]} : vector<2x128xf32> to vector<2x32xf32>
    %229 = vector.extract_strided_slice %227 {offsets = [0, 32], sizes = [2, 32], strides = [1, 1]} : vector<2x128xf32> to vector<2x32xf32>
    %230 = vector.extract_strided_slice %227 {offsets = [0, 96], sizes = [2, 32], strides = [1, 1]} : vector<2x128xf32> to vector<2x32xf32>
    %231 = vector.extract_strided_slice %222 {offsets = [0, 64], sizes = [2, 32], strides = [1, 1]} : vector<2x128xf32> to vector<2x32xf32>
    %232 = math.tanh %231 : vector<2x32xf32>
    %233 = arith.mulf %229, %212 : vector<2x32xf32>
    %234 = arith.mulf %228, %232 : vector<2x32xf32>
    %235 = arith.addf %233, %234 : vector<2x32xf32>
    %236 = math.tanh %235 : vector<2x32xf32>
    %237 = arith.mulf %230, %236 : vector<2x32xf32>
    %c6_51 = arith.constant 6 : index
    %c0_52 = arith.constant 0 : index
    %c0_53 = arith.constant 0 : index
    %238 = vector.load %arg21[%c6_51, %c0_52, %c0_53] : memref<8x2x32xf32, #tpu.memory_space<vmem>>, vector<1x2x32xf32>
    %239 = vector.shape_cast %238 : vector<1x2x32xf32> to vector<2x32xf32>
    %240 = vector.shape_cast %237 : vector<2x32xf32> to vector<1x2x32xf32>
    tpu.vector_store %arg21[%c6_51, %c0_52, %c0_53], %240 {strides = array<i32>} : memref<8x2x32xf32, #tpu.memory_space<vmem>>, vector<1x2x32xf32>,
    %241 = vector.extract_strided_slice %7 {offsets = [5, 0, 0], sizes = [1, 2, 256], strides = [1, 1, 1]} : vector<8x2x256xf32> to vector<1x2x256xf32>
    %242 = vector.shape_cast %241 : vector<1x2x256xf32> to vector<2x256xf32>
    %243 = vector.extract_strided_slice %242 {offsets = [0, 128], sizes = [2, 128], strides = [1, 1]} : vector<2x256xf32> to vector<2x128xf32>
    %cst_54 = arith.constant dense<0.000000e+00> : vector<2x128xf32>
    %244 = tpu.matmul %237, %9, %cst_54 {dimension_numbers = #tpu.dot_dimension_numbers<[1], [0], [0], [1], [0, 0, 1, 1], [], []>} : vector<2x32xf32>, vector<32x128xf32>, vector<2x128xf32> -> vector<2x128xf32>
    %245 = arith.addf %243, %244 : vector<2x128xf32>
    %246 = arith.negf %245 : vector<2x128xf32>
    %247 = math.exp %246 : vector<2x128xf32>
    %cst_55 = arith.constant 1.000000e+00 : f32
    %248 = vector.broadcast %cst_55 : f32 to vector<2x128xf32>
    %249 = arith.addf %248, %247 : vector<2x128xf32>
    %250 = arith.divf %248, %249 : vector<2x128xf32>
    %251 = vector.extract_strided_slice %250 {offsets = [0, 0], sizes = [2, 32], strides = [1, 1]} : vector<2x128xf32> to vector<2x32xf32>
    %252 = vector.extract_strided_slice %250 {offsets = [0, 32], sizes = [2, 32], strides = [1, 1]} : vector<2x128xf32> to vector<2x32xf32>
    %253 = vector.extract_strided_slice %250 {offsets = [0, 96], sizes = [2, 32], strides = [1, 1]} : vector<2x128xf32> to vector<2x32xf32>
    %254 = vector.extract_strided_slice %245 {offsets = [0, 64], sizes = [2, 32], strides = [1, 1]} : vector<2x128xf32> to vector<2x32xf32>
    %255 = math.tanh %254 : vector<2x32xf32>
    %256 = arith.mulf %252, %235 : vector<2x32xf32>
    %257 = arith.mulf %251, %255 : vector<2x32xf32>
    %258 = arith.addf %256, %257 : vector<2x32xf32>
    %259 = math.tanh %258 : vector<2x32xf32>
    %260 = arith.mulf %253, %259 : vector<2x32xf32>
    %c5_56 = arith.constant 5 : index
    %c0_57 = arith.constant 0 : index
    %c0_58 = arith.constant 0 : index
    %261 = vector.load %arg21[%c5_56, %c0_57, %c0_58] : memref<8x2x32xf32, #tpu.memory_space<vmem>>, vector<1x2x32xf32>
    %262 = vector.shape_cast %261 : vector<1x2x32xf32> to vector<2x32xf32>
    %263 = vector.shape_cast %260 : vector<2x32xf32> to vector<1x2x32xf32>
    tpu.vector_store %arg21[%c5_56, %c0_57, %c0_58], %263 {strides = array<i32>} : memref<8x2x32xf32, #tpu.memory_space<vmem>>, vector<1x2x32xf32>,
    %264 = vector.extract_strided_slice %7 {offsets = [4, 0, 0], sizes = [1, 2, 256], strides = [1, 1, 1]} : vector<8x2x256xf32> to vector<1x2x256xf32>
    %265 = vector.shape_cast %264 : vector<1x2x256xf32> to vector<2x256xf32>
    %266 = vector.extract_strided_slice %265 {offsets = [0, 128], sizes = [2, 128], strides = [1, 1]} : vector<2x256xf32> to vector<2x128xf32>
    %cst_59 = arith.constant dense<0.000000e+00> : vector<2x128xf32>
    %267 = tpu.matmul %260, %9, %cst_59 {dimension_numbers = #tpu.dot_dimension_numbers<[1], [0], [0], [1], [0, 0, 1, 1], [], []>} : vector<2x32xf32>, vector<32x128xf32>, vector<2x128xf32> -> vector<2x128xf32>
    %268 = arith.addf %266, %267 : vector<2x128xf32>
    %269 = arith.negf %268 : vector<2x128xf32>
    %270 = math.exp %269 : vector<2x128xf32>
    %cst_60 = arith.constant 1.000000e+00 : f32
    %271 = vector.broadcast %cst_60 : f32 to vector<2x128xf32>
    %272 = arith.addf %271, %270 : vector<2x128xf32>
    %273 = arith.divf %271, %272 : vector<2x128xf32>
    %274 = vector.extract_strided_slice %273 {offsets = [0, 0], sizes = [2, 32], strides = [1, 1]} : vector<2x128xf32> to vector<2x32xf32>
    %275 = vector.extract_strided_slice %273 {offsets = [0, 32], sizes = [2, 32], strides = [1, 1]} : vector<2x128xf32> to vector<2x32xf32>
    %276 = vector.extract_strided_slice %273 {offsets = [0, 96], sizes = [2, 32], strides = [1, 1]} : vector<2x128xf32> to vector<2x32xf32>
    %277 = vector.extract_strided_slice %268 {offsets = [0, 64], sizes = [2, 32], strides = [1, 1]} : vector<2x128xf32> to vector<2x32xf32>
    %278 = math.tanh %277 : vector<2x32xf32>
    %279 = arith.mulf %275, %258 : vector<2x32xf32>
    %280 = arith.mulf %274, %278 : vector<2x32xf32>
    %281 = arith.addf %279, %280 : vector<2x32xf32>
    %282 = math.tanh %281 : vector<2x32xf32>
    %283 = arith.mulf %276, %282 : vector<2x32xf32>
    %c4_61 = arith.constant 4 : index
    %c0_62 = arith.constant 0 : index
    %c0_63 = arith.constant 0 : index
    %284 = vector.load %arg21[%c4_61, %c0_62, %c0_63] : memref<8x2x32xf32, #tpu.memory_space<vmem>>, vector<1x2x32xf32>
    %285 = vector.shape_cast %284 : vector<1x2x32xf32> to vector<2x32xf32>
    %286 = vector.shape_cast %283 : vector<2x32xf32> to vector<1x2x32xf32>
    tpu.vector_store %arg21[%c4_61, %c0_62, %c0_63], %286 {strides = array<i32>} : memref<8x2x32xf32, #tpu.memory_space<vmem>>, vector<1x2x32xf32>,
    %287 = vector.extract_strided_slice %7 {offsets = [3, 0, 0], sizes = [1, 2, 256], strides = [1, 1, 1]} : vector<8x2x256xf32> to vector<1x2x256xf32>
    %288 = vector.shape_cast %287 : vector<1x2x256xf32> to vector<2x256xf32>
    %289 = vector.extract_strided_slice %288 {offsets = [0, 128], sizes = [2, 128], strides = [1, 1]} : vector<2x256xf32> to vector<2x128xf32>
    %cst_64 = arith.constant dense<0.000000e+00> : vector<2x128xf32>
    %290 = tpu.matmul %283, %9, %cst_64 {dimension_numbers = #tpu.dot_dimension_numbers<[1], [0], [0], [1], [0, 0, 1, 1], [], []>} : vector<2x32xf32>, vector<32x128xf32>, vector<2x128xf32> -> vector<2x128xf32>
    %291 = arith.addf %289, %290 : vector<2x128xf32>
    %292 = arith.negf %291 : vector<2x128xf32>
    %293 = math.exp %292 : vector<2x128xf32>
    %cst_65 = arith.constant 1.000000e+00 : f32
    %294 = vector.broadcast %cst_65 : f32 to vector<2x128xf32>
    %295 = arith.addf %294, %293 : vector<2x128xf32>
    %296 = arith.divf %294, %295 : vector<2x128xf32>
    %297 = vector.extract_strided_slice %296 {offsets = [0, 0], sizes = [2, 32], strides = [1, 1]} : vector<2x128xf32> to vector<2x32xf32>
    %298 = vector.extract_strided_slice %296 {offsets = [0, 32], sizes = [2, 32], strides = [1, 1]} : vector<2x128xf32> to vector<2x32xf32>
    %299 = vector.extract_strided_slice %296 {offsets = [0, 96], sizes = [2, 32], strides = [1, 1]} : vector<2x128xf32> to vector<2x32xf32>
    %300 = vector.extract_strided_slice %291 {offsets = [0, 64], sizes = [2, 32], strides = [1, 1]} : vector<2x128xf32> to vector<2x32xf32>
    %301 = math.tanh %300 : vector<2x32xf32>
    %302 = arith.mulf %298, %281 : vector<2x32xf32>
    %303 = arith.mulf %297, %301 : vector<2x32xf32>
    %304 = arith.addf %302, %303 : vector<2x32xf32>
    %305 = math.tanh %304 : vector<2x32xf32>
    %306 = arith.mulf %299, %305 : vector<2x32xf32>
    %c3_66 = arith.constant 3 : index
    %c0_67 = arith.constant 0 : index
    %c0_68 = arith.constant 0 : index
    %307 = vector.load %arg21[%c3_66, %c0_67, %c0_68] : memref<8x2x32xf32, #tpu.memory_space<vmem>>, vector<1x2x32xf32>
    %308 = vector.shape_cast %307 : vector<1x2x32xf32> to vector<2x32xf32>
    %309 = vector.shape_cast %306 : vector<2x32xf32> to vector<1x2x32xf32>
    tpu.vector_store %arg21[%c3_66, %c0_67, %c0_68], %309 {strides = array<i32>} : memref<8x2x32xf32, #tpu.memory_space<vmem>>, vector<1x2x32xf32>,
    %310 = vector.extract_strided_slice %7 {offsets = [2, 0, 0], sizes = [1, 2, 256], strides = [1, 1, 1]} : vector<8x2x256xf32> to vector<1x2x256xf32>
    %311 = vector.shape_cast %310 : vector<1x2x256xf32> to vector<2x256xf32>
    %312 = vector.extract_strided_slice %311 {offsets = [0, 128], sizes = [2, 128], strides = [1, 1]} : vector<2x256xf32> to vector<2x128xf32>
    %cst_69 = arith.constant dense<0.000000e+00> : vector<2x128xf32>
    %313 = tpu.matmul %306, %9, %cst_69 {dimension_numbers = #tpu.dot_dimension_numbers<[1], [0], [0], [1], [0, 0, 1, 1], [], []>} : vector<2x32xf32>, vector<32x128xf32>, vector<2x128xf32> -> vector<2x128xf32>
    %314 = arith.addf %312, %313 : vector<2x128xf32>
    %315 = arith.negf %314 : vector<2x128xf32>
    %316 = math.exp %315 : vector<2x128xf32>
    %cst_70 = arith.constant 1.000000e+00 : f32
    %317 = vector.broadcast %cst_70 : f32 to vector<2x128xf32>
    %318 = arith.addf %317, %316 : vector<2x128xf32>
    %319 = arith.divf %317, %318 : vector<2x128xf32>
    %320 = vector.extract_strided_slice %319 {offsets = [0, 0], sizes = [2, 32], strides = [1, 1]} : vector<2x128xf32> to vector<2x32xf32>
    %321 = vector.extract_strided_slice %319 {offsets = [0, 32], sizes = [2, 32], strides = [1, 1]} : vector<2x128xf32> to vector<2x32xf32>
    %322 = vector.extract_strided_slice %319 {offsets = [0, 96], sizes = [2, 32], strides = [1, 1]} : vector<2x128xf32> to vector<2x32xf32>
    %323 = vector.extract_strided_slice %314 {offsets = [0, 64], sizes = [2, 32], strides = [1, 1]} : vector<2x128xf32> to vector<2x32xf32>
    %324 = math.tanh %323 : vector<2x32xf32>
    %325 = arith.mulf %321, %304 : vector<2x32xf32>
    %326 = arith.mulf %320, %324 : vector<2x32xf32>
    %327 = arith.addf %325, %326 : vector<2x32xf32>
    %328 = math.tanh %327 : vector<2x32xf32>
    %329 = arith.mulf %322, %328 : vector<2x32xf32>
    %c2_71 = arith.constant 2 : index
    %c0_72 = arith.constant 0 : index
    %c0_73 = arith.constant 0 : index
    %330 = vector.load %arg21[%c2_71, %c0_72, %c0_73] : memref<8x2x32xf32, #tpu.memory_space<vmem>>, vector<1x2x32xf32>
    %331 = vector.shape_cast %330 : vector<1x2x32xf32> to vector<2x32xf32>
    %332 = vector.shape_cast %329 : vector<2x32xf32> to vector<1x2x32xf32>
    tpu.vector_store %arg21[%c2_71, %c0_72, %c0_73], %332 {strides = array<i32>} : memref<8x2x32xf32, #tpu.memory_space<vmem>>, vector<1x2x32xf32>,
    %333 = vector.extract_strided_slice %7 {offsets = [1, 0, 0], sizes = [1, 2, 256], strides = [1, 1, 1]} : vector<8x2x256xf32> to vector<1x2x256xf32>
    %334 = vector.shape_cast %333 : vector<1x2x256xf32> to vector<2x256xf32>
    %335 = vector.extract_strided_slice %334 {offsets = [0, 128], sizes = [2, 128], strides = [1, 1]} : vector<2x256xf32> to vector<2x128xf32>
    %cst_74 = arith.constant dense<0.000000e+00> : vector<2x128xf32>
    %336 = tpu.matmul %329, %9, %cst_74 {dimension_numbers = #tpu.dot_dimension_numbers<[1], [0], [0], [1], [0, 0, 1, 1], [], []>} : vector<2x32xf32>, vector<32x128xf32>, vector<2x128xf32> -> vector<2x128xf32>
    %337 = arith.addf %335, %336 : vector<2x128xf32>
    %338 = arith.negf %337 : vector<2x128xf32>
    %339 = math.exp %338 : vector<2x128xf32>
    %cst_75 = arith.constant 1.000000e+00 : f32
    %340 = vector.broadcast %cst_75 : f32 to vector<2x128xf32>
    %341 = arith.addf %340, %339 : vector<2x128xf32>
    %342 = arith.divf %340, %341 : vector<2x128xf32>
    %343 = vector.extract_strided_slice %342 {offsets = [0, 0], sizes = [2, 32], strides = [1, 1]} : vector<2x128xf32> to vector<2x32xf32>
    %344 = vector.extract_strided_slice %342 {offsets = [0, 32], sizes = [2, 32], strides = [1, 1]} : vector<2x128xf32> to vector<2x32xf32>
    %345 = vector.extract_strided_slice %342 {offsets = [0, 96], sizes = [2, 32], strides = [1, 1]} : vector<2x128xf32> to vector<2x32xf32>
    %346 = vector.extract_strided_slice %337 {offsets = [0, 64], sizes = [2, 32], strides = [1, 1]} : vector<2x128xf32> to vector<2x32xf32>
    %347 = math.tanh %346 : vector<2x32xf32>
    %348 = arith.mulf %344, %327 : vector<2x32xf32>
    %349 = arith.mulf %343, %347 : vector<2x32xf32>
    %350 = arith.addf %348, %349 : vector<2x32xf32>
    %351 = math.tanh %350 : vector<2x32xf32>
    %352 = arith.mulf %345, %351 : vector<2x32xf32>
    %c1_76 = arith.constant 1 : index
    %c0_77 = arith.constant 0 : index
    %c0_78 = arith.constant 0 : index
    %353 = vector.load %arg21[%c1_76, %c0_77, %c0_78] : memref<8x2x32xf32, #tpu.memory_space<vmem>>, vector<1x2x32xf32>
    %354 = vector.shape_cast %353 : vector<1x2x32xf32> to vector<2x32xf32>
    %355 = vector.shape_cast %352 : vector<2x32xf32> to vector<1x2x32xf32>
    tpu.vector_store %arg21[%c1_76, %c0_77, %c0_78], %355 {strides = array<i32>} : memref<8x2x32xf32, #tpu.memory_space<vmem>>, vector<1x2x32xf32>,
    %356 = vector.extract_strided_slice %7 {offsets = [0, 0, 0], sizes = [1, 2, 256], strides = [1, 1, 1]} : vector<8x2x256xf32> to vector<1x2x256xf32>
    %357 = vector.shape_cast %356 : vector<1x2x256xf32> to vector<2x256xf32>
    %358 = vector.extract_strided_slice %357 {offsets = [0, 128], sizes = [2, 128], strides = [1, 1]} : vector<2x256xf32> to vector<2x128xf32>
    %cst_79 = arith.constant dense<0.000000e+00> : vector<2x128xf32>
    %359 = tpu.matmul %352, %9, %cst_79 {dimension_numbers = #tpu.dot_dimension_numbers<[1], [0], [0], [1], [0, 0, 1, 1], [], []>} : vector<2x32xf32>, vector<32x128xf32>, vector<2x128xf32> -> vector<2x128xf32>
    %360 = arith.addf %358, %359 : vector<2x128xf32>
    %361 = arith.negf %360 : vector<2x128xf32>
    %362 = math.exp %361 : vector<2x128xf32>
    %cst_80 = arith.constant 1.000000e+00 : f32
    %363 = vector.broadcast %cst_80 : f32 to vector<2x128xf32>
    %364 = arith.addf %363, %362 : vector<2x128xf32>
    %365 = arith.divf %363, %364 : vector<2x128xf32>
    %366 = vector.extract_strided_slice %365 {offsets = [0, 0], sizes = [2, 32], strides = [1, 1]} : vector<2x128xf32> to vector<2x32xf32>
    %367 = vector.extract_strided_slice %365 {offsets = [0, 32], sizes = [2, 32], strides = [1, 1]} : vector<2x128xf32> to vector<2x32xf32>
    %368 = vector.extract_strided_slice %365 {offsets = [0, 96], sizes = [2, 32], strides = [1, 1]} : vector<2x128xf32> to vector<2x32xf32>
    %369 = vector.extract_strided_slice %360 {offsets = [0, 64], sizes = [2, 32], strides = [1, 1]} : vector<2x128xf32> to vector<2x32xf32>
    %370 = math.tanh %369 : vector<2x32xf32>
    %371 = arith.mulf %367, %350 : vector<2x32xf32>
    %372 = arith.mulf %366, %370 : vector<2x32xf32>
    %373 = arith.addf %371, %372 : vector<2x32xf32>
    %374 = math.tanh %373 : vector<2x32xf32>
    %375 = arith.mulf %368, %374 : vector<2x32xf32>
    %c0_81 = arith.constant 0 : index
    %c0_82 = arith.constant 0 : index
    %c0_83 = arith.constant 0 : index
    %376 = vector.load %arg21[%c0_81, %c0_82, %c0_83] : memref<8x2x32xf32, #tpu.memory_space<vmem>>, vector<1x2x32xf32>
    %377 = vector.shape_cast %376 : vector<1x2x32xf32> to vector<2x32xf32>
    %378 = vector.shape_cast %375 : vector<2x32xf32> to vector<1x2x32xf32>
    tpu.vector_store %arg21[%c0_81, %c0_82, %c0_83], %378 {strides = array<i32>} : memref<8x2x32xf32, #tpu.memory_space<vmem>>, vector<1x2x32xf32>,
    %c0_84 = arith.constant 0 : index
    %c0_85 = arith.constant 0 : index
    %c0_86 = arith.constant 0 : index
    %379 = vector.load %arg20[%c0_84, %c0_85, %c0_86] : memref<8x2x32xf32, #tpu.memory_space<vmem>>, vector<8x2x32xf32>
    %380 = vector.shape_cast %379 : vector<8x2x32xf32> to vector<16x32xf32>
    %c0_87 = arith.constant 0 : index
    %c0_88 = arith.constant 0 : index
    %c0_89 = arith.constant 0 : index
    %381 = vector.load %arg21[%c0_87, %c0_88, %c0_89] : memref<8x2x32xf32, #tpu.memory_space<vmem>>, vector<8x2x32xf32>
    %382 = vector.shape_cast %381 : vector<8x2x32xf32> to vector<16x32xf32>
    %c0_90 = arith.constant 0 : index
    %c0_91 = arith.constant 0 : index
    %383 = vector.load %arg5[%c0_90, %c0_91] : memref<32x256xf32, #tpu.memory_space<vmem>>, vector<32x256xf32>
    %cst_92 = arith.constant dense<0.000000e+00> : vector<16x256xf32>
    %384 = tpu.matmul %380, %383, %cst_92 {dimension_numbers = #tpu.dot_dimension_numbers<[1], [0], [0], [1], [0, 0, 1, 1], [], []>} : vector<16x32xf32>, vector<32x256xf32>, vector<16x256xf32> -> vector<16x256xf32>
    %c0_93 = arith.constant 0 : index
    %c0_94 = arith.constant 0 : index
    %385 = vector.load %arg6[%c0_93, %c0_94] : memref<32x256xf32, #tpu.memory_space<vmem>>, vector<32x256xf32>
    %cst_95 = arith.constant dense<0.000000e+00> : vector<16x256xf32>
    %386 = tpu.matmul %382, %385, %cst_95 {dimension_numbers = #tpu.dot_dimension_numbers<[1], [0], [0], [1], [0, 0, 1, 1], [], []>} : vector<16x32xf32>, vector<32x256xf32>, vector<16x256xf32> -> vector<16x256xf32>
    %387 = arith.addf %384, %386 : vector<16x256xf32>
    %c0_96 = arith.constant 0 : index
    %c0_97 = arith.constant 0 : index
    %388 = vector.load %arg7[%c0_96, %c0_97] : memref<1x256xf32, #tpu.memory_space<vmem>>, vector<1x256xf32>
    %389 = vector.broadcast %388 : vector<1x256xf32> to vector<16x256xf32>
    %390 = arith.addf %387, %389 : vector<16x256xf32>
    %391 = vector.shape_cast %390 : vector<16x256xf32> to vector<8x2x256xf32>
    %c0_98 = arith.constant 0 : index
    %c0_99 = arith.constant 0 : index
    %392 = vector.load %arg8[%c0_98, %c0_99] : memref<32x128xf32, #tpu.memory_space<vmem>>, vector<32x128xf32>
    %c0_100 = arith.constant 0 : index
    %c0_101 = arith.constant 0 : index
    %393 = vector.load %arg9[%c0_100, %c0_101] : memref<32x128xf32, #tpu.memory_space<vmem>>, vector<32x128xf32>
    %394 = vector.extract_strided_slice %391 {offsets = [0, 0, 0], sizes = [1, 2, 256], strides = [1, 1, 1]} : vector<8x2x256xf32> to vector<1x2x256xf32>
    %395 = vector.shape_cast %394 : vector<1x2x256xf32> to vector<2x256xf32>
    %396 = vector.extract_strided_slice %395 {offsets = [0, 0], sizes = [2, 128], strides = [1, 1]} : vector<2x256xf32> to vector<2x128xf32>
    %cst_102 = arith.constant dense<0.000000e+00> : vector<2x128xf32>
    %397 = tpu.matmul %10, %392, %cst_102 {dimension_numbers = #tpu.dot_dimension_numbers<[1], [0], [0], [1], [0, 0, 1, 1], [], []>} : vector<2x32xf32>, vector<32x128xf32>, vector<2x128xf32> -> vector<2x128xf32>
    %398 = arith.addf %396, %397 : vector<2x128xf32>
    %399 = arith.negf %398 : vector<2x128xf32>
    %400 = math.exp %399 : vector<2x128xf32>
    %cst_103 = arith.constant 1.000000e+00 : f32
    %401 = vector.broadcast %cst_103 : f32 to vector<2x128xf32>
    %402 = arith.addf %401, %400 : vector<2x128xf32>
    %403 = arith.divf %401, %402 : vector<2x128xf32>
    %404 = vector.extract_strided_slice %403 {offsets = [0, 0], sizes = [2, 32], strides = [1, 1]} : vector<2x128xf32> to vector<2x32xf32>
    %405 = vector.extract_strided_slice %403 {offsets = [0, 32], sizes = [2, 32], strides = [1, 1]} : vector<2x128xf32> to vector<2x32xf32>
    %406 = vector.extract_strided_slice %403 {offsets = [0, 96], sizes = [2, 32], strides = [1, 1]} : vector<2x128xf32> to vector<2x32xf32>
    %407 = vector.extract_strided_slice %398 {offsets = [0, 64], sizes = [2, 32], strides = [1, 1]} : vector<2x128xf32> to vector<2x32xf32>
    %408 = math.tanh %407 : vector<2x32xf32>
    %409 = arith.mulf %405, %10 : vector<2x32xf32>
    %410 = arith.mulf %404, %408 : vector<2x32xf32>
    %411 = arith.addf %409, %410 : vector<2x32xf32>
    %412 = math.tanh %411 : vector<2x32xf32>
    %413 = arith.mulf %406, %412 : vector<2x32xf32>
    %414 = vector.extract_strided_slice %391 {offsets = [1, 0, 0], sizes = [1, 2, 256], strides = [1, 1, 1]} : vector<8x2x256xf32> to vector<1x2x256xf32>
    %415 = vector.shape_cast %414 : vector<1x2x256xf32> to vector<2x256xf32>
    %416 = vector.extract_strided_slice %415 {offsets = [0, 0], sizes = [2, 128], strides = [1, 1]} : vector<2x256xf32> to vector<2x128xf32>
    %cst_104 = arith.constant dense<0.000000e+00> : vector<2x128xf32>
    %417 = tpu.matmul %413, %392, %cst_104 {dimension_numbers = #tpu.dot_dimension_numbers<[1], [0], [0], [1], [0, 0, 1, 1], [], []>} : vector<2x32xf32>, vector<32x128xf32>, vector<2x128xf32> -> vector<2x128xf32>
    %418 = arith.addf %416, %417 : vector<2x128xf32>
    %419 = arith.negf %418 : vector<2x128xf32>
    %420 = math.exp %419 : vector<2x128xf32>
    %cst_105 = arith.constant 1.000000e+00 : f32
    %421 = vector.broadcast %cst_105 : f32 to vector<2x128xf32>
    %422 = arith.addf %421, %420 : vector<2x128xf32>
    %423 = arith.divf %421, %422 : vector<2x128xf32>
    %424 = vector.extract_strided_slice %423 {offsets = [0, 0], sizes = [2, 32], strides = [1, 1]} : vector<2x128xf32> to vector<2x32xf32>
    %425 = vector.extract_strided_slice %423 {offsets = [0, 32], sizes = [2, 32], strides = [1, 1]} : vector<2x128xf32> to vector<2x32xf32>
    %426 = vector.extract_strided_slice %423 {offsets = [0, 96], sizes = [2, 32], strides = [1, 1]} : vector<2x128xf32> to vector<2x32xf32>
    %427 = vector.extract_strided_slice %418 {offsets = [0, 64], sizes = [2, 32], strides = [1, 1]} : vector<2x128xf32> to vector<2x32xf32>
    %428 = math.tanh %427 : vector<2x32xf32>
    %429 = arith.mulf %425, %411 : vector<2x32xf32>
    %430 = arith.mulf %424, %428 : vector<2x32xf32>
    %431 = arith.addf %429, %430 : vector<2x32xf32>
    %432 = math.tanh %431 : vector<2x32xf32>
    %433 = arith.mulf %426, %432 : vector<2x32xf32>
    %434 = vector.extract_strided_slice %391 {offsets = [2, 0, 0], sizes = [1, 2, 256], strides = [1, 1, 1]} : vector<8x2x256xf32> to vector<1x2x256xf32>
    %435 = vector.shape_cast %434 : vector<1x2x256xf32> to vector<2x256xf32>
    %436 = vector.extract_strided_slice %435 {offsets = [0, 0], sizes = [2, 128], strides = [1, 1]} : vector<2x256xf32> to vector<2x128xf32>
    %cst_106 = arith.constant dense<0.000000e+00> : vector<2x128xf32>
    %437 = tpu.matmul %433, %392, %cst_106 {dimension_numbers = #tpu.dot_dimension_numbers<[1], [0], [0], [1], [0, 0, 1, 1], [], []>} : vector<2x32xf32>, vector<32x128xf32>, vector<2x128xf32> -> vector<2x128xf32>
    %438 = arith.addf %436, %437 : vector<2x128xf32>
    %439 = arith.negf %438 : vector<2x128xf32>
    %440 = math.exp %439 : vector<2x128xf32>
    %cst_107 = arith.constant 1.000000e+00 : f32
    %441 = vector.broadcast %cst_107 : f32 to vector<2x128xf32>
    %442 = arith.addf %441, %440 : vector<2x128xf32>
    %443 = arith.divf %441, %442 : vector<2x128xf32>
    %444 = vector.extract_strided_slice %443 {offsets = [0, 0], sizes = [2, 32], strides = [1, 1]} : vector<2x128xf32> to vector<2x32xf32>
    %445 = vector.extract_strided_slice %443 {offsets = [0, 32], sizes = [2, 32], strides = [1, 1]} : vector<2x128xf32> to vector<2x32xf32>
    %446 = vector.extract_strided_slice %443 {offsets = [0, 96], sizes = [2, 32], strides = [1, 1]} : vector<2x128xf32> to vector<2x32xf32>
    %447 = vector.extract_strided_slice %438 {offsets = [0, 64], sizes = [2, 32], strides = [1, 1]} : vector<2x128xf32> to vector<2x32xf32>
    %448 = math.tanh %447 : vector<2x32xf32>
    %449 = arith.mulf %445, %431 : vector<2x32xf32>
    %450 = arith.mulf %444, %448 : vector<2x32xf32>
    %451 = arith.addf %449, %450 : vector<2x32xf32>
    %452 = math.tanh %451 : vector<2x32xf32>
    %453 = arith.mulf %446, %452 : vector<2x32xf32>
    %454 = vector.extract_strided_slice %391 {offsets = [3, 0, 0], sizes = [1, 2, 256], strides = [1, 1, 1]} : vector<8x2x256xf32> to vector<1x2x256xf32>
    %455 = vector.shape_cast %454 : vector<1x2x256xf32> to vector<2x256xf32>
    %456 = vector.extract_strided_slice %455 {offsets = [0, 0], sizes = [2, 128], strides = [1, 1]} : vector<2x256xf32> to vector<2x128xf32>
    %cst_108 = arith.constant dense<0.000000e+00> : vector<2x128xf32>
    %457 = tpu.matmul %453, %392, %cst_108 {dimension_numbers = #tpu.dot_dimension_numbers<[1], [0], [0], [1], [0, 0, 1, 1], [], []>} : vector<2x32xf32>, vector<32x128xf32>, vector<2x128xf32> -> vector<2x128xf32>
    %458 = arith.addf %456, %457 : vector<2x128xf32>
    %459 = arith.negf %458 : vector<2x128xf32>
    %460 = math.exp %459 : vector<2x128xf32>
    %cst_109 = arith.constant 1.000000e+00 : f32
    %461 = vector.broadcast %cst_109 : f32 to vector<2x128xf32>
    %462 = arith.addf %461, %460 : vector<2x128xf32>
    %463 = arith.divf %461, %462 : vector<2x128xf32>
    %464 = vector.extract_strided_slice %463 {offsets = [0, 0], sizes = [2, 32], strides = [1, 1]} : vector<2x128xf32> to vector<2x32xf32>
    %465 = vector.extract_strided_slice %463 {offsets = [0, 32], sizes = [2, 32], strides = [1, 1]} : vector<2x128xf32> to vector<2x32xf32>
    %466 = vector.extract_strided_slice %463 {offsets = [0, 96], sizes = [2, 32], strides = [1, 1]} : vector<2x128xf32> to vector<2x32xf32>
    %467 = vector.extract_strided_slice %458 {offsets = [0, 64], sizes = [2, 32], strides = [1, 1]} : vector<2x128xf32> to vector<2x32xf32>
    %468 = math.tanh %467 : vector<2x32xf32>
    %469 = arith.mulf %465, %451 : vector<2x32xf32>
    %470 = arith.mulf %464, %468 : vector<2x32xf32>
    %471 = arith.addf %469, %470 : vector<2x32xf32>
    %472 = math.tanh %471 : vector<2x32xf32>
    %473 = arith.mulf %466, %472 : vector<2x32xf32>
    %474 = vector.extract_strided_slice %391 {offsets = [4, 0, 0], sizes = [1, 2, 256], strides = [1, 1, 1]} : vector<8x2x256xf32> to vector<1x2x256xf32>
    %475 = vector.shape_cast %474 : vector<1x2x256xf32> to vector<2x256xf32>
    %476 = vector.extract_strided_slice %475 {offsets = [0, 0], sizes = [2, 128], strides = [1, 1]} : vector<2x256xf32> to vector<2x128xf32>
    %cst_110 = arith.constant dense<0.000000e+00> : vector<2x128xf32>
    %477 = tpu.matmul %473, %392, %cst_110 {dimension_numbers = #tpu.dot_dimension_numbers<[1], [0], [0], [1], [0, 0, 1, 1], [], []>} : vector<2x32xf32>, vector<32x128xf32>, vector<2x128xf32> -> vector<2x128xf32>
    %478 = arith.addf %476, %477 : vector<2x128xf32>
    %479 = arith.negf %478 : vector<2x128xf32>
    %480 = math.exp %479 : vector<2x128xf32>
    %cst_111 = arith.constant 1.000000e+00 : f32
    %481 = vector.broadcast %cst_111 : f32 to vector<2x128xf32>
    %482 = arith.addf %481, %480 : vector<2x128xf32>
    %483 = arith.divf %481, %482 : vector<2x128xf32>
    %484 = vector.extract_strided_slice %483 {offsets = [0, 0], sizes = [2, 32], strides = [1, 1]} : vector<2x128xf32> to vector<2x32xf32>
    %485 = vector.extract_strided_slice %483 {offsets = [0, 32], sizes = [2, 32], strides = [1, 1]} : vector<2x128xf32> to vector<2x32xf32>
    %486 = vector.extract_strided_slice %483 {offsets = [0, 96], sizes = [2, 32], strides = [1, 1]} : vector<2x128xf32> to vector<2x32xf32>
    %487 = vector.extract_strided_slice %478 {offsets = [0, 64], sizes = [2, 32], strides = [1, 1]} : vector<2x128xf32> to vector<2x32xf32>
    %488 = math.tanh %487 : vector<2x32xf32>
    %489 = arith.mulf %485, %471 : vector<2x32xf32>
    %490 = arith.mulf %484, %488 : vector<2x32xf32>
    %491 = arith.addf %489, %490 : vector<2x32xf32>
    %492 = math.tanh %491 : vector<2x32xf32>
    %493 = arith.mulf %486, %492 : vector<2x32xf32>
    %494 = vector.extract_strided_slice %391 {offsets = [5, 0, 0], sizes = [1, 2, 256], strides = [1, 1, 1]} : vector<8x2x256xf32> to vector<1x2x256xf32>
    %495 = vector.shape_cast %494 : vector<1x2x256xf32> to vector<2x256xf32>
    %496 = vector.extract_strided_slice %495 {offsets = [0, 0], sizes = [2, 128], strides = [1, 1]} : vector<2x256xf32> to vector<2x128xf32>
    %cst_112 = arith.constant dense<0.000000e+00> : vector<2x128xf32>
    %497 = tpu.matmul %493, %392, %cst_112 {dimension_numbers = #tpu.dot_dimension_numbers<[1], [0], [0], [1], [0, 0, 1, 1], [], []>} : vector<2x32xf32>, vector<32x128xf32>, vector<2x128xf32> -> vector<2x128xf32>
    %498 = arith.addf %496, %497 : vector<2x128xf32>
    %499 = arith.negf %498 : vector<2x128xf32>
    %500 = math.exp %499 : vector<2x128xf32>
    %cst_113 = arith.constant 1.000000e+00 : f32
    %501 = vector.broadcast %cst_113 : f32 to vector<2x128xf32>
    %502 = arith.addf %501, %500 : vector<2x128xf32>
    %503 = arith.divf %501, %502 : vector<2x128xf32>
    %504 = vector.extract_strided_slice %503 {offsets = [0, 0], sizes = [2, 32], strides = [1, 1]} : vector<2x128xf32> to vector<2x32xf32>
    %505 = vector.extract_strided_slice %503 {offsets = [0, 32], sizes = [2, 32], strides = [1, 1]} : vector<2x128xf32> to vector<2x32xf32>
    %506 = vector.extract_strided_slice %503 {offsets = [0, 96], sizes = [2, 32], strides = [1, 1]} : vector<2x128xf32> to vector<2x32xf32>
    %507 = vector.extract_strided_slice %498 {offsets = [0, 64], sizes = [2, 32], strides = [1, 1]} : vector<2x128xf32> to vector<2x32xf32>
    %508 = math.tanh %507 : vector<2x32xf32>
    %509 = arith.mulf %505, %491 : vector<2x32xf32>
    %510 = arith.mulf %504, %508 : vector<2x32xf32>
    %511 = arith.addf %509, %510 : vector<2x32xf32>
    %512 = math.tanh %511 : vector<2x32xf32>
    %513 = arith.mulf %506, %512 : vector<2x32xf32>
    %514 = vector.extract_strided_slice %391 {offsets = [6, 0, 0], sizes = [1, 2, 256], strides = [1, 1, 1]} : vector<8x2x256xf32> to vector<1x2x256xf32>
    %515 = vector.shape_cast %514 : vector<1x2x256xf32> to vector<2x256xf32>
    %516 = vector.extract_strided_slice %515 {offsets = [0, 0], sizes = [2, 128], strides = [1, 1]} : vector<2x256xf32> to vector<2x128xf32>
    %cst_114 = arith.constant dense<0.000000e+00> : vector<2x128xf32>
    %517 = tpu.matmul %513, %392, %cst_114 {dimension_numbers = #tpu.dot_dimension_numbers<[1], [0], [0], [1], [0, 0, 1, 1], [], []>} : vector<2x32xf32>, vector<32x128xf32>, vector<2x128xf32> -> vector<2x128xf32>
    %518 = arith.addf %516, %517 : vector<2x128xf32>
    %519 = arith.negf %518 : vector<2x128xf32>
    %520 = math.exp %519 : vector<2x128xf32>
    %cst_115 = arith.constant 1.000000e+00 : f32
    %521 = vector.broadcast %cst_115 : f32 to vector<2x128xf32>
    %522 = arith.addf %521, %520 : vector<2x128xf32>
    %523 = arith.divf %521, %522 : vector<2x128xf32>
    %524 = vector.extract_strided_slice %523 {offsets = [0, 0], sizes = [2, 32], strides = [1, 1]} : vector<2x128xf32> to vector<2x32xf32>
    %525 = vector.extract_strided_slice %523 {offsets = [0, 32], sizes = [2, 32], strides = [1, 1]} : vector<2x128xf32> to vector<2x32xf32>
    %526 = vector.extract_strided_slice %523 {offsets = [0, 96], sizes = [2, 32], strides = [1, 1]} : vector<2x128xf32> to vector<2x32xf32>
    %527 = vector.extract_strided_slice %518 {offsets = [0, 64], sizes = [2, 32], strides = [1, 1]} : vector<2x128xf32> to vector<2x32xf32>
    %528 = math.tanh %527 : vector<2x32xf32>
    %529 = arith.mulf %525, %511 : vector<2x32xf32>
    %530 = arith.mulf %524, %528 : vector<2x32xf32>
    %531 = arith.addf %529, %530 : vector<2x32xf32>
    %532 = math.tanh %531 : vector<2x32xf32>
    %533 = arith.mulf %526, %532 : vector<2x32xf32>
    %534 = vector.extract_strided_slice %391 {offsets = [7, 0, 0], sizes = [1, 2, 256], strides = [1, 1, 1]} : vector<8x2x256xf32> to vector<1x2x256xf32>
    %535 = vector.shape_cast %534 : vector<1x2x256xf32> to vector<2x256xf32>
    %536 = vector.extract_strided_slice %535 {offsets = [0, 0], sizes = [2, 128], strides = [1, 1]} : vector<2x256xf32> to vector<2x128xf32>
    %cst_116 = arith.constant dense<0.000000e+00> : vector<2x128xf32>
    %537 = tpu.matmul %533, %392, %cst_116 {dimension_numbers = #tpu.dot_dimension_numbers<[1], [0], [0], [1], [0, 0, 1, 1], [], []>} : vector<2x32xf32>, vector<32x128xf32>, vector<2x128xf32> -> vector<2x128xf32>
    %538 = arith.addf %536, %537 : vector<2x128xf32>
    %539 = arith.negf %538 : vector<2x128xf32>
    %540 = math.exp %539 : vector<2x128xf32>
    %cst_117 = arith.constant 1.000000e+00 : f32
    %541 = vector.broadcast %cst_117 : f32 to vector<2x128xf32>
    %542 = arith.addf %541, %540 : vector<2x128xf32>
    %543 = arith.divf %541, %542 : vector<2x128xf32>
    %544 = vector.extract_strided_slice %543 {offsets = [0, 0], sizes = [2, 32], strides = [1, 1]} : vector<2x128xf32> to vector<2x32xf32>
    %545 = vector.extract_strided_slice %543 {offsets = [0, 32], sizes = [2, 32], strides = [1, 1]} : vector<2x128xf32> to vector<2x32xf32>
    %546 = vector.extract_strided_slice %543 {offsets = [0, 96], sizes = [2, 32], strides = [1, 1]} : vector<2x128xf32> to vector<2x32xf32>
    %547 = vector.extract_strided_slice %538 {offsets = [0, 64], sizes = [2, 32], strides = [1, 1]} : vector<2x128xf32> to vector<2x32xf32>
    %548 = math.tanh %547 : vector<2x32xf32>
    %549 = arith.mulf %545, %531 : vector<2x32xf32>
    %550 = arith.mulf %544, %548 : vector<2x32xf32>
    %551 = arith.addf %549, %550 : vector<2x32xf32>
    %552 = math.tanh %551 : vector<2x32xf32>
    %553 = arith.mulf %546, %552 : vector<2x32xf32>
    %554 = vector.extract_strided_slice %391 {offsets = [7, 0, 0], sizes = [1, 2, 256], strides = [1, 1, 1]} : vector<8x2x256xf32> to vector<1x2x256xf32>
    %555 = vector.shape_cast %554 : vector<1x2x256xf32> to vector<2x256xf32>
    %556 = vector.extract_strided_slice %555 {offsets = [0, 128], sizes = [2, 128], strides = [1, 1]} : vector<2x256xf32> to vector<2x128xf32>
    %cst_118 = arith.constant dense<0.000000e+00> : vector<2x128xf32>
    %557 = tpu.matmul %10, %393, %cst_118 {dimension_numbers = #tpu.dot_dimension_numbers<[1], [0], [0], [1], [0, 0, 1, 1], [], []>} : vector<2x32xf32>, vector<32x128xf32>, vector<2x128xf32> -> vector<2x128xf32>
    %558 = arith.addf %556, %557 : vector<2x128xf32>
    %559 = arith.negf %558 : vector<2x128xf32>
    %560 = math.exp %559 : vector<2x128xf32>
    %cst_119 = arith.constant 1.000000e+00 : f32
    %561 = vector.broadcast %cst_119 : f32 to vector<2x128xf32>
    %562 = arith.addf %561, %560 : vector<2x128xf32>
    %563 = arith.divf %561, %562 : vector<2x128xf32>
    %564 = vector.extract_strided_slice %563 {offsets = [0, 0], sizes = [2, 32], strides = [1, 1]} : vector<2x128xf32> to vector<2x32xf32>
    %565 = vector.extract_strided_slice %563 {offsets = [0, 32], sizes = [2, 32], strides = [1, 1]} : vector<2x128xf32> to vector<2x32xf32>
    %566 = vector.extract_strided_slice %563 {offsets = [0, 96], sizes = [2, 32], strides = [1, 1]} : vector<2x128xf32> to vector<2x32xf32>
    %567 = vector.extract_strided_slice %558 {offsets = [0, 64], sizes = [2, 32], strides = [1, 1]} : vector<2x128xf32> to vector<2x32xf32>
    %568 = math.tanh %567 : vector<2x32xf32>
    %569 = arith.mulf %565, %10 : vector<2x32xf32>
    %570 = arith.mulf %564, %568 : vector<2x32xf32>
    %571 = arith.addf %569, %570 : vector<2x32xf32>
    %572 = math.tanh %571 : vector<2x32xf32>
    %573 = arith.mulf %566, %572 : vector<2x32xf32>
    %574 = vector.extract_strided_slice %391 {offsets = [6, 0, 0], sizes = [1, 2, 256], strides = [1, 1, 1]} : vector<8x2x256xf32> to vector<1x2x256xf32>
    %575 = vector.shape_cast %574 : vector<1x2x256xf32> to vector<2x256xf32>
    %576 = vector.extract_strided_slice %575 {offsets = [0, 128], sizes = [2, 128], strides = [1, 1]} : vector<2x256xf32> to vector<2x128xf32>
    %cst_120 = arith.constant dense<0.000000e+00> : vector<2x128xf32>
    %577 = tpu.matmul %573, %393, %cst_120 {dimension_numbers = #tpu.dot_dimension_numbers<[1], [0], [0], [1], [0, 0, 1, 1], [], []>} : vector<2x32xf32>, vector<32x128xf32>, vector<2x128xf32> -> vector<2x128xf32>
    %578 = arith.addf %576, %577 : vector<2x128xf32>
    %579 = arith.negf %578 : vector<2x128xf32>
    %580 = math.exp %579 : vector<2x128xf32>
    %cst_121 = arith.constant 1.000000e+00 : f32
    %581 = vector.broadcast %cst_121 : f32 to vector<2x128xf32>
    %582 = arith.addf %581, %580 : vector<2x128xf32>
    %583 = arith.divf %581, %582 : vector<2x128xf32>
    %584 = vector.extract_strided_slice %583 {offsets = [0, 0], sizes = [2, 32], strides = [1, 1]} : vector<2x128xf32> to vector<2x32xf32>
    %585 = vector.extract_strided_slice %583 {offsets = [0, 32], sizes = [2, 32], strides = [1, 1]} : vector<2x128xf32> to vector<2x32xf32>
    %586 = vector.extract_strided_slice %583 {offsets = [0, 96], sizes = [2, 32], strides = [1, 1]} : vector<2x128xf32> to vector<2x32xf32>
    %587 = vector.extract_strided_slice %578 {offsets = [0, 64], sizes = [2, 32], strides = [1, 1]} : vector<2x128xf32> to vector<2x32xf32>
    %588 = math.tanh %587 : vector<2x32xf32>
    %589 = arith.mulf %585, %571 : vector<2x32xf32>
    %590 = arith.mulf %584, %588 : vector<2x32xf32>
    %591 = arith.addf %589, %590 : vector<2x32xf32>
    %592 = math.tanh %591 : vector<2x32xf32>
    %593 = arith.mulf %586, %592 : vector<2x32xf32>
    %594 = vector.extract_strided_slice %391 {offsets = [5, 0, 0], sizes = [1, 2, 256], strides = [1, 1, 1]} : vector<8x2x256xf32> to vector<1x2x256xf32>
    %595 = vector.shape_cast %594 : vector<1x2x256xf32> to vector<2x256xf32>
    %596 = vector.extract_strided_slice %595 {offsets = [0, 128], sizes = [2, 128], strides = [1, 1]} : vector<2x256xf32> to vector<2x128xf32>
    %cst_122 = arith.constant dense<0.000000e+00> : vector<2x128xf32>
    %597 = tpu.matmul %593, %393, %cst_122 {dimension_numbers = #tpu.dot_dimension_numbers<[1], [0], [0], [1], [0, 0, 1, 1], [], []>} : vector<2x32xf32>, vector<32x128xf32>, vector<2x128xf32> -> vector<2x128xf32>
    %598 = arith.addf %596, %597 : vector<2x128xf32>
    %599 = arith.negf %598 : vector<2x128xf32>
    %600 = math.exp %599 : vector<2x128xf32>
    %cst_123 = arith.constant 1.000000e+00 : f32
    %601 = vector.broadcast %cst_123 : f32 to vector<2x128xf32>
    %602 = arith.addf %601, %600 : vector<2x128xf32>
    %603 = arith.divf %601, %602 : vector<2x128xf32>
    %604 = vector.extract_strided_slice %603 {offsets = [0, 0], sizes = [2, 32], strides = [1, 1]} : vector<2x128xf32> to vector<2x32xf32>
    %605 = vector.extract_strided_slice %603 {offsets = [0, 32], sizes = [2, 32], strides = [1, 1]} : vector<2x128xf32> to vector<2x32xf32>
    %606 = vector.extract_strided_slice %603 {offsets = [0, 96], sizes = [2, 32], strides = [1, 1]} : vector<2x128xf32> to vector<2x32xf32>
    %607 = vector.extract_strided_slice %598 {offsets = [0, 64], sizes = [2, 32], strides = [1, 1]} : vector<2x128xf32> to vector<2x32xf32>
    %608 = math.tanh %607 : vector<2x32xf32>
    %609 = arith.mulf %605, %591 : vector<2x32xf32>
    %610 = arith.mulf %604, %608 : vector<2x32xf32>
    %611 = arith.addf %609, %610 : vector<2x32xf32>
    %612 = math.tanh %611 : vector<2x32xf32>
    %613 = arith.mulf %606, %612 : vector<2x32xf32>
    %614 = vector.extract_strided_slice %391 {offsets = [4, 0, 0], sizes = [1, 2, 256], strides = [1, 1, 1]} : vector<8x2x256xf32> to vector<1x2x256xf32>
    %615 = vector.shape_cast %614 : vector<1x2x256xf32> to vector<2x256xf32>
    %616 = vector.extract_strided_slice %615 {offsets = [0, 128], sizes = [2, 128], strides = [1, 1]} : vector<2x256xf32> to vector<2x128xf32>
    %cst_124 = arith.constant dense<0.000000e+00> : vector<2x128xf32>
    %617 = tpu.matmul %613, %393, %cst_124 {dimension_numbers = #tpu.dot_dimension_numbers<[1], [0], [0], [1], [0, 0, 1, 1], [], []>} : vector<2x32xf32>, vector<32x128xf32>, vector<2x128xf32> -> vector<2x128xf32>
    %618 = arith.addf %616, %617 : vector<2x128xf32>
    %619 = arith.negf %618 : vector<2x128xf32>
    %620 = math.exp %619 : vector<2x128xf32>
    %cst_125 = arith.constant 1.000000e+00 : f32
    %621 = vector.broadcast %cst_125 : f32 to vector<2x128xf32>
    %622 = arith.addf %621, %620 : vector<2x128xf32>
    %623 = arith.divf %621, %622 : vector<2x128xf32>
    %624 = vector.extract_strided_slice %623 {offsets = [0, 0], sizes = [2, 32], strides = [1, 1]} : vector<2x128xf32> to vector<2x32xf32>
    %625 = vector.extract_strided_slice %623 {offsets = [0, 32], sizes = [2, 32], strides = [1, 1]} : vector<2x128xf32> to vector<2x32xf32>
    %626 = vector.extract_strided_slice %623 {offsets = [0, 96], sizes = [2, 32], strides = [1, 1]} : vector<2x128xf32> to vector<2x32xf32>
    %627 = vector.extract_strided_slice %618 {offsets = [0, 64], sizes = [2, 32], strides = [1, 1]} : vector<2x128xf32> to vector<2x32xf32>
    %628 = math.tanh %627 : vector<2x32xf32>
    %629 = arith.mulf %625, %611 : vector<2x32xf32>
    %630 = arith.mulf %624, %628 : vector<2x32xf32>
    %631 = arith.addf %629, %630 : vector<2x32xf32>
    %632 = math.tanh %631 : vector<2x32xf32>
    %633 = arith.mulf %626, %632 : vector<2x32xf32>
    %634 = vector.extract_strided_slice %391 {offsets = [3, 0, 0], sizes = [1, 2, 256], strides = [1, 1, 1]} : vector<8x2x256xf32> to vector<1x2x256xf32>
    %635 = vector.shape_cast %634 : vector<1x2x256xf32> to vector<2x256xf32>
    %636 = vector.extract_strided_slice %635 {offsets = [0, 128], sizes = [2, 128], strides = [1, 1]} : vector<2x256xf32> to vector<2x128xf32>
    %cst_126 = arith.constant dense<0.000000e+00> : vector<2x128xf32>
    %637 = tpu.matmul %633, %393, %cst_126 {dimension_numbers = #tpu.dot_dimension_numbers<[1], [0], [0], [1], [0, 0, 1, 1], [], []>} : vector<2x32xf32>, vector<32x128xf32>, vector<2x128xf32> -> vector<2x128xf32>
    %638 = arith.addf %636, %637 : vector<2x128xf32>
    %639 = arith.negf %638 : vector<2x128xf32>
    %640 = math.exp %639 : vector<2x128xf32>
    %cst_127 = arith.constant 1.000000e+00 : f32
    %641 = vector.broadcast %cst_127 : f32 to vector<2x128xf32>
    %642 = arith.addf %641, %640 : vector<2x128xf32>
    %643 = arith.divf %641, %642 : vector<2x128xf32>
    %644 = vector.extract_strided_slice %643 {offsets = [0, 0], sizes = [2, 32], strides = [1, 1]} : vector<2x128xf32> to vector<2x32xf32>
    %645 = vector.extract_strided_slice %643 {offsets = [0, 32], sizes = [2, 32], strides = [1, 1]} : vector<2x128xf32> to vector<2x32xf32>
    %646 = vector.extract_strided_slice %643 {offsets = [0, 96], sizes = [2, 32], strides = [1, 1]} : vector<2x128xf32> to vector<2x32xf32>
    %647 = vector.extract_strided_slice %638 {offsets = [0, 64], sizes = [2, 32], strides = [1, 1]} : vector<2x128xf32> to vector<2x32xf32>
    %648 = math.tanh %647 : vector<2x32xf32>
    %649 = arith.mulf %645, %631 : vector<2x32xf32>
    %650 = arith.mulf %644, %648 : vector<2x32xf32>
    %651 = arith.addf %649, %650 : vector<2x32xf32>
    %652 = math.tanh %651 : vector<2x32xf32>
    %653 = arith.mulf %646, %652 : vector<2x32xf32>
    %654 = vector.extract_strided_slice %391 {offsets = [2, 0, 0], sizes = [1, 2, 256], strides = [1, 1, 1]} : vector<8x2x256xf32> to vector<1x2x256xf32>
    %655 = vector.shape_cast %654 : vector<1x2x256xf32> to vector<2x256xf32>
    %656 = vector.extract_strided_slice %655 {offsets = [0, 128], sizes = [2, 128], strides = [1, 1]} : vector<2x256xf32> to vector<2x128xf32>
    %cst_128 = arith.constant dense<0.000000e+00> : vector<2x128xf32>
    %657 = tpu.matmul %653, %393, %cst_128 {dimension_numbers = #tpu.dot_dimension_numbers<[1], [0], [0], [1], [0, 0, 1, 1], [], []>} : vector<2x32xf32>, vector<32x128xf32>, vector<2x128xf32> -> vector<2x128xf32>
    %658 = arith.addf %656, %657 : vector<2x128xf32>
    %659 = arith.negf %658 : vector<2x128xf32>
    %660 = math.exp %659 : vector<2x128xf32>
    %cst_129 = arith.constant 1.000000e+00 : f32
    %661 = vector.broadcast %cst_129 : f32 to vector<2x128xf32>
    %662 = arith.addf %661, %660 : vector<2x128xf32>
    %663 = arith.divf %661, %662 : vector<2x128xf32>
    %664 = vector.extract_strided_slice %663 {offsets = [0, 0], sizes = [2, 32], strides = [1, 1]} : vector<2x128xf32> to vector<2x32xf32>
    %665 = vector.extract_strided_slice %663 {offsets = [0, 32], sizes = [2, 32], strides = [1, 1]} : vector<2x128xf32> to vector<2x32xf32>
    %666 = vector.extract_strided_slice %663 {offsets = [0, 96], sizes = [2, 32], strides = [1, 1]} : vector<2x128xf32> to vector<2x32xf32>
    %667 = vector.extract_strided_slice %658 {offsets = [0, 64], sizes = [2, 32], strides = [1, 1]} : vector<2x128xf32> to vector<2x32xf32>
    %668 = math.tanh %667 : vector<2x32xf32>
    %669 = arith.mulf %665, %651 : vector<2x32xf32>
    %670 = arith.mulf %664, %668 : vector<2x32xf32>
    %671 = arith.addf %669, %670 : vector<2x32xf32>
    %672 = math.tanh %671 : vector<2x32xf32>
    %673 = arith.mulf %666, %672 : vector<2x32xf32>
    %674 = vector.extract_strided_slice %391 {offsets = [1, 0, 0], sizes = [1, 2, 256], strides = [1, 1, 1]} : vector<8x2x256xf32> to vector<1x2x256xf32>
    %675 = vector.shape_cast %674 : vector<1x2x256xf32> to vector<2x256xf32>
    %676 = vector.extract_strided_slice %675 {offsets = [0, 128], sizes = [2, 128], strides = [1, 1]} : vector<2x256xf32> to vector<2x128xf32>
    %cst_130 = arith.constant dense<0.000000e+00> : vector<2x128xf32>
    %677 = tpu.matmul %673, %393, %cst_130 {dimension_numbers = #tpu.dot_dimension_numbers<[1], [0], [0], [1], [0, 0, 1, 1], [], []>} : vector<2x32xf32>, vector<32x128xf32>, vector<2x128xf32> -> vector<2x128xf32>
    %678 = arith.addf %676, %677 : vector<2x128xf32>
    %679 = arith.negf %678 : vector<2x128xf32>
    %680 = math.exp %679 : vector<2x128xf32>
    %cst_131 = arith.constant 1.000000e+00 : f32
    %681 = vector.broadcast %cst_131 : f32 to vector<2x128xf32>
    %682 = arith.addf %681, %680 : vector<2x128xf32>
    %683 = arith.divf %681, %682 : vector<2x128xf32>
    %684 = vector.extract_strided_slice %683 {offsets = [0, 0], sizes = [2, 32], strides = [1, 1]} : vector<2x128xf32> to vector<2x32xf32>
    %685 = vector.extract_strided_slice %683 {offsets = [0, 32], sizes = [2, 32], strides = [1, 1]} : vector<2x128xf32> to vector<2x32xf32>
    %686 = vector.extract_strided_slice %683 {offsets = [0, 96], sizes = [2, 32], strides = [1, 1]} : vector<2x128xf32> to vector<2x32xf32>
    %687 = vector.extract_strided_slice %678 {offsets = [0, 64], sizes = [2, 32], strides = [1, 1]} : vector<2x128xf32> to vector<2x32xf32>
    %688 = math.tanh %687 : vector<2x32xf32>
    %689 = arith.mulf %685, %671 : vector<2x32xf32>
    %690 = arith.mulf %684, %688 : vector<2x32xf32>
    %691 = arith.addf %689, %690 : vector<2x32xf32>
    %692 = math.tanh %691 : vector<2x32xf32>
    %693 = arith.mulf %686, %692 : vector<2x32xf32>
    %694 = vector.extract_strided_slice %391 {offsets = [0, 0, 0], sizes = [1, 2, 256], strides = [1, 1, 1]} : vector<8x2x256xf32> to vector<1x2x256xf32>
    %695 = vector.shape_cast %694 : vector<1x2x256xf32> to vector<2x256xf32>
    %696 = vector.extract_strided_slice %695 {offsets = [0, 128], sizes = [2, 128], strides = [1, 1]} : vector<2x256xf32> to vector<2x128xf32>
    %cst_132 = arith.constant dense<0.000000e+00> : vector<2x128xf32>
    %697 = tpu.matmul %693, %393, %cst_132 {dimension_numbers = #tpu.dot_dimension_numbers<[1], [0], [0], [1], [0, 0, 1, 1], [], []>} : vector<2x32xf32>, vector<32x128xf32>, vector<2x128xf32> -> vector<2x128xf32>
    %698 = arith.addf %696, %697 : vector<2x128xf32>
    %699 = arith.negf %698 : vector<2x128xf32>
    %700 = math.exp %699 : vector<2x128xf32>
    %cst_133 = arith.constant 1.000000e+00 : f32
    %701 = vector.broadcast %cst_133 : f32 to vector<2x128xf32>
    %702 = arith.addf %701, %700 : vector<2x128xf32>
    %703 = arith.divf %701, %702 : vector<2x128xf32>
    %704 = vector.extract_strided_slice %703 {offsets = [0, 0], sizes = [2, 32], strides = [1, 1]} : vector<2x128xf32> to vector<2x32xf32>
    %705 = vector.extract_strided_slice %703 {offsets = [0, 32], sizes = [2, 32], strides = [1, 1]} : vector<2x128xf32> to vector<2x32xf32>
    %706 = vector.extract_strided_slice %703 {offsets = [0, 96], sizes = [2, 32], strides = [1, 1]} : vector<2x128xf32> to vector<2x32xf32>
    %707 = vector.extract_strided_slice %698 {offsets = [0, 64], sizes = [2, 32], strides = [1, 1]} : vector<2x128xf32> to vector<2x32xf32>
    %708 = math.tanh %707 : vector<2x32xf32>
    %709 = arith.mulf %705, %691 : vector<2x32xf32>
    %710 = arith.mulf %704, %708 : vector<2x32xf32>
    %711 = arith.addf %709, %710 : vector<2x32xf32>
    %712 = math.tanh %711 : vector<2x32xf32>
    %713 = arith.mulf %706, %712 : vector<2x32xf32>
    %714 = tpu.concatenate %191, %375 in 1 : vector<2x32xf32>, vector<2x32xf32> -> vector<2x64xf32>
    %715 = tpu.concatenate %189, %373 in 1 : vector<2x32xf32>, vector<2x32xf32> -> vector<2x64xf32>
    %716 = tpu.concatenate %553, %713 in 1 : vector<2x32xf32>, vector<2x32xf32> -> vector<2x64xf32>
    %717 = tpu.concatenate %551, %711 in 1 : vector<2x32xf32>, vector<2x32xf32> -> vector<2x64xf32>
    %c0_134 = arith.constant 0 : index
    %c0_135 = arith.constant 0 : index
    %718 = vector.load %arg10[%c0_134, %c0_135] : memref<16x32xf32, #tpu.memory_space<vmem>>, vector<16x32xf32>
    %c0_136 = arith.constant 0 : index
    %c0_137 = arith.constant 0 : index
    %719 = vector.load %arg11[%c0_136, %c0_137] : memref<32x256xf32, #tpu.memory_space<vmem>>, vector<32x256xf32>
    %cst_138 = arith.constant dense<0.000000e+00> : vector<16x256xf32>
    %720 = tpu.matmul %718, %719, %cst_138 {dimension_numbers = #tpu.dot_dimension_numbers<[1], [0], [0], [1], [0, 0, 1, 1], [], []>} : vector<16x32xf32>, vector<32x256xf32>, vector<16x256xf32> -> vector<16x256xf32>
    %c0_139 = arith.constant 0 : index
    %c0_140 = arith.constant 0 : index
    %721 = vector.load %arg12[%c0_139, %c0_140] : memref<1x256xf32, #tpu.memory_space<vmem>>, vector<1x256xf32>
    %722 = vector.broadcast %721 : vector<1x256xf32> to vector<16x256xf32>
    %723 = arith.addf %720, %722 : vector<16x256xf32>
    %c0_141 = arith.constant 0 : index
    %c0_142 = arith.constant 0 : index
    %724 = vector.load %arg13[%c0_141, %c0_142] : memref<64x256xf32, #tpu.memory_space<vmem>>, vector<64x256xf32>
    %c0_143 = arith.constant 0 : index
    %c0_144 = arith.constant 0 : index
    %725 = vector.load %arg14[%c0_143, %c0_144] : memref<64x256xf32, #tpu.memory_space<vmem>>, vector<64x256xf32>
    %c0_145 = arith.constant 0 : index
    %c0_146 = arith.constant 0 : index
    %726 = vector.load %arg16[%c0_145, %c0_146] : memref<64x256xf32, #tpu.memory_space<vmem>>, vector<64x256xf32>
    %c0_147 = arith.constant 0 : index
    %c0_148 = arith.constant 0 : index
    %727 = vector.load %arg15[%c0_147, %c0_148] : memref<1x256xf32, #tpu.memory_space<vmem>>, vector<1x256xf32>
    %728 = vector.shape_cast %727 : vector<1x256xf32> to vector<1x256xf32>
    %729 = vector.broadcast %728 : vector<1x256xf32> to vector<2x256xf32>
    %c0_149 = arith.constant 0 : index
    %c0_150 = arith.constant 0 : index
    %730 = vector.load %arg17[%c0_149, %c0_150] : memref<64x16xf32, #tpu.memory_space<vmem>>, vector<64x16xf32>
    %c0_151 = arith.constant 0 : index
    %c0_152 = arith.constant 0 : index
    %731 = vector.load %arg18[%c0_151, %c0_152] : memref<1x16xf32, #tpu.memory_space<vmem>>, vector<1x16xf32>
    %732 = vector.shape_cast %731 : vector<1x16xf32> to vector<1x16xf32>
    %733 = vector.broadcast %732 : vector<1x16xf32> to vector<2x16xf32>
    %734 = tpu.iota {dimensions = array<i32: 1>} : vector<2x16xi32>
    %c2_i32 = arith.constant 2 : i32
    %735 = vector.broadcast %c2_i32 : i32 to vector<2x16xi32>
    %736 = arith.cmpi eq, %734, %735 : vector<2x16xi32>
    %737 = arith.extui %736 : vector<2x16xi1> to vector<2x16xi32>
    %738 = arith.sitofp %737 : vector<2x16xi32> to vector<2x16xf32>
    %c0_153 = arith.constant 0 : index
    %c0_154 = arith.constant 0 : index
    %c0_155 = arith.constant 0 : index
    %739 = vector.load %arg19[%c0_153, %c0_154, %c0_155] : memref<6x2x16xf32, #tpu.memory_space<vmem>>, vector<1x2x16xf32>
    %740 = vector.shape_cast %739 : vector<1x2x16xf32> to vector<2x16xf32>
    %741 = vector.shape_cast %738 : vector<2x16xf32> to vector<1x2x16xf32>
    tpu.vector_store %arg19[%c0_153, %c0_154, %c0_155], %741 {strides = array<i32>} : memref<6x2x16xf32, #tpu.memory_space<vmem>>, vector<1x2x16xf32>,
    %cst_156 = arith.constant dense<0.000000e+00> : vector<2x256xf32>
    %742 = tpu.matmul %738, %723, %cst_156 {dimension_numbers = #tpu.dot_dimension_numbers<[1], [0], [0], [1], [0, 0, 1, 1], [], []>} : vector<2x16xf32>, vector<16x256xf32>, vector<2x256xf32> -> vector<2x256xf32>
    %cst_157 = arith.constant dense<0.000000e+00> : vector<2x256xf32>
    %743 = tpu.matmul %714, %724, %cst_157 {dimension_numbers = #tpu.dot_dimension_numbers<[1], [0], [0], [1], [0, 0, 1, 1], [], []>} : vector<2x64xf32>, vector<64x256xf32>, vector<2x256xf32> -> vector<2x256xf32>
    %744 = arith.addf %742, %743 : vector<2x256xf32>
    %745 = arith.negf %744 : vector<2x256xf32>
    %746 = math.exp %745 : vector<2x256xf32>
    %cst_158 = arith.constant 1.000000e+00 : f32
    %747 = vector.broadcast %cst_158 : f32 to vector<2x256xf32>
    %748 = arith.addf %747, %746 : vector<2x256xf32>
    %749 = arith.divf %747, %748 : vector<2x256xf32>
    %750 = vector.extract_strided_slice %749 {offsets = [0, 0], sizes = [2, 64], strides = [1, 1]} : vector<2x256xf32> to vector<2x64xf32>
    %751 = vector.extract_strided_slice %749 {offsets = [0, 64], sizes = [2, 64], strides = [1, 1]} : vector<2x256xf32> to vector<2x64xf32>
    %752 = vector.extract_strided_slice %749 {offsets = [0, 192], sizes = [2, 64], strides = [1, 1]} : vector<2x256xf32> to vector<2x64xf32>
    %753 = vector.extract_strided_slice %744 {offsets = [0, 128], sizes = [2, 64], strides = [1, 1]} : vector<2x256xf32> to vector<2x64xf32>
    %754 = math.tanh %753 : vector<2x64xf32>
    %755 = arith.mulf %751, %715 : vector<2x64xf32>
    %756 = arith.mulf %750, %754 : vector<2x64xf32>
    %757 = arith.addf %755, %756 : vector<2x64xf32>
    %758 = math.tanh %757 : vector<2x64xf32>
    %759 = arith.mulf %752, %758 : vector<2x64xf32>
    %cst_159 = arith.constant dense<0.000000e+00> : vector<2x256xf32>
    %760 = tpu.matmul %759, %725, %cst_159 {dimension_numbers = #tpu.dot_dimension_numbers<[1], [0], [0], [1], [0, 0, 1, 1], [], []>} : vector<2x64xf32>, vector<64x256xf32>, vector<2x256xf32> -> vector<2x256xf32>
    %cst_160 = arith.constant dense<0.000000e+00> : vector<2x256xf32>
    %761 = tpu.matmul %716, %726, %cst_160 {dimension_numbers = #tpu.dot_dimension_numbers<[1], [0], [0], [1], [0, 0, 1, 1], [], []>} : vector<2x64xf32>, vector<64x256xf32>, vector<2x256xf32> -> vector<2x256xf32>
    %762 = arith.addf %760, %761 : vector<2x256xf32>
    %763 = arith.addf %762, %729 : vector<2x256xf32>
    %764 = arith.negf %763 : vector<2x256xf32>
    %765 = math.exp %764 : vector<2x256xf32>
    %cst_161 = arith.constant 1.000000e+00 : f32
    %766 = vector.broadcast %cst_161 : f32 to vector<2x256xf32>
    %767 = arith.addf %766, %765 : vector<2x256xf32>
    %768 = arith.divf %766, %767 : vector<2x256xf32>
    %769 = vector.extract_strided_slice %768 {offsets = [0, 0], sizes = [2, 64], strides = [1, 1]} : vector<2x256xf32> to vector<2x64xf32>
    %770 = vector.extract_strided_slice %768 {offsets = [0, 64], sizes = [2, 64], strides = [1, 1]} : vector<2x256xf32> to vector<2x64xf32>
    %771 = vector.extract_strided_slice %768 {offsets = [0, 192], sizes = [2, 64], strides = [1, 1]} : vector<2x256xf32> to vector<2x64xf32>
    %772 = vector.extract_strided_slice %763 {offsets = [0, 128], sizes = [2, 64], strides = [1, 1]} : vector<2x256xf32> to vector<2x64xf32>
    %773 = math.tanh %772 : vector<2x64xf32>
    %774 = arith.mulf %770, %717 : vector<2x64xf32>
    %775 = arith.mulf %769, %773 : vector<2x64xf32>
    %776 = arith.addf %774, %775 : vector<2x64xf32>
    %777 = math.tanh %776 : vector<2x64xf32>
    %778 = arith.mulf %771, %777 : vector<2x64xf32>
    %cst_162 = arith.constant dense<0.000000e+00> : vector<2x16xf32>
    %779 = tpu.matmul %778, %730, %cst_162 {dimension_numbers = #tpu.dot_dimension_numbers<[1], [0], [0], [1], [0, 0, 1, 1], [], []>} : vector<2x64xf32>, vector<64x16xf32>, vector<2x16xf32> -> vector<2x16xf32>
    %780 = arith.addf %779, %733 : vector<2x16xf32>
    %cst_163 = arith.constant dense<0xFF800000> : vector<2xf32>
    %781 = vector.multi_reduction <maximumf>, %780, %cst_163 [1] : vector<2x16xf32> to vector<2xf32>
    %782 = vector.shape_cast %781 : vector<2xf32> to vector<2x1xf32>
    %783 = vector.broadcast %782 : vector<2x1xf32> to vector<2x16xf32>
    %784 = arith.subf %780, %783 : vector<2x16xf32>
    %785 = math.exp %784 : vector<2x16xf32>
    %cst_164 = arith.constant dense<0.000000e+00> : vector<2xf32>
    %786 = vector.multi_reduction <add>, %785, %cst_164 [1] : vector<2x16xf32> to vector<2xf32>
    %787 = vector.shape_cast %786 : vector<2xf32> to vector<2x1xf32>
    %788 = math.log %787 : vector<2x1xf32>
    %789 = arith.addf %788, %782 : vector<2x1xf32>
    %790 = vector.broadcast %789 : vector<2x1xf32> to vector<2x16xf32>
    %791 = arith.subf %780, %790 : vector<2x16xf32>
    %c1_165 = arith.constant 1 : index
    %c0_166 = arith.constant 0 : index
    %c0_167 = arith.constant 0 : index
    %792 = vector.load %arg19[%c1_165, %c0_166, %c0_167] : memref<6x2x16xf32, #tpu.memory_space<vmem>>, vector<1x2x16xf32>
    %793 = vector.shape_cast %792 : vector<1x2x16xf32> to vector<2x16xf32>
    %794 = vector.shape_cast %791 : vector<2x16xf32> to vector<1x2x16xf32>
    tpu.vector_store %arg19[%c1_165, %c0_166, %c0_167], %794 {strides = array<i32>} : memref<6x2x16xf32, #tpu.memory_space<vmem>>, vector<1x2x16xf32>,
    %cst_168 = arith.constant dense<0xFF800000> : vector<2xf32>
    %795 = vector.multi_reduction <maximumf>, %791, %cst_168 [1] : vector<2x16xf32> to vector<2xf32>
    %796 = vector.shape_cast %795 : vector<2xf32> to vector<2x1xf32>
    %797 = vector.broadcast %796 : vector<2x1xf32> to vector<2x16xf32>
    %798 = arith.cmpf oeq, %791, %797 : vector<2x16xf32>
    %c16_i32 = arith.constant 16 : i32
    %799 = vector.broadcast %c16_i32 : i32 to vector<2x16xi32>
    %800 = arith.select %798, %734, %799 : vector<2x16xi1>, vector<2x16xi32>
    %cst_169 = arith.constant dense<2147483647> : vector<2xi32>
    %801 = vector.multi_reduction <minsi>, %800, %cst_169 [1] : vector<2x16xi32> to vector<2xi32>
    %802 = vector.shape_cast %801 : vector<2xi32> to vector<2x1xi32>
    %803 = vector.broadcast %802 : vector<2x1xi32> to vector<2x16xi32>
    %804 = arith.cmpi eq, %734, %803 : vector<2x16xi32>
    %805 = arith.extui %804 : vector<2x16xi1> to vector<2x16xi32>
    %806 = arith.sitofp %805 : vector<2x16xi32> to vector<2x16xf32>
    %cst_170 = arith.constant dense<0.000000e+00> : vector<2x256xf32>
    %807 = tpu.matmul %806, %723, %cst_170 {dimension_numbers = #tpu.dot_dimension_numbers<[1], [0], [0], [1], [0, 0, 1, 1], [], []>} : vector<2x16xf32>, vector<16x256xf32>, vector<2x256xf32> -> vector<2x256xf32>
    %cst_171 = arith.constant dense<0.000000e+00> : vector<2x256xf32>
    %808 = tpu.matmul %759, %724, %cst_171 {dimension_numbers = #tpu.dot_dimension_numbers<[1], [0], [0], [1], [0, 0, 1, 1], [], []>} : vector<2x64xf32>, vector<64x256xf32>, vector<2x256xf32> -> vector<2x256xf32>
    %809 = arith.addf %807, %808 : vector<2x256xf32>
    %810 = arith.negf %809 : vector<2x256xf32>
    %811 = math.exp %810 : vector<2x256xf32>
    %cst_172 = arith.constant 1.000000e+00 : f32
    %812 = vector.broadcast %cst_172 : f32 to vector<2x256xf32>
    %813 = arith.addf %812, %811 : vector<2x256xf32>
    %814 = arith.divf %812, %813 : vector<2x256xf32>
    %815 = vector.extract_strided_slice %814 {offsets = [0, 0], sizes = [2, 64], strides = [1, 1]} : vector<2x256xf32> to vector<2x64xf32>
    %816 = vector.extract_strided_slice %814 {offsets = [0, 64], sizes = [2, 64], strides = [1, 1]} : vector<2x256xf32> to vector<2x64xf32>
    %817 = vector.extract_strided_slice %814 {offsets = [0, 192], sizes = [2, 64], strides = [1, 1]} : vector<2x256xf32> to vector<2x64xf32>
    %818 = vector.extract_strided_slice %809 {offsets = [0, 128], sizes = [2, 64], strides = [1, 1]} : vector<2x256xf32> to vector<2x64xf32>
    %819 = math.tanh %818 : vector<2x64xf32>
    %820 = arith.mulf %816, %757 : vector<2x64xf32>
    %821 = arith.mulf %815, %819 : vector<2x64xf32>
    %822 = arith.addf %820, %821 : vector<2x64xf32>
    %823 = math.tanh %822 : vector<2x64xf32>
    %824 = arith.mulf %817, %823 : vector<2x64xf32>
    %cst_173 = arith.constant dense<0.000000e+00> : vector<2x256xf32>
    %825 = tpu.matmul %824, %725, %cst_173 {dimension_numbers = #tpu.dot_dimension_numbers<[1], [0], [0], [1], [0, 0, 1, 1], [], []>} : vector<2x64xf32>, vector<64x256xf32>, vector<2x256xf32> -> vector<2x256xf32>
    %cst_174 = arith.constant dense<0.000000e+00> : vector<2x256xf32>
    %826 = tpu.matmul %778, %726, %cst_174 {dimension_numbers = #tpu.dot_dimension_numbers<[1], [0], [0], [1], [0, 0, 1, 1], [], []>} : vector<2x64xf32>, vector<64x256xf32>, vector<2x256xf32> -> vector<2x256xf32>
    %827 = arith.addf %825, %826 : vector<2x256xf32>
    %828 = arith.addf %827, %729 : vector<2x256xf32>
    %829 = arith.negf %828 : vector<2x256xf32>
    %830 = math.exp %829 : vector<2x256xf32>
    %cst_175 = arith.constant 1.000000e+00 : f32
    %831 = vector.broadcast %cst_175 : f32 to vector<2x256xf32>
    %832 = arith.addf %831, %830 : vector<2x256xf32>
    %833 = arith.divf %831, %832 : vector<2x256xf32>
    %834 = vector.extract_strided_slice %833 {offsets = [0, 0], sizes = [2, 64], strides = [1, 1]} : vector<2x256xf32> to vector<2x64xf32>
    %835 = vector.extract_strided_slice %833 {offsets = [0, 64], sizes = [2, 64], strides = [1, 1]} : vector<2x256xf32> to vector<2x64xf32>
    %836 = vector.extract_strided_slice %833 {offsets = [0, 192], sizes = [2, 64], strides = [1, 1]} : vector<2x256xf32> to vector<2x64xf32>
    %837 = vector.extract_strided_slice %828 {offsets = [0, 128], sizes = [2, 64], strides = [1, 1]} : vector<2x256xf32> to vector<2x64xf32>
    %838 = math.tanh %837 : vector<2x64xf32>
    %839 = arith.mulf %835, %776 : vector<2x64xf32>
    %840 = arith.mulf %834, %838 : vector<2x64xf32>
    %841 = arith.addf %839, %840 : vector<2x64xf32>
    %842 = math.tanh %841 : vector<2x64xf32>
    %843 = arith.mulf %836, %842 : vector<2x64xf32>
    %cst_176 = arith.constant dense<0.000000e+00> : vector<2x16xf32>
    %844 = tpu.matmul %843, %730, %cst_176 {dimension_numbers = #tpu.dot_dimension_numbers<[1], [0], [0], [1], [0, 0, 1, 1], [], []>} : vector<2x64xf32>, vector<64x16xf32>, vector<2x16xf32> -> vector<2x16xf32>
    %845 = arith.addf %844, %733 : vector<2x16xf32>
    %cst_177 = arith.constant dense<0xFF800000> : vector<2xf32>
    %846 = vector.multi_reduction <maximumf>, %845, %cst_177 [1] : vector<2x16xf32> to vector<2xf32>
    %847 = vector.shape_cast %846 : vector<2xf32> to vector<2x1xf32>
    %848 = vector.broadcast %847 : vector<2x1xf32> to vector<2x16xf32>
    %849 = arith.subf %845, %848 : vector<2x16xf32>
    %850 = math.exp %849 : vector<2x16xf32>
    %cst_178 = arith.constant dense<0.000000e+00> : vector<2xf32>
    %851 = vector.multi_reduction <add>, %850, %cst_178 [1] : vector<2x16xf32> to vector<2xf32>
    %852 = vector.shape_cast %851 : vector<2xf32> to vector<2x1xf32>
    %853 = math.log %852 : vector<2x1xf32>
    %854 = arith.addf %853, %847 : vector<2x1xf32>
    %855 = vector.broadcast %854 : vector<2x1xf32> to vector<2x16xf32>
    %856 = arith.subf %845, %855 : vector<2x16xf32>
    %c2_179 = arith.constant 2 : index
    %c0_180 = arith.constant 0 : index
    %c0_181 = arith.constant 0 : index
    %857 = vector.load %arg19[%c2_179, %c0_180, %c0_181] : memref<6x2x16xf32, #tpu.memory_space<vmem>>, vector<1x2x16xf32>
    %858 = vector.shape_cast %857 : vector<1x2x16xf32> to vector<2x16xf32>
    %859 = vector.shape_cast %856 : vector<2x16xf32> to vector<1x2x16xf32>
    tpu.vector_store %arg19[%c2_179, %c0_180, %c0_181], %859 {strides = array<i32>} : memref<6x2x16xf32, #tpu.memory_space<vmem>>, vector<1x2x16xf32>,
    %cst_182 = arith.constant dense<0xFF800000> : vector<2xf32>
    %860 = vector.multi_reduction <maximumf>, %856, %cst_182 [1] : vector<2x16xf32> to vector<2xf32>
    %861 = vector.shape_cast %860 : vector<2xf32> to vector<2x1xf32>
    %862 = vector.broadcast %861 : vector<2x1xf32> to vector<2x16xf32>
    %863 = arith.cmpf oeq, %856, %862 : vector<2x16xf32>
    %c16_i32_183 = arith.constant 16 : i32
    %864 = vector.broadcast %c16_i32_183 : i32 to vector<2x16xi32>
    %865 = arith.select %863, %734, %864 : vector<2x16xi1>, vector<2x16xi32>
    %cst_184 = arith.constant dense<2147483647> : vector<2xi32>
    %866 = vector.multi_reduction <minsi>, %865, %cst_184 [1] : vector<2x16xi32> to vector<2xi32>
    %867 = vector.shape_cast %866 : vector<2xi32> to vector<2x1xi32>
    %868 = vector.broadcast %867 : vector<2x1xi32> to vector<2x16xi32>
    %869 = arith.cmpi eq, %734, %868 : vector<2x16xi32>
    %870 = arith.extui %869 : vector<2x16xi1> to vector<2x16xi32>
    %871 = arith.sitofp %870 : vector<2x16xi32> to vector<2x16xf32>
    %cst_185 = arith.constant dense<0.000000e+00> : vector<2x256xf32>
    %872 = tpu.matmul %871, %723, %cst_185 {dimension_numbers = #tpu.dot_dimension_numbers<[1], [0], [0], [1], [0, 0, 1, 1], [], []>} : vector<2x16xf32>, vector<16x256xf32>, vector<2x256xf32> -> vector<2x256xf32>
    %cst_186 = arith.constant dense<0.000000e+00> : vector<2x256xf32>
    %873 = tpu.matmul %824, %724, %cst_186 {dimension_numbers = #tpu.dot_dimension_numbers<[1], [0], [0], [1], [0, 0, 1, 1], [], []>} : vector<2x64xf32>, vector<64x256xf32>, vector<2x256xf32> -> vector<2x256xf32>
    %874 = arith.addf %872, %873 : vector<2x256xf32>
    %875 = arith.negf %874 : vector<2x256xf32>
    %876 = math.exp %875 : vector<2x256xf32>
    %cst_187 = arith.constant 1.000000e+00 : f32
    %877 = vector.broadcast %cst_187 : f32 to vector<2x256xf32>
    %878 = arith.addf %877, %876 : vector<2x256xf32>
    %879 = arith.divf %877, %878 : vector<2x256xf32>
    %880 = vector.extract_strided_slice %879 {offsets = [0, 0], sizes = [2, 64], strides = [1, 1]} : vector<2x256xf32> to vector<2x64xf32>
    %881 = vector.extract_strided_slice %879 {offsets = [0, 64], sizes = [2, 64], strides = [1, 1]} : vector<2x256xf32> to vector<2x64xf32>
    %882 = vector.extract_strided_slice %879 {offsets = [0, 192], sizes = [2, 64], strides = [1, 1]} : vector<2x256xf32> to vector<2x64xf32>
    %883 = vector.extract_strided_slice %874 {offsets = [0, 128], sizes = [2, 64], strides = [1, 1]} : vector<2x256xf32> to vector<2x64xf32>
    %884 = math.tanh %883 : vector<2x64xf32>
    %885 = arith.mulf %881, %822 : vector<2x64xf32>
    %886 = arith.mulf %880, %884 : vector<2x64xf32>
    %887 = arith.addf %885, %886 : vector<2x64xf32>
    %888 = math.tanh %887 : vector<2x64xf32>
    %889 = arith.mulf %882, %888 : vector<2x64xf32>
    %cst_188 = arith.constant dense<0.000000e+00> : vector<2x256xf32>
    %890 = tpu.matmul %889, %725, %cst_188 {dimension_numbers = #tpu.dot_dimension_numbers<[1], [0], [0], [1], [0, 0, 1, 1], [], []>} : vector<2x64xf32>, vector<64x256xf32>, vector<2x256xf32> -> vector<2x256xf32>
    %cst_189 = arith.constant dense<0.000000e+00> : vector<2x256xf32>
    %891 = tpu.matmul %843, %726, %cst_189 {dimension_numbers = #tpu.dot_dimension_numbers<[1], [0], [0], [1], [0, 0, 1, 1], [], []>} : vector<2x64xf32>, vector<64x256xf32>, vector<2x256xf32> -> vector<2x256xf32>
    %892 = arith.addf %890, %891 : vector<2x256xf32>
    %893 = arith.addf %892, %729 : vector<2x256xf32>
    %894 = arith.negf %893 : vector<2x256xf32>
    %895 = math.exp %894 : vector<2x256xf32>
    %cst_190 = arith.constant 1.000000e+00 : f32
    %896 = vector.broadcast %cst_190 : f32 to vector<2x256xf32>
    %897 = arith.addf %896, %895 : vector<2x256xf32>
    %898 = arith.divf %896, %897 : vector<2x256xf32>
    %899 = vector.extract_strided_slice %898 {offsets = [0, 0], sizes = [2, 64], strides = [1, 1]} : vector<2x256xf32> to vector<2x64xf32>
    %900 = vector.extract_strided_slice %898 {offsets = [0, 64], sizes = [2, 64], strides = [1, 1]} : vector<2x256xf32> to vector<2x64xf32>
    %901 = vector.extract_strided_slice %898 {offsets = [0, 192], sizes = [2, 64], strides = [1, 1]} : vector<2x256xf32> to vector<2x64xf32>
    %902 = vector.extract_strided_slice %893 {offsets = [0, 128], sizes = [2, 64], strides = [1, 1]} : vector<2x256xf32> to vector<2x64xf32>
    %903 = math.tanh %902 : vector<2x64xf32>
    %904 = arith.mulf %900, %841 : vector<2x64xf32>
    %905 = arith.mulf %899, %903 : vector<2x64xf32>
    %906 = arith.addf %904, %905 : vector<2x64xf32>
    %907 = math.tanh %906 : vector<2x64xf32>
    %908 = arith.mulf %901, %907 : vector<2x64xf32>
    %cst_191 = arith.constant dense<0.000000e+00> : vector<2x16xf32>
    %909 = tpu.matmul %908, %730, %cst_191 {dimension_numbers = #tpu.dot_dimension_numbers<[1], [0], [0], [1], [0, 0, 1, 1], [], []>} : vector<2x64xf32>, vector<64x16xf32>, vector<2x16xf32> -> vector<2x16xf32>
    %910 = arith.addf %909, %733 : vector<2x16xf32>
    %cst_192 = arith.constant dense<0xFF800000> : vector<2xf32>
    %911 = vector.multi_reduction <maximumf>, %910, %cst_192 [1] : vector<2x16xf32> to vector<2xf32>
    %912 = vector.shape_cast %911 : vector<2xf32> to vector<2x1xf32>
    %913 = vector.broadcast %912 : vector<2x1xf32> to vector<2x16xf32>
    %914 = arith.subf %910, %913 : vector<2x16xf32>
    %915 = math.exp %914 : vector<2x16xf32>
    %cst_193 = arith.constant dense<0.000000e+00> : vector<2xf32>
    %916 = vector.multi_reduction <add>, %915, %cst_193 [1] : vector<2x16xf32> to vector<2xf32>
    %917 = vector.shape_cast %916 : vector<2xf32> to vector<2x1xf32>
    %918 = math.log %917 : vector<2x1xf32>
    %919 = arith.addf %918, %912 : vector<2x1xf32>
    %920 = vector.broadcast %919 : vector<2x1xf32> to vector<2x16xf32>
    %921 = arith.subf %910, %920 : vector<2x16xf32>
    %c3_194 = arith.constant 3 : index
    %c0_195 = arith.constant 0 : index
    %c0_196 = arith.constant 0 : index
    %922 = vector.load %arg19[%c3_194, %c0_195, %c0_196] : memref<6x2x16xf32, #tpu.memory_space<vmem>>, vector<1x2x16xf32>
    %923 = vector.shape_cast %922 : vector<1x2x16xf32> to vector<2x16xf32>
    %924 = vector.shape_cast %921 : vector<2x16xf32> to vector<1x2x16xf32>
    tpu.vector_store %arg19[%c3_194, %c0_195, %c0_196], %924 {strides = array<i32>} : memref<6x2x16xf32, #tpu.memory_space<vmem>>, vector<1x2x16xf32>,
    %cst_197 = arith.constant dense<0xFF800000> : vector<2xf32>
    %925 = vector.multi_reduction <maximumf>, %921, %cst_197 [1] : vector<2x16xf32> to vector<2xf32>
    %926 = vector.shape_cast %925 : vector<2xf32> to vector<2x1xf32>
    %927 = vector.broadcast %926 : vector<2x1xf32> to vector<2x16xf32>
    %928 = arith.cmpf oeq, %921, %927 : vector<2x16xf32>
    %c16_i32_198 = arith.constant 16 : i32
    %929 = vector.broadcast %c16_i32_198 : i32 to vector<2x16xi32>
    %930 = arith.select %928, %734, %929 : vector<2x16xi1>, vector<2x16xi32>
    %cst_199 = arith.constant dense<2147483647> : vector<2xi32>
    %931 = vector.multi_reduction <minsi>, %930, %cst_199 [1] : vector<2x16xi32> to vector<2xi32>
    %932 = vector.shape_cast %931 : vector<2xi32> to vector<2x1xi32>
    %933 = vector.broadcast %932 : vector<2x1xi32> to vector<2x16xi32>
    %934 = arith.cmpi eq, %734, %933 : vector<2x16xi32>
    %935 = arith.extui %934 : vector<2x16xi1> to vector<2x16xi32>
    %936 = arith.sitofp %935 : vector<2x16xi32> to vector<2x16xf32>
    %cst_200 = arith.constant dense<0.000000e+00> : vector<2x256xf32>
    %937 = tpu.matmul %936, %723, %cst_200 {dimension_numbers = #tpu.dot_dimension_numbers<[1], [0], [0], [1], [0, 0, 1, 1], [], []>} : vector<2x16xf32>, vector<16x256xf32>, vector<2x256xf32> -> vector<2x256xf32>
    %cst_201 = arith.constant dense<0.000000e+00> : vector<2x256xf32>
    %938 = tpu.matmul %889, %724, %cst_201 {dimension_numbers = #tpu.dot_dimension_numbers<[1], [0], [0], [1], [0, 0, 1, 1], [], []>} : vector<2x64xf32>, vector<64x256xf32>, vector<2x256xf32> -> vector<2x256xf32>
    %939 = arith.addf %937, %938 : vector<2x256xf32>
    %940 = arith.negf %939 : vector<2x256xf32>
    %941 = math.exp %940 : vector<2x256xf32>
    %cst_202 = arith.constant 1.000000e+00 : f32
    %942 = vector.broadcast %cst_202 : f32 to vector<2x256xf32>
    %943 = arith.addf %942, %941 : vector<2x256xf32>
    %944 = arith.divf %942, %943 : vector<2x256xf32>
    %945 = vector.extract_strided_slice %944 {offsets = [0, 0], sizes = [2, 64], strides = [1, 1]} : vector<2x256xf32> to vector<2x64xf32>
    %946 = vector.extract_strided_slice %944 {offsets = [0, 64], sizes = [2, 64], strides = [1, 1]} : vector<2x256xf32> to vector<2x64xf32>
    %947 = vector.extract_strided_slice %944 {offsets = [0, 192], sizes = [2, 64], strides = [1, 1]} : vector<2x256xf32> to vector<2x64xf32>
    %948 = vector.extract_strided_slice %939 {offsets = [0, 128], sizes = [2, 64], strides = [1, 1]} : vector<2x256xf32> to vector<2x64xf32>
    %949 = math.tanh %948 : vector<2x64xf32>
    %950 = arith.mulf %946, %887 : vector<2x64xf32>
    %951 = arith.mulf %945, %949 : vector<2x64xf32>
    %952 = arith.addf %950, %951 : vector<2x64xf32>
    %953 = math.tanh %952 : vector<2x64xf32>
    %954 = arith.mulf %947, %953 : vector<2x64xf32>
    %cst_203 = arith.constant dense<0.000000e+00> : vector<2x256xf32>
    %955 = tpu.matmul %954, %725, %cst_203 {dimension_numbers = #tpu.dot_dimension_numbers<[1], [0], [0], [1], [0, 0, 1, 1], [], []>} : vector<2x64xf32>, vector<64x256xf32>, vector<2x256xf32> -> vector<2x256xf32>
    %cst_204 = arith.constant dense<0.000000e+00> : vector<2x256xf32>
    %956 = tpu.matmul %908, %726, %cst_204 {dimension_numbers = #tpu.dot_dimension_numbers<[1], [0], [0], [1], [0, 0, 1, 1], [], []>} : vector<2x64xf32>, vector<64x256xf32>, vector<2x256xf32> -> vector<2x256xf32>
    %957 = arith.addf %955, %956 : vector<2x256xf32>
    %958 = arith.addf %957, %729 : vector<2x256xf32>
    %959 = arith.negf %958 : vector<2x256xf32>
    %960 = math.exp %959 : vector<2x256xf32>
    %cst_205 = arith.constant 1.000000e+00 : f32
    %961 = vector.broadcast %cst_205 : f32 to vector<2x256xf32>
    %962 = arith.addf %961, %960 : vector<2x256xf32>
    %963 = arith.divf %961, %962 : vector<2x256xf32>
    %964 = vector.extract_strided_slice %963 {offsets = [0, 0], sizes = [2, 64], strides = [1, 1]} : vector<2x256xf32> to vector<2x64xf32>
    %965 = vector.extract_strided_slice %963 {offsets = [0, 64], sizes = [2, 64], strides = [1, 1]} : vector<2x256xf32> to vector<2x64xf32>
    %966 = vector.extract_strided_slice %963 {offsets = [0, 192], sizes = [2, 64], strides = [1, 1]} : vector<2x256xf32> to vector<2x64xf32>
    %967 = vector.extract_strided_slice %958 {offsets = [0, 128], sizes = [2, 64], strides = [1, 1]} : vector<2x256xf32> to vector<2x64xf32>
    %968 = math.tanh %967 : vector<2x64xf32>
    %969 = arith.mulf %965, %906 : vector<2x64xf32>
    %970 = arith.mulf %964, %968 : vector<2x64xf32>
    %971 = arith.addf %969, %970 : vector<2x64xf32>
    %972 = math.tanh %971 : vector<2x64xf32>
    %973 = arith.mulf %966, %972 : vector<2x64xf32>
    %cst_206 = arith.constant dense<0.000000e+00> : vector<2x16xf32>
    %974 = tpu.matmul %973, %730, %cst_206 {dimension_numbers = #tpu.dot_dimension_numbers<[1], [0], [0], [1], [0, 0, 1, 1], [], []>} : vector<2x64xf32>, vector<64x16xf32>, vector<2x16xf32> -> vector<2x16xf32>
    %975 = arith.addf %974, %733 : vector<2x16xf32>
    %cst_207 = arith.constant dense<0xFF800000> : vector<2xf32>
    %976 = vector.multi_reduction <maximumf>, %975, %cst_207 [1] : vector<2x16xf32> to vector<2xf32>
    %977 = vector.shape_cast %976 : vector<2xf32> to vector<2x1xf32>
    %978 = vector.broadcast %977 : vector<2x1xf32> to vector<2x16xf32>
    %979 = arith.subf %975, %978 : vector<2x16xf32>
    %980 = math.exp %979 : vector<2x16xf32>
    %cst_208 = arith.constant dense<0.000000e+00> : vector<2xf32>
    %981 = vector.multi_reduction <add>, %980, %cst_208 [1] : vector<2x16xf32> to vector<2xf32>
    %982 = vector.shape_cast %981 : vector<2xf32> to vector<2x1xf32>
    %983 = math.log %982 : vector<2x1xf32>
    %984 = arith.addf %983, %977 : vector<2x1xf32>
    %985 = vector.broadcast %984 : vector<2x1xf32> to vector<2x16xf32>
    %986 = arith.subf %975, %985 : vector<2x16xf32>
    %c4_209 = arith.constant 4 : index
    %c0_210 = arith.constant 0 : index
    %c0_211 = arith.constant 0 : index
    %987 = vector.load %arg19[%c4_209, %c0_210, %c0_211] : memref<6x2x16xf32, #tpu.memory_space<vmem>>, vector<1x2x16xf32>
    %988 = vector.shape_cast %987 : vector<1x2x16xf32> to vector<2x16xf32>
    %989 = vector.shape_cast %986 : vector<2x16xf32> to vector<1x2x16xf32>
    tpu.vector_store %arg19[%c4_209, %c0_210, %c0_211], %989 {strides = array<i32>} : memref<6x2x16xf32, #tpu.memory_space<vmem>>, vector<1x2x16xf32>,
    %cst_212 = arith.constant dense<0xFF800000> : vector<2xf32>
    %990 = vector.multi_reduction <maximumf>, %986, %cst_212 [1] : vector<2x16xf32> to vector<2xf32>
    %991 = vector.shape_cast %990 : vector<2xf32> to vector<2x1xf32>
    %992 = vector.broadcast %991 : vector<2x1xf32> to vector<2x16xf32>
    %993 = arith.cmpf oeq, %986, %992 : vector<2x16xf32>
    %c16_i32_213 = arith.constant 16 : i32
    %994 = vector.broadcast %c16_i32_213 : i32 to vector<2x16xi32>
    %995 = arith.select %993, %734, %994 : vector<2x16xi1>, vector<2x16xi32>
    %cst_214 = arith.constant dense<2147483647> : vector<2xi32>
    %996 = vector.multi_reduction <minsi>, %995, %cst_214 [1] : vector<2x16xi32> to vector<2xi32>
    %997 = vector.shape_cast %996 : vector<2xi32> to vector<2x1xi32>
    %998 = vector.broadcast %997 : vector<2x1xi32> to vector<2x16xi32>
    %999 = arith.cmpi eq, %734, %998 : vector<2x16xi32>
    %1000 = arith.extui %999 : vector<2x16xi1> to vector<2x16xi32>
    %1001 = arith.sitofp %1000 : vector<2x16xi32> to vector<2x16xf32>
    %cst_215 = arith.constant dense<0.000000e+00> : vector<2x256xf32>
    %1002 = tpu.matmul %1001, %723, %cst_215 {dimension_numbers = #tpu.dot_dimension_numbers<[1], [0], [0], [1], [0, 0, 1, 1], [], []>} : vector<2x16xf32>, vector<16x256xf32>, vector<2x256xf32> -> vector<2x256xf32>
    %cst_216 = arith.constant dense<0.000000e+00> : vector<2x256xf32>
    %1003 = tpu.matmul %954, %724, %cst_216 {dimension_numbers = #tpu.dot_dimension_numbers<[1], [0], [0], [1], [0, 0, 1, 1], [], []>} : vector<2x64xf32>, vector<64x256xf32>, vector<2x256xf32> -> vector<2x256xf32>
    %1004 = arith.addf %1002, %1003 : vector<2x256xf32>
    %1005 = arith.negf %1004 : vector<2x256xf32>
    %1006 = math.exp %1005 : vector<2x256xf32>
    %cst_217 = arith.constant 1.000000e+00 : f32
    %1007 = vector.broadcast %cst_217 : f32 to vector<2x256xf32>
    %1008 = arith.addf %1007, %1006 : vector<2x256xf32>
    %1009 = arith.divf %1007, %1008 : vector<2x256xf32>
    %1010 = vector.extract_strided_slice %1009 {offsets = [0, 0], sizes = [2, 64], strides = [1, 1]} : vector<2x256xf32> to vector<2x64xf32>
    %1011 = vector.extract_strided_slice %1009 {offsets = [0, 64], sizes = [2, 64], strides = [1, 1]} : vector<2x256xf32> to vector<2x64xf32>
    %1012 = vector.extract_strided_slice %1009 {offsets = [0, 192], sizes = [2, 64], strides = [1, 1]} : vector<2x256xf32> to vector<2x64xf32>
    %1013 = vector.extract_strided_slice %1004 {offsets = [0, 128], sizes = [2, 64], strides = [1, 1]} : vector<2x256xf32> to vector<2x64xf32>
    %1014 = math.tanh %1013 : vector<2x64xf32>
    %1015 = arith.mulf %1011, %952 : vector<2x64xf32>
    %1016 = arith.mulf %1010, %1014 : vector<2x64xf32>
    %1017 = arith.addf %1015, %1016 : vector<2x64xf32>
    %1018 = math.tanh %1017 : vector<2x64xf32>
    %1019 = arith.mulf %1012, %1018 : vector<2x64xf32>
    %cst_218 = arith.constant dense<0.000000e+00> : vector<2x256xf32>
    %1020 = tpu.matmul %1019, %725, %cst_218 {dimension_numbers = #tpu.dot_dimension_numbers<[1], [0], [0], [1], [0, 0, 1, 1], [], []>} : vector<2x64xf32>, vector<64x256xf32>, vector<2x256xf32> -> vector<2x256xf32>
    %cst_219 = arith.constant dense<0.000000e+00> : vector<2x256xf32>
    %1021 = tpu.matmul %973, %726, %cst_219 {dimension_numbers = #tpu.dot_dimension_numbers<[1], [0], [0], [1], [0, 0, 1, 1], [], []>} : vector<2x64xf32>, vector<64x256xf32>, vector<2x256xf32> -> vector<2x256xf32>
    %1022 = arith.addf %1020, %1021 : vector<2x256xf32>
    %1023 = arith.addf %1022, %729 : vector<2x256xf32>
    %1024 = arith.negf %1023 : vector<2x256xf32>
    %1025 = math.exp %1024 : vector<2x256xf32>
    %cst_220 = arith.constant 1.000000e+00 : f32
    %1026 = vector.broadcast %cst_220 : f32 to vector<2x256xf32>
    %1027 = arith.addf %1026, %1025 : vector<2x256xf32>
    %1028 = arith.divf %1026, %1027 : vector<2x256xf32>
    %1029 = vector.extract_strided_slice %1028 {offsets = [0, 0], sizes = [2, 64], strides = [1, 1]} : vector<2x256xf32> to vector<2x64xf32>
    %1030 = vector.extract_strided_slice %1028 {offsets = [0, 64], sizes = [2, 64], strides = [1, 1]} : vector<2x256xf32> to vector<2x64xf32>
    %1031 = vector.extract_strided_slice %1028 {offsets = [0, 192], sizes = [2, 64], strides = [1, 1]} : vector<2x256xf32> to vector<2x64xf32>
    %1032 = vector.extract_strided_slice %1023 {offsets = [0, 128], sizes = [2, 64], strides = [1, 1]} : vector<2x256xf32> to vector<2x64xf32>
    %1033 = math.tanh %1032 : vector<2x64xf32>
    %1034 = arith.mulf %1030, %971 : vector<2x64xf32>
    %1035 = arith.mulf %1029, %1033 : vector<2x64xf32>
    %1036 = arith.addf %1034, %1035 : vector<2x64xf32>
    %1037 = math.tanh %1036 : vector<2x64xf32>
    %1038 = arith.mulf %1031, %1037 : vector<2x64xf32>
    %cst_221 = arith.constant dense<0.000000e+00> : vector<2x16xf32>
    %1039 = tpu.matmul %1038, %730, %cst_221 {dimension_numbers = #tpu.dot_dimension_numbers<[1], [0], [0], [1], [0, 0, 1, 1], [], []>} : vector<2x64xf32>, vector<64x16xf32>, vector<2x16xf32> -> vector<2x16xf32>
    %1040 = arith.addf %1039, %733 : vector<2x16xf32>
    %cst_222 = arith.constant dense<0xFF800000> : vector<2xf32>
    %1041 = vector.multi_reduction <maximumf>, %1040, %cst_222 [1] : vector<2x16xf32> to vector<2xf32>
    %1042 = vector.shape_cast %1041 : vector<2xf32> to vector<2x1xf32>
    %1043 = vector.broadcast %1042 : vector<2x1xf32> to vector<2x16xf32>
    %1044 = arith.subf %1040, %1043 : vector<2x16xf32>
    %1045 = math.exp %1044 : vector<2x16xf32>
    %cst_223 = arith.constant dense<0.000000e+00> : vector<2xf32>
    %1046 = vector.multi_reduction <add>, %1045, %cst_223 [1] : vector<2x16xf32> to vector<2xf32>
    %1047 = vector.shape_cast %1046 : vector<2xf32> to vector<2x1xf32>
    %1048 = math.log %1047 : vector<2x1xf32>
    %1049 = arith.addf %1048, %1042 : vector<2x1xf32>
    %1050 = vector.broadcast %1049 : vector<2x1xf32> to vector<2x16xf32>
    %1051 = arith.subf %1040, %1050 : vector<2x16xf32>
    %c5_224 = arith.constant 5 : index
    %c0_225 = arith.constant 0 : index
    %c0_226 = arith.constant 0 : index
    %1052 = vector.load %arg19[%c5_224, %c0_225, %c0_226] : memref<6x2x16xf32, #tpu.memory_space<vmem>>, vector<1x2x16xf32>
    %1053 = vector.shape_cast %1052 : vector<1x2x16xf32> to vector<2x16xf32>
    %1054 = vector.shape_cast %1051 : vector<2x16xf32> to vector<1x2x16xf32>
    tpu.vector_store %arg19[%c5_224, %c0_225, %c0_226], %1054 {strides = array<i32>} : memref<6x2x16xf32, #tpu.memory_space<vmem>>, vector<1x2x16xf32>,
    return
  }
}

</mosaic_0001>

<bundles_post_ra>
// kernel: tpu_custom_call.1
= control target key start
LH: loop header
LB: loop body
LE: loop exit
PB: predicated region body
PF: predicated region fallthrough
CT: control target
= control target key end

     0   :  { %s10533_s0 = inlined_call_operand.hbm [shape: f32[8,2,16], index: 0, kind: input, shape index: {}]   ;;  %s10534_s1 = inlined_call_operand.hbm [shape: f32[16,256], index: 1, kind: input, shape index: {}]   ;;  %s10535_s2 = inlined_call_operand.hbm [shape: f32[1,256], index: 2, kind: input, shape index: {}]   ;;  %s10536_s3 = inlined_call_operand.hbm [shape: f32[32,128], index: 3, kind: input, shape index: {}]   ;;  %s10537_s4 = inlined_call_operand.hbm [shape: f32[32,128], index: 4, kind: input, shape index: {}]   ;;  %s10538_s5 = inlined_call_operand.hbm [shape: f32[32,256], index: 5, kind: input, shape index: {}]   ;;  %s10539_s6 = inlined_call_operand.hbm [shape: f32[32,256], index: 6, kind: input, shape index: {}]   ;;  %s10540_s7 = inlined_call_operand.hbm [shape: f32[1,256], index: 7, kind: input, shape index: {}]   ;;  %s10541_s8 = inlined_call_operand.hbm [shape: f32[32,128], index: 8, kind: input, shape index: {}]   ;;  %s10542_s9 = inlined_call_operand.hbm [shape: f32[32,128], index: 9, kind: input, shape index: {}]   ;;  %s10543_s10 = inlined_call_operand.hbm [shape: f32[16,32], index: 10, kind: input, shape index: {}]   ;;  %s10544_s11 = inlined_call_operand.hbm [shape: f32[32,256], index: 11, kind: input, shape index: {}]   ;;  %s10545_s12 = inlined_call_operand.hbm [shape: f32[1,256], index: 12, kind: input, shape index: {}]   ;;  %s10546_s13 = inlined_call_operand.vmem [shape: f32[64,256], index: 13, kind: input, shape index: {}]   ;;  %s10547_s14 = inlined_call_operand.hbm [shape: f32[64,256], index: 14, kind: input, shape index: {}]   ;;  %s10548_s15 = inlined_call_operand.hbm [shape: f32[1,256], index: 15, kind: input, shape index: {}]   ;;  %s10549_s16 = inlined_call_operand.hbm [shape: f32[64,256], index: 16, kind: input, shape index: {}]   ;;  %s10550_s17 = inlined_call_operand.vmem [shape: f32[64,16], index: 17, kind: input, shape index: {}]   ;;  %s10551_s18 = inlined_call_operand.vmem [shape: f32[1,16], index: 18, kind: input, shape index: {}]   ;;  %s10552_s19 = inlined_call_operand.hbm [shape: f32[6,2,16], index: 19, kind: output, shape index: {}]  }
   0x1   :  { %10563 = sst [smem:[#allocation41_spill]] %s10533_s0 }
   0x2   :  { %10564 = sst [smem:[#allocation42_spill]] %s10534_s1 }
   0x3   :  { %10565 = sst [smem:[#allocation43_spill]] %s10535_s2 }
   0x4   :  { %10566 = sst [smem:[#allocation44_spill]] %s10536_s3 }
   0x5   :  { %10567 = sst [smem:[#allocation45_spill]] %s10551_s18 }
   0x6   :  { %10568 = sst [smem:[#allocation46_spill]] %s10552_s19 }
   0x7   :  { %24 = vsyncpa [#allocation5], 0 }
   0x8   :  { %25 = vsyncpa [#allocation8], 0 }
   0x9   :  { %26 = vsyncpa [#allocation11], 0 }
   0xa   :  { %27 = vsyncpa [#allocation14], 0 }
   0xb   :  { %28 = vsyncpa [#allocation17], 0 }
   0xc   :  { %29 = vsyncpa [#allocation20], 0 }
   0xd   :  { %30 = vsyncpa [#allocation23], 0 }
   0xe   :  { %31 = vsyncpa [#allocation26], 0 }
   0xf   :  { %32 = vsyncpa [#allocation29], 0 }
  0x10   :  { %33 = vsyncpa [#allocation6], 0  ;;  %s8970_s0 = smov [#allocation7]   ;;  %s10569_s1 = sld [smem:[#allocation42_spill]] }
  0x11   :  { %s51_s30 = sshll.u32 %s8970_s0, 4  ;;  %s52_s30 = int_to_ptr.vmem [resolvable:$true] %s51_s30 }
  0x16   :  { %s8576_s22 = scalar_lea.hbm %s10569_s1, 512 }
  0x17   :  { %p8577_p0 = scmp.ne.s32.totalorder %s10569_s1, %s8576_s22  ;;  %p8580_p1 = scmp.lt.u32.totalorder %s8576_s22, %s10569_s1 }
  0x19   :  { %p8582_p2 = pnand %p8580_p1, %p8577_p0 }
  0x1b   :  { %8585 = shalt.err (!%p8582_p2)
}
  0x1c   :  { %s8586_s3 = scalar_lea.vmem %s52_s30, 512  ;;  %p8591_p4 = scmp.lt.s32.totalorder %s52_s30, %s52_s30 }
  0x1d   :  { %p8587_p3 = scmp.ne.s32.totalorder %s52_s30, %s8586_s3  ;;  %p8592_p5 = scmp.lt.s32.totalorder %s8586_s3, %s8586_s3 }
  0x1f   :  { %p8593_p6 = por %p8592_p5, %p8591_p4 }
  0x21   :  { %p8594_p7 = pnand %p8593_p6, %p8587_p3 }
  0x23   :  { %8597 = shalt.err (!%p8594_p7)
}
  0x24   :  { %s10559_s26 = smov 256   ;;  %s10561_s27 = smov 16  }
  0x25   :  { %57 = dma.hbm_to_vmem [thread:$0]  %s10569_s1, 512, %s52_s30, [#allocation8], %s10559_s26, %s10559_s26, %s10561_s27  }
  0x26   :  { %s8973_s0 = smov [#allocation10]   ;;  %s10570_s2 = sld [smem:[#allocation44_spill]] }
  0x27   :  { %s73_s20 = sshll.u32 %s8973_s0, 4  ;;  %s74_s20 = int_to_ptr.vmem [resolvable:$true] %s73_s20 }
  0x2c   :  { %s8598_s23 = scalar_lea.hbm %s10570_s2, 512 }
  0x2d   :  { %p8599_p8 = scmp.ne.s32.totalorder %s10570_s2, %s8598_s23  ;;  %p8602_p9 = scmp.lt.u32.totalorder %s8598_s23, %s10570_s2 }
  0x2f   :  { %p8604_p10 = pnand %p8602_p9, %p8599_p8 }
  0x31   :  { %8607 = shalt.err (!%p8604_p10)
}
  0x32   :  { %s8608_s18 = scalar_lea.vmem %s74_s20, 512  ;;  %p8613_p12 = scmp.lt.s32.totalorder %s74_s20, %s74_s20 }
  0x33   :  { %p8609_p11 = scmp.ne.s32.totalorder %s74_s20, %s8608_s18  ;;  %p8614_p13 = scmp.lt.s32.totalorder %s8608_s18, %s8608_s18 }
  0x35   :  { %p8615_p0 = por %p8614_p13, %p8613_p12 }
  0x37   :  { %p8616_p1 = pnand %p8615_p0, %p8609_p11 }
  0x39   :  { %8619 = shalt.err (!%p8616_p1)
}
  0x3a   :  { %s8974_s30 = smov 128   ;;  %s8975_s1 = smov 8  }
  0x3b   :  { %79 = dma.hbm_to_vmem [thread:$0]  %s10570_s2, 512, %s74_s20, [#allocation11], %s8974_s30, %s8974_s30, %s8975_s1  }
  0x3c   :  { %s8976_s19 = smov [#allocation13]   ;;  %s8977_s21 = smov [#allocation16]  }
  0x3d   :  { %s97_s0 = sshll.u32 %s8976_s19, 4  ;;  %s122_s22 = sshll.u32 %s8977_s21, 4  ;;  %s98_s0 = int_to_ptr.vmem [resolvable:$true] %s97_s0  ;;  %s123_s22 = int_to_ptr.vmem [resolvable:$true] %s122_s22 }
  0x3e   :  { %s8620_s24 = scalar_lea.hbm %s10538_s5, 1024 }
  0x3f   :  { %p8621_p2 = scmp.ne.s32.totalorder %s10538_s5, %s8620_s24  ;;  %p8624_p3 = scmp.lt.u32.totalorder %s8620_s24, %s10538_s5 }
  0x41   :  { %p8626_p4 = pnand %p8624_p3, %p8621_p2 }
  0x43   :  { %8629 = shalt.err (!%p8626_p4)
}
  0x44   :  { %s8630_s20 = scalar_lea.vmem %s98_s0, 1024  ;;  %p8635_p6 = scmp.lt.s32.totalorder %s98_s0, %s98_s0 }
  0x45   :  { %p8631_p5 = scmp.ne.s32.totalorder %s98_s0, %s8630_s20  ;;  %p8636_p7 = scmp.lt.s32.totalorder %s8630_s20, %s8630_s20 }
  0x47   :  { %p8637_p8 = por %p8636_p7, %p8635_p6 }
  0x49   :  { %p8638_p9 = pnand %p8637_p8, %p8631_p5 }
  0x4b   :  { %8641 = shalt.err (!%p8638_p9)
}
  0x4c   :  { %s10571_s2 = smov 16   ;;  %s10572_s28 = smov 256  }
  0x4d   :  { %103 = dma.hbm_to_vmem [thread:$0]  %s10538_s5, 1024, %s98_s0, [#allocation14], %s10572_s28, %s10572_s28, %s10571_s2  }
  0x4e   :  { %s8642_s26 = scalar_lea.hbm %s10540_s7, 32 }
  0x4f   :  { %p8643_p10 = scmp.ne.s32.totalorder %s10540_s7, %s8642_s26  ;;  %p8646_p11 = scmp.lt.u32.totalorder %s8642_s26, %s10540_s7 }
  0x51   :  { %p8648_p12 = pnand %p8646_p11, %p8643_p10 }
  0x53   :  { %8651 = shalt.err (!%p8648_p12)
}
  0x54   :  { %s8652_s3 = scalar_lea.vmem %s123_s22, 32  ;;  %p8657_p0 = scmp.lt.s32.totalorder %s123_s22, %s123_s22 }
  0x55   :  { %p8653_p13 = scmp.ne.s32.totalorder %s123_s22, %s8652_s3  ;;  %p8658_p1 = scmp.lt.s32.totalorder %s8652_s3, %s8652_s3 }
  0x57   :  { %p8659_p2 = por %p8658_p1, %p8657_p0 }
  0x59   :  { %p8660_p3 = pnand %p8659_p2, %p8653_p13 }
  0x5b   :  { %8663 = shalt.err (!%p8660_p3)
}
  0x5c   :  { %125 = dma.hbm_to_vmem [thread:$0]  %s10540_s7, 32, %s123_s22, [#allocation17]  }
  0x5d   :  { %s8978_s20 = smov [#allocation19]   ;;  %s8979_s19 = smov [#allocation22]  }
  0x5e   :  { %s143_s29 = sshll.u32 %s8978_s20, 4  ;;  %s167_s21 = sshll.u32 %s8979_s19, 4  ;;  %s144_s29 = int_to_ptr.vmem [resolvable:$true] %s143_s29  ;;  %s9156_s21 = int_to_ptr.vmem [resolvable:$true] %s167_s21 }
  0x5f   :  { %s8664_s27 = scalar_lea.hbm %s10542_s9, 512 }
  0x60   :  { %p8665_p4 = scmp.ne.s32.totalorder %s10542_s9, %s8664_s27  ;;  %p8668_p5 = scmp.lt.u32.totalorder %s8664_s27, %s10542_s9 }
  0x62   :  { %p8670_p6 = pnand %p8668_p5, %p8665_p4 }
  0x64   :  { %8673 = shalt.err (!%p8670_p6)
}
  0x65   :  { %s8674_s7 = scalar_lea.vmem %s144_s29, 512  ;;  %p8679_p8 = scmp.lt.s32.totalorder %s144_s29, %s144_s29 }
  0x66   :  { %p8675_p7 = scmp.ne.s32.totalorder %s144_s29, %s8674_s7  ;;  %p8680_p9 = scmp.lt.s32.totalorder %s8674_s7, %s8674_s7 }
  0x68   :  { %p8681_p10 = por %p8680_p9, %p8679_p8 }
  0x6a   :  { %p8682_p11 = pnand %p8681_p10, %p8675_p7 }
  0x6c   :  { %8685 = shalt.err (!%p8682_p11)
}
  0x6d   :  { %149 = dma.hbm_to_vmem [thread:$0]  %s10542_s9, 512, %s144_s29, [#allocation20], %s8974_s30, %s8974_s30, %s8975_s1  }
  0x6e   :  { %s8686_s19 = scalar_lea.hbm %s10544_s11, 1024 }
  0x6f   :  { %p8687_p12 = scmp.ne.s32.totalorder %s10544_s11, %s8686_s19  ;;  %p8690_p13 = scmp.lt.u32.totalorder %s8686_s19, %s10544_s11 }
  0x71   :  { %p8692_p0 = pnand %p8690_p13, %p8687_p12 }
  0x73   :  { %8695 = shalt.err (!%p8692_p0)
}
  0x74   :  { %s8696_s24 = scalar_lea.vmem %s9156_s21, 1024  ;;  %p8701_p2 = scmp.lt.s32.totalorder %s9156_s21, %s9156_s21 }
  0x75   :  { %p8697_p1 = scmp.ne.s32.totalorder %s9156_s21, %s8696_s24  ;;  %p8702_p3 = scmp.lt.s32.totalorder %s8696_s24, %s8696_s24 }
  0x77   :  { %p8703_p4 = por %p8702_p3, %p8701_p2 }
  0x79   :  { %p8704_p5 = pnand %p8703_p4, %p8697_p1 }
  0x7b   :  { %8707 = shalt.err (!%p8704_p5)
}
  0x7c   :  { %173 = dma.hbm_to_vmem [thread:$0]  %s10544_s11, 1024, %s9156_s21, [#allocation23], %s10572_s28, %s10572_s28, %s10571_s2  }
  0x7d   :  { %s8980_s25 = smov [#allocation25]   ;;  %s8981_s7 = smov [#allocation4]  }
  0x7e   :  { %s191_s3 = sshll.u32 %s8980_s25, 4  ;;  %s39_s22 = sshll.u32 %s8981_s7, 4  ;;  %s192_s3 = int_to_ptr.vmem [resolvable:$true] %s191_s3  ;;  %s9193_s22 = int_to_ptr.vmem [resolvable:$true] %s39_s22 }
  0x7f   :  { %s8708_s20 = scalar_lea.hbm %s10547_s14, 2048 }
  0x80   :  { %p8709_p6 = scmp.ne.s32.totalorder %s10547_s14, %s8708_s20  ;;  %p8712_p7 = scmp.lt.u32.totalorder %s8708_s20, %s10547_s14 }
  0x82   :  { %p8714_p8 = pnand %p8712_p7, %p8709_p6 }
  0x84   :  { %8717 = shalt.err (!%p8714_p8)
}
  0x85   :  { %s8718_s11 = scalar_lea.vmem %s192_s3, 2048  ;;  %p8723_p10 = scmp.lt.s32.totalorder %s192_s3, %s192_s3 }
  0x86   :  { %p8719_p9 = scmp.ne.s32.totalorder %s192_s3, %s8718_s11  ;;  %p8724_p11 = scmp.lt.s32.totalorder %s8718_s11, %s8718_s11 }
  0x88   :  { %p8725_p12 = por %p8724_p11, %p8723_p10 }
  0x8a   :  { %p8726_p13 = pnand %p8725_p12, %p8719_p9 }
  0x8c   :  { %8729 = shalt.err (!%p8726_p13)
}
  0x8d   :  { %197 = dma.hbm_to_vmem [thread:$0]  %s10547_s14, 2048, %s192_s3, [#allocation26], %s10572_s28, %s10572_s28, %s10571_s2  }
  0x8e   :  { %s10573_s29 = sld [smem:[#allocation41_spill]] }
  0x94   :  { %s8730_s25 = scalar_lea.hbm %s10573_s29, 256 }
  0x95   :  { %p8731_p0 = scmp.ne.s32.totalorder %s10573_s29, %s8730_s25  ;;  %p8734_p1 = scmp.lt.u32.totalorder %s8730_s25, %s10573_s29 }
  0x97   :  { %p8736_p2 = pnand %p8734_p1, %p8731_p0 }
  0x99   :  { %8739 = shalt.err (!%p8736_p2)
}
  0x9a   :  { %s8740_s19 = scalar_lea.vmem %s9193_s22, 256  ;;  %p8745_p4 = scmp.lt.s32.totalorder %s9193_s22, %s9193_s22 }
  0x9b   :  { %p8741_p3 = scmp.ne.s32.totalorder %s9193_s22, %s8740_s19  ;;  %p8746_p5 = scmp.lt.s32.totalorder %s8740_s19, %s8740_s19 }
  0x9d   :  { %p8747_p6 = por %p8746_p5, %p8745_p4 }
  0x9f   :  { %p8748_p7 = pnand %p8747_p6, %p8741_p3 }
  0xa1   :  { %8751 = shalt.err (!%p8748_p7)
}
  0xa2   :  { %s8982_s14 = smov 32   ;;  %s8983_s3 = smov 2  }
  0xa3   :  { %45 = dma.hbm_to_vmem [thread:$0]  %s10573_s29, 256, %s9193_s22, [#allocation5], %s8982_s14, %s8982_s14, %s8983_s3  }
  0xa4   :  { %s8984_s27 = smov [#allocation9]   ;;  %s8985_s21 = smov [#allocation12]  }
  0xa5   :  { %s64_s11 = sshll.u32 %s8984_s27, 4  ;;  %s85_s18 = sshll.u32 %s8985_s21, 4  ;;  %s65_s11 = int_to_ptr.vmem [resolvable:$true] %s64_s11  ;;  %s9230_s18 = int_to_ptr.vmem [resolvable:$true] %s85_s18 }
  0xa6   :  { %s10574_s25 = sld [smem:[#allocation43_spill]] }
  0xac   :  { %s8752_s7 = scalar_lea.hbm %s10574_s25, 32 }
  0xad   :  { %p8753_p8 = scmp.ne.s32.totalorder %s10574_s25, %s8752_s7  ;;  %p8756_p9 = scmp.lt.u32.totalorder %s8752_s7, %s10574_s25 }
  0xaf   :  { %p8758_p10 = pnand %p8756_p9, %p8753_p8 }
  0xb1   :  { %8761 = shalt.err (!%p8758_p10)
}
  0xb2   :  { %s8762_s22 = scalar_lea.vmem %s65_s11, 32  ;;  %p8767_p12 = scmp.lt.s32.totalorder %s65_s11, %s65_s11 }
  0xb3   :  { %p8763_p11 = scmp.ne.s32.totalorder %s65_s11, %s8762_s22  ;;  %p8768_p13 = scmp.lt.s32.totalorder %s8762_s22, %s8762_s22 }
  0xb5   :  { %p8769_p0 = por %p8768_p13, %p8767_p12 }
  0xb7   :  { %p8770_p1 = pnand %p8769_p0, %p8763_p11 }
  0xb9   :  { %8773 = shalt.err (!%p8770_p1)
}
  0xba   :  { %67 = dma.hbm_to_vmem [thread:$0]  %s10574_s25, 32, %s65_s11, [#allocation8]  }
  0xbb   :  { %s8774_s21 = scalar_lea.hbm %s10537_s4, 512 }
  0xbc   :  { %p8775_p2 = scmp.ne.s32.totalorder %s10537_s4, %s8774_s21  ;;  %p8778_p3 = scmp.lt.u32.totalorder %s8774_s21, %s10537_s4 }
  0xbe   :  { %p8780_p4 = pnand %p8778_p3, %p8775_p2 }
  0xc0   :  { %8783 = shalt.err (!%p8780_p4)
}
  0xc1   :  { %s8784_s0 = scalar_lea.vmem %s9230_s18, 512  ;;  %p8789_p6 = scmp.lt.s32.totalorder %s9230_s18, %s9230_s18 }
  0xc2   :  { %p8785_p5 = scmp.ne.s32.totalorder %s9230_s18, %s8784_s0  ;;  %p8790_p7 = scmp.lt.s32.totalorder %s8784_s0, %s8784_s0 }
  0xc4   :  { %p8791_p8 = por %p8790_p7, %p8789_p6 }
  0xc6   :  { %p8792_p9 = pnand %p8791_p8, %p8785_p5 }
  0xc8   :  { %8795 = shalt.err (!%p8792_p9)
}
  0xc9   :  { %91 = dma.hbm_to_vmem [thread:$0]  %s10537_s4, 512, %s9230_s18, [#allocation11], %s8974_s30, %s8974_s30, %s8975_s1  }
  0xca   :  { %s8986_s20 = smov [#allocation15]   ;;  %s8987_s22 = smov [#allocation18]  }
  0xcb   :  { %s109_s19 = sshll.u32 %s8986_s20, 4  ;;  %s131_s29 = sshll.u32 %s8987_s22, 4  ;;  %s110_s19 = int_to_ptr.vmem [resolvable:$true] %s109_s19  ;;  %s9264_s29 = int_to_ptr.vmem [resolvable:$true] %s131_s29 }
  0xcc   :  { %s8796_s27 = scalar_lea.hbm %s10539_s6, 1024 }
  0xcd   :  { %p8797_p10 = scmp.ne.s32.totalorder %s10539_s6, %s8796_s27  ;;  %p8800_p11 = scmp.lt.u32.totalorder %s8796_s27, %s10539_s6 }
  0xcf   :  { %p8802_p12 = pnand %p8800_p11, %p8797_p10 }
  0xd1   :  { %8805 = shalt.err (!%p8802_p12)
}
  0xd2   :  { %s8806_s4 = scalar_lea.vmem %s110_s19, 1024  ;;  %p8811_p0 = scmp.lt.s32.totalorder %s110_s19, %s110_s19 }
  0xd3   :  { %p8807_p13 = scmp.ne.s32.totalorder %s110_s19, %s8806_s4  ;;  %p8812_p1 = scmp.lt.s32.totalorder %s8806_s4, %s8806_s4 }
  0xd5   :  { %p8813_p2 = por %p8812_p1, %p8811_p0 }
  0xd7   :  { %p8814_p3 = pnand %p8813_p2, %p8807_p13 }
  0xd9   :  { %8817 = shalt.err (!%p8814_p3)
}
  0xda   :  { %115 = dma.hbm_to_vmem [thread:$0]  %s10539_s6, 1024, %s110_s19, [#allocation14], %s10572_s28, %s10572_s28, %s10571_s2  }
  0xdb   :  { %s8818_s25 = scalar_lea.hbm %s10541_s8, 512 }
  0xdc   :  { %p8819_p4 = scmp.ne.s32.totalorder %s10541_s8, %s8818_s25  ;;  %p8822_p5 = scmp.lt.u32.totalorder %s8818_s25, %s10541_s8 }
  0xde   :  { %p8824_p6 = pnand %p8822_p5, %p8819_p4 }
  0xe0   :  { %8827 = shalt.err (!%p8824_p6)
}
  0xe1   :  { %s8828_s27 = scalar_lea.vmem %s9264_s29, 512  ;;  %p8833_p8 = scmp.lt.s32.totalorder %s9264_s29, %s9264_s29 }
  0xe2   :  { %p8829_p7 = scmp.ne.s32.totalorder %s9264_s29, %s8828_s27  ;;  %p8834_p9 = scmp.lt.s32.totalorder %s8828_s27, %s8828_s27 }
  0xe4   :  { %p8835_p10 = por %p8834_p9, %p8833_p8 }
  0xe6   :  { %p8836_p11 = pnand %p8835_p10, %p8829_p7 }
  0xe8   :  { %8839 = shalt.err (!%p8836_p11)
}
  0xe9   :  { %137 = dma.hbm_to_vmem [thread:$0]  %s10541_s8, 512, %s9264_s29, [#allocation17], %s8974_s30, %s8974_s30, %s8975_s1  }
  0xea   :  { %s8988_s21 = smov [#allocation21]   ;;  %s8989_s9 = smov [#allocation24]  }
  0xeb   :  { %s155_s24 = sshll.u32 %s8988_s21, 4  ;;  %s180_s7 = sshll.u32 %s8989_s9, 4  ;;  %s156_s24 = int_to_ptr.vmem [resolvable:$true] %s155_s24  ;;  %s181_s7 = int_to_ptr.vmem [resolvable:$true] %s180_s7 }
  0xec   :  { %s8840_s5 = scalar_lea.hbm %s10543_s10, 256 }
  0xed   :  { %p8841_p12 = scmp.ne.s32.totalorder %s10543_s10, %s8840_s5  ;;  %p8844_p13 = scmp.lt.u32.totalorder %s8840_s5, %s10543_s10 }
  0xef   :  { %p8846_p0 = pnand %p8844_p13, %p8841_p12 }
  0xf1   :  { %8849 = shalt.err (!%p8846_p0)
}
  0xf2   :  { %s8850_s8 = scalar_lea.vmem %s156_s24, 256  ;;  %p8855_p2 = scmp.lt.s32.totalorder %s156_s24, %s156_s24 }
  0xf3   :  { %p8851_p1 = scmp.ne.s32.totalorder %s156_s24, %s8850_s8  ;;  %p8856_p3 = scmp.lt.s32.totalorder %s8850_s8, %s8850_s8 }
  0xf5   :  { %p8857_p4 = por %p8856_p3, %p8855_p2 }
  0xf7   :  { %p8858_p5 = pnand %p8857_p4, %p8851_p1 }
  0xf9   :  { %8861 = shalt.err (!%p8858_p5)
}
  0xfa   :  { %161 = dma.hbm_to_vmem [thread:$0]  %s10543_s10, 256, %s156_s24, [#allocation20], %s8974_s30, %s8974_s30, %s8975_s1  }
  0xfb   :  { %s8862_s27 = scalar_lea.hbm %s10545_s12, 32 }
  0xfc   :  { %p8863_p6 = scmp.ne.s32.totalorder %s10545_s12, %s8862_s27  ;;  %p8866_p7 = scmp.lt.u32.totalorder %s8862_s27, %s10545_s12 }
  0xfe   :  { %p8868_p8 = pnand %p8866_p7, %p8863_p6 }
 0x100   :  { %8871 = shalt.err (!%p8868_p8)
}
 0x101   :  { %s8872_s4 = scalar_lea.vmem %s181_s7, 32  ;;  %p8877_p10 = scmp.lt.s32.totalorder %s181_s7, %s181_s7 }
 0x102   :  { %p8873_p9 = scmp.ne.s32.totalorder %s181_s7, %s8872_s4  ;;  %p8878_p11 = scmp.lt.s32.totalorder %s8872_s4, %s8872_s4 }
 0x104   :  { %p8879_p12 = por %p8878_p11, %p8877_p10 }
 0x106   :  { %p8880_p13 = pnand %p8879_p12, %p8873_p9 }
 0x108   :  { %8883 = shalt.err (!%p8880_p13)
}
 0x109   :  { %183 = dma.hbm_to_vmem [thread:$0]  %s10545_s12, 32, %s181_s7, [#allocation23]  }
 0x10a   :  { %s8990_s1 = smov [#allocation27]   ;;  %s8991_s18 = smov [#allocation28]  }
 0x10b   :  { %s204_s24 = sshll.u32 %s8990_s1, 4  ;;  %s213_s5 = sshll.u32 %s8991_s18, 4  ;;  %s205_s24 = int_to_ptr.vmem [resolvable:$true] %s204_s24  ;;  %s9328_s5 = int_to_ptr.vmem [resolvable:$true] %s213_s5 }
 0x10c   :  { %s8884_s25 = scalar_lea.hbm %s10548_s15, 32 }
 0x10d   :  { %p8885_p0 = scmp.ne.s32.totalorder %s10548_s15, %s8884_s25  ;;  %p8888_p1 = scmp.lt.u32.totalorder %s8884_s25, %s10548_s15 }
 0x10f   :  { %p8890_p2 = pnand %p8888_p1, %p8885_p0 }
 0x111   :  { %8893 = shalt.err (!%p8890_p2)
}
 0x112   :  { %s8894_s12 = scalar_lea.vmem %s205_s24, 32  ;;  %p8899_p4 = scmp.lt.s32.totalorder %s205_s24, %s205_s24 }
 0x113   :  { %p8895_p3 = scmp.ne.s32.totalorder %s205_s24, %s8894_s12  ;;  %p8900_p5 = scmp.lt.s32.totalorder %s8894_s12, %s8894_s12 }
 0x115   :  { %p8901_p6 = por %p8900_p5, %p8899_p4 }
 0x117   :  { %p8902_p7 = pnand %p8901_p6, %p8895_p3 }
 0x119   :  { %8905 = shalt.err (!%p8902_p7)
}
 0x11a   :  { %207 = dma.hbm_to_vmem [thread:$0]  %s10548_s15, 32, %s205_s24, [#allocation26]  }
 0x11b   :  { %s8906_s6 = scalar_lea.hbm %s10549_s16, 2048 }
 0x11c   :  { %p8907_p8 = scmp.ne.s32.totalorder %s10549_s16, %s8906_s6  ;;  %p8910_p9 = scmp.lt.u32.totalorder %s8906_s6, %s10549_s16 }
 0x11e   :  { %p8912_p10 = pnand %p8910_p9, %p8907_p8 }
 0x120   :  { %8915 = shalt.err (!%p8912_p10)
}
 0x121   :  { %s8916_s10 = scalar_lea.vmem %s9328_s5, 2048  ;;  %p8921_p12 = scmp.lt.s32.totalorder %s9328_s5, %s9328_s5 }
 0x122   :  { %p8917_p11 = scmp.ne.s32.totalorder %s9328_s5, %s8916_s10  ;;  %p8922_p13 = scmp.lt.s32.totalorder %s8916_s10, %s8916_s10 }
 0x124   :  { %p8923_p0 = por %p8922_p13, %p8921_p12 }
 0x126   :  { %p8924_p1 = pnand %p8923_p0, %p8917_p11 }
 0x128   :  { %8927 = shalt.err (!%p8924_p1)
}
 0x129   :  { %219 = dma.hbm_to_vmem [thread:$0]  %s10549_s16, 2048, %s9328_s5, [#allocation29], %s10572_s28, %s10572_s28, %s10571_s2  }
 0x12a   :  { %8950 = dma.done.wait [#allocation5], 256  }
 0x12b   :  { %8951 = vsyncadd [#allocation5], 4294967040 }
 0x12c   :  { %8952 = dma.done.wait [#allocation8], 544  }
 0x12d   :  { %8953 = vsyncadd [#allocation8], 4294966752 }
 0x12e   :  { %8954 = dma.done.wait [#allocation11], 1024  }
 0x12f   :  { %8955 = vsyncadd [#allocation11], 4294966272 }
 0x130   :  { %8956 = dma.done.wait [#allocation14], 2048  }
 0x131   :  { %8957 = vsyncadd [#allocation14], 4294965248 }
 0x132   :  { %8958 = dma.done.wait [#allocation17], 544  }
 0x133   :  { %8959 = vsyncadd [#allocation17], 4294966752 }
 0x134   :  { %8960 = dma.done.wait [#allocation20], 768  }
 0x135   :  { %8961 = vsyncadd [#allocation20], 4294966528 }
 0x136   :  { %8962 = dma.done.wait [#allocation23], 1056  }
 0x137   :  { %8963 = vsyncadd [#allocation23], 4294966240 }
 0x138   :  { %8964 = dma.done.wait [#allocation26], 2080  }
 0x139   :  { %8965 = vsyncadd [#allocation26], 4294965216 }
 0x13a   :  { %8966 = dma.done.wait [#allocation29], 2048  }
 0x13b   :  { %8967 = vsyncadd [#allocation29], 4294965248  ;;  %v286_v0 = vlaneseq  ;;  %v8992_v1 = vmov 0.0|0.0   ;;  %v8993_v2 = vmov 0.0   ;;  %v8994_v3 = vmov 1983009808  }
 0x13c   :  { %7590 = vmatprep.subr.bf16.mxu1 %v8992_v1  ;;  %407 = vmatprep.mubr.f32.mxu0 %v8993_v2  ;;  %v307_v4 = vunpack.c.l.s4 %v8994_v3  ;;  %vm8995_vm0 = vmmov 0   ;;  %v281_v7 = vld [vmem:[#allocation7 + $0x8] sm:$0xff]  ;;  %v283_v8 = vld [vmem:[#allocation7 + $0x18] sm:$0xff]  ;;  %v280_v9 = vld [vmem:[#allocation7] sm:$0xff]  ;;  %vm338_vm1 = vcmask 130048   ;;  %s8996_s16 = smov 64  }
 0x13d   :  { %7147 = vmatprep.mubr.msk.f32.mxu1 %vm8995_vm0, %v8993_v2  ;;  %v287_v5 = vshrl.u32 %v286_v0, 7  ;;  %v7586_v10 = vpack.c.bf16 %v283_v8, %v281_v7  ;;  %v282_v11 = vld [vmem:[#allocation7 + $0x10] sm:$0xff]  ;;  %v468_v12 = vld [vmem:[#allocation10] sm:$0xff]  ;;  %v471_v23 = vld [vmem:[#allocation10 + $0x18] sm:$0xff]  ;;  %vm586_vm2 = vcmask 254976   ;;  %vm476_vm3 = vcmask 261120  }
 0x13e   :  { %v308_v6 = vunpack.c.0.s8 %v307_v4  ;;  %v469_v13 = vld [vmem:[#allocation10 + $0x8] sm:$0xff]  ;;  %v7588_v15 = vpack.c.bf16 %v282_v11, %v280_v9  ;;  %v273_v18 = vld [vmem:[#allocation4 + $0x2] sm:$0x3]  ;;  %v274_v19 = vld [vmem:[#allocation4 + $0x4] sm:$0x3]  ;;  %vm4541_vm5 = vcmask 123904  }
 0x13f   :  { %v9369_v16 = vpack.c.bf16 %v469_v13, %v468_v12  ;;  %v272_v17 = vld [vmem:[#allocation4] sm:$0x3]  ;;  %7587 = vmatprep.subr.bf16.mxu0 %v7586_v10  ;;  %v275_v20 = vld [vmem:[#allocation4 + $0x6] sm:$0x3]  ;;  %v9393_v29 = vsub.s32 0, %v287_v5  ;;  %v9395_v31 = vsub.s32 1, %v287_v5 }
 0x140   :  { %v9367_v14 = vsub.s32 %v308_v6, %v287_v5  ;;  %v304_v21 = vcombine.low %v272_v17, %v273_v18  ;;  %v470_v22 = vld [vmem:[#allocation10 + $0x10] sm:$0xff]  ;;  %7589 = vmatpush1.bf16.msra.mxu0 %v7588_v15  ;;  %v305_v24 = vcombine.low %v274_v19, %v275_v20  ;;  %v284_v30 = vld [vmem:[#allocation9] sm:$0x3]  ;;  %v277_v55 = vld [vmem:[#allocation4 + $0xa] sm:$0x3]  ;;  %s8997_s0 = smov 96  }
 0x141   :  { %7592 = vmatpush3.bf16.msra.mxu1 %v9369_v16  ;;  %v9372_v25 = vpack.c.bf16 %v471_v23, %v470_v22  ;;  %7596 = vmatprep.subr.bf16.mxu0 %v8992_v1  ;;  %v289_v32 = vrot.slane %v284_v30, %v9393_v29  ;;  %v293_v33 = vrot.slane %v284_v30, %v9395_v31  ;;  %v276_v54 = vld [vmem:[#allocation4 + $0x8] sm:$0x3]  ;;  %v278_v56 = vld [vmem:[#allocation4 + $0xc] sm:$0x3]  ;;  %v279_v57 = vld [vmem:[#allocation4 + $0xe] sm:$0x3] }
 0x142   :  { %v312_v26 = vrot.slane %v304_v21, %v9367_v14  ;;  %7593 = vmatprep.subr.bf16.mxu1 %v8992_v1  ;;  %v319_v27 = vrot.slane %v305_v24, %v9367_v14  ;;  %v321_v58 = vcombine.low %v276_v54, %v277_v55  ;;  %v322_v59 = vcombine.low %v278_v56, %v279_v57  ;;  %s10575_s10 = sld [smem:[#allocation45_spill]] }
 0x143   :  { %vm4543_vm6 = vcmask 523264  }
 0x144   :  { %v320_v28 = vcombine.low %v312_v26, %v319_v27  ;;  %v329_v60 = vrot.slane %v321_v58, %v9367_v14  ;;  %v336_v61 = vrot.slane %v322_v59, %v9367_v14 }
 0x145   :  { %7595 = vmatpush3.bf16.msra.mxu1 %v9372_v25 }
 0x146   :  { %7602 = vmatprep.subr.bf16.mxu1 %v8992_v1  ;;  %6815 = vmatmul.mubr.msk.f32.vlgmr.msra.gmra.mrb[0].mxu0 %vm338_vm1, %v320_v28  ;;  %v337_v62 = vcombine.low %v329_v60, %v336_v61 }
 0x147   :  { %7598 = vmatpush3.bf16.msra.mxu0 %v9369_v16  ;;  %413 = vmatprep.mubr.f32.mxu0 %v8993_v2 }
 0x148   :  { %7148 = vmatmul.mubr.f32.vlgmr.msra.gmra.mrb[0].mxu1 %v8993_v2  ;;  %7599 = vmatprep.subr.bf16.mxu0 %v8992_v1 }
 0x149   :  { %7604 = vmatpush3.bf16.msra.mxu1 %v9369_v16  ;;  %7169 = vmatprep.mubr.msk.f32.mxu1 %vm8995_vm0, %v8993_v2 }
 0x14a   :  { %7605 = vmatprep.subr.bf16.mxu1 %v8992_v1  ;;  %6816 = vmatmul.mubr.msk.f32.gmra.mrb[2].mxu0 %vm338_vm1, %v337_v62 }
 0x14b   :  { %7601 = vmatpush3.bf16.msra.mxu0 %v9372_v25  ;;  %7158 = vmatprep.mubr.msk.f32.mxu0 %vm8995_vm0, %v8993_v2 }
 0x14c   :  { %7608 = vmatprep.subr.bf16.mxu0 %v8992_v1 }
 0x14d   :  { %7607 = vmatpush3.bf16.msra.mxu1 %v9372_v25 }
 0x14e   :  { %7614 = vmatprep.subr.bf16.mxu1 %v8992_v1 }
 0x219   :  { %v409_v34 = vpop.f32.mrb[0].mxu0 }
 0x21a   :  { %v9399_v35 = vadd.f32 %v409_v34, %v289_v32  ;;  %v411_v36 = vpop.f32.mrb[1].mxu0 }
 0x21b   :  { %v546_v37 = vpop.f32.mrb[0].mxu1  ;;  %v9401_v38 = vadd.f32 %v411_v36, %v293_v33 }
 0x21c   :  { %v7149_v39 = vpop.f32.mrb[1].mxu1 }
 0x21d   :  { %v424_v40 = vcombine.low %v9399_v35, %v9401_v38  ;;  %v425_v41 = vcombine.high %v9399_v35, %v9401_v38  ;;  %v415_v6 = vpop.f32.mrb[2].mxu0 }
 0x21e   :  { %v9421_v7 = vadd.f32 %v415_v6, %v289_v32  ;;  %v417_v8 = vpop.f32.mrb[3].mxu0 }
 0x21f   :  { %v9408_v42 = vrot.slane %v424_v40, %v9367_v14  ;;  %v9423_v9 = vadd.f32 %v417_v8, %v293_v33  ;;  %v9459_v39 = vrot.slane %v425_v41, %v9367_v14 }
 0x221   :  { %v550_v43 = vadd.f32 %v546_v37, %v9408_v42  ;;  %v442_v10 = vcombine.low %v9421_v7, %v9423_v9  ;;  %v443_v11 = vcombine.high %v9421_v7, %v9423_v9  ;;  %v9439_v13 = vcombine.high %v9408_v42, %v9408_v42 }
 0x222   :  { %v9477_v57 = vcombine.high %v9459_v39, %v9459_v39 }
 0x223   :  { %8179 = vtanh.f32 %v550_v43  ;;  %v6817_v45 = vmul.f32 -1.442695, %v550_v43 }
 0x225   :  { %8181 = vpow2.f32 %v6817_v45 }
 0x22d   :  { %v8180_v44 = vpop.eup %8179 }
 0x22e   :  { %560 = vrot.lane.b32.xlu0 %v8180_v44, %s8996_s16 }
 0x22f   :  { %v8182_v46 = vpop.eup %8181 }
 0x230   :  { %v554_v47 = vadd.f32 1.0, %v8182_v46 }
 0x232   :  { %8183 = vrcp.f32 %v554_v47 }
 0x23c   :  { %v8184_v48 = vpop.eup %8183 }
 0x23d   :  { %v558_v51 = vmul.f32 0.0, %v8184_v48 }
 0x2a0   :  { %v561_v49 = vpop.permute.xlu0 %560 }
 0x2a1   :  { %v563_v50 = vmul.f32 %v8184_v48, %v561_v49 }
 0x2a3   :  { %565 = vrot.lane.b32.xlu0 %v563_v50, %s8982_s14 }
 0x315   :  { %v566_v52 = vpop.permute.xlu0 %565 }
 0x316   :  { %v568_v53 = vadd.f32 %v566_v52, %v558_v51 }
 0x318   :  { %8185 = vtanh.f32 %v568_v53 }
 0x322   :  { %v8186_v63 = vpop.eup %8185 }
 0x323   :  { %571 = vrot.lane.b32.xlu1 %v8186_v63, %s8996_s16 }
 0x395   :  { %v572_v3 = vpop.permute.xlu1 %571 }
 0x396   :  { %v574_v4 = vmul.f32 %v8184_v48, %v572_v3 }
 0x398   :  { %v582_v5 = vrot.slane %v574_v4, %v9367_v14 }
 0x39a   :  { %583 = vrot.lane.b32.xlu1 %v582_v5, %s8982_s14 }
 0x40c   :  { %v584_v12 = vpop.permute.xlu1 %583 }
 0x40d   :  { %587 = vst.msk [vmem:[#allocation2] sm:$0x3] %vm586_vm2, %v584_v12  ;;  %7159 = vmatmul.mubr.msk.f32.vlgmr.msra.gmra.mrb[4].mxu0 %vm476_vm3, %v584_v12 }
 0x40e   :  { %7610 = vmatpush3.bf16.msra.mxu0 %v9369_v16  ;;  %7180 = vmatprep.mubr.msk.f32.mxu0 %vm8995_vm0, %v8993_v2 }
 0x40f   :  { %7611 = vmatprep.subr.bf16.mxu0 %v8992_v1 }
 0x412   :  { %7613 = vmatpush3.bf16.msra.mxu0 %v9372_v25 }
 0x413   :  { %7620 = vmatprep.subr.bf16.mxu0 %v8992_v1 }
 0x4e0   :  { %v656_v15 = vpop.f32.mrb[4].mxu0 }
 0x4e1   :  { %v660_v17 = vadd.f32 %v656_v15, %v9439_v13  ;;  %v7160_v18 = vpop.f32.mrb[5].mxu0 }
 0x4e3   :  { %8187 = vtanh.f32 %v660_v17  ;;  %v6819_v20 = vmul.f32 -1.442695, %v660_v17 }
 0x4e5   :  { %8189 = vpow2.f32 %v6819_v20 }
 0x4ed   :  { %v8188_v19 = vpop.eup %8187 }
 0x4ee   :  { %670 = vrot.lane.b32.xlu0 %v8188_v19, %s8996_s16 }
 0x4ef   :  { %v8190_v21 = vpop.eup %8189 }
 0x4f0   :  { %v664_v22 = vadd.f32 1.0, %v8190_v21 }
 0x4f2   :  { %8191 = vrcp.f32 %v664_v22  ;;  %v9497_v22 = vrot.slane %v442_v10, %v9367_v14 }
 0x4fc   :  { %v8192_v23 = vpop.eup %8191 }
 0x4fd   :  { %v668_v27 = vmul.f32 %v8192_v23, %v568_v53 }
 0x560   :  { %v671_v24 = vpop.permute.xlu0 %670 }
 0x561   :  { %v673_v26 = vmul.f32 %v8192_v23, %v671_v24 }
 0x563   :  { %675 = vrot.lane.b32.xlu1 %v673_v26, %s8982_s14 }
 0x5d5   :  { %v676_v28 = vpop.permute.xlu1 %675 }
 0x5d6   :  { %v678_v30 = vadd.f32 %v676_v28, %v668_v27 }
 0x5d8   :  { %8193 = vtanh.f32 %v678_v30 }
 0x5e2   :  { %v8194_v32 = vpop.eup %8193 }
 0x5e3   :  { %681 = vrot.lane.b32.xlu0 %v8194_v32, %s8996_s16 }
 0x655   :  { %v682_v33 = vpop.permute.xlu0 %681 }
 0x656   :  { %v684_v34 = vmul.f32 %v8192_v23, %v682_v33 }
 0x658   :  { %v692_v36 = vrot.slane %v684_v34, %v9367_v14 }
 0x65a   :  { %693 = vrot.lane.b32.xlu1 %v692_v36, %s8982_s14 }
 0x6cc   :  { %v694_v37 = vpop.permute.xlu1 %693 }
 0x6cd   :  { %697 = vst.msk [vmem:[#allocation2 + $0x2] sm:$0x3] %vm586_vm2, %v694_v37  ;;  %7170 = vmatmul.mubr.msk.f32.vlgmr.msra.gmra.mrb[2].mxu1 %vm476_vm3, %v694_v37 }
 0x6ce   :  { %7616 = vmatpush3.bf16.msra.mxu1 %v9369_v16  ;;  %7191 = vmatprep.mubr.msk.f32.mxu1 %vm8995_vm0, %v8993_v2 }
 0x6cf   :  { %7617 = vmatprep.subr.bf16.mxu1 %v8992_v1 }
 0x6d2   :  { %7619 = vmatpush3.bf16.msra.mxu1 %v9372_v25 }
 0x6d3   :  { %7626 = vmatprep.subr.bf16.mxu1 %v8992_v1 }
 0x7a0   :  { %v766_v40 = vpop.f32.mrb[2].mxu1 }
 0x7a1   :  { %v770_v43 = vadd.f32 %v766_v40, %v9459_v39  ;;  %v7171_v44 = vpop.f32.mrb[3].mxu1 }
 0x7a3   :  { %8195 = vtanh.f32 %v770_v43  ;;  %v6821_v46 = vmul.f32 -1.442695, %v770_v43 }
 0x7a5   :  { %8197 = vpow2.f32 %v6821_v46 }
 0x7ad   :  { %v8196_v45 = vpop.eup %8195 }
 0x7ae   :  { %780 = vrot.lane.b32.xlu0 %v8196_v45, %s8996_s16 }
 0x7af   :  { %v8198_v47 = vpop.eup %8197 }
 0x7b0   :  { %v774_v48 = vadd.f32 1.0, %v8198_v47 }
 0x7b2   :  { %8199 = vrcp.f32 %v774_v48  ;;  %v9515_v48 = vcombine.high %v9497_v22, %v9497_v22 }
 0x7bc   :  { %v8200_v49 = vpop.eup %8199 }
 0x7bd   :  { %v778_v35 = vmul.f32 %v8200_v49, %v678_v30 }
 0x820   :  { %v781_v50 = vpop.permute.xlu0 %780 }
 0x821   :  { %v783_v51 = vmul.f32 %v8200_v49, %v781_v50 }
 0x823   :  { %785 = vrot.lane.b32.xlu1 %v783_v51, %s8982_s14 }
 0x895   :  { %v786_v38 = vpop.permute.xlu1 %785 }
 0x896   :  { %v788_v41 = vadd.f32 %v786_v38, %v778_v35 }
 0x898   :  { %8201 = vtanh.f32 %v788_v41 }
 0x8a2   :  { %v8202_v52 = vpop.eup %8201 }
 0x8a3   :  { %791 = vrot.lane.b32.xlu0 %v8202_v52, %s8996_s16 }
 0x915   :  { %v792_v53 = vpop.permute.xlu0 %791 }
 0x916   :  { %v794_v54 = vmul.f32 %v8200_v49, %v792_v53 }
 0x918   :  { %v802_v55 = vrot.slane %v794_v54, %v9367_v14 }
 0x91a   :  { %803 = vrot.lane.b32.xlu1 %v802_v55, %s8982_s14 }
 0x98c   :  { %v804_v56 = vpop.permute.xlu1 %803 }
 0x98d   :  { %807 = vst.msk [vmem:[#allocation2 + $0x4] sm:$0x3] %vm586_vm2, %v804_v56  ;;  %7181 = vmatmul.mubr.msk.f32.vlgmr.msra.gmra.mrb[6].mxu0 %vm476_vm3, %v804_v56 }
 0x98e   :  { %7622 = vmatpush3.bf16.msra.mxu0 %v9369_v16  ;;  %7202 = vmatprep.mubr.msk.f32.mxu0 %vm8995_vm0, %v8993_v2 }
 0x98f   :  { %7623 = vmatprep.subr.bf16.mxu0 %v8992_v1 }
 0x992   :  { %7625 = vmatpush3.bf16.msra.mxu0 %v9372_v25 }
 0x993   :  { %7632 = vmatprep.subr.bf16.mxu0 %v8992_v1 }
 0xa60   :  { %v876_v58 = vpop.f32.mrb[6].mxu0 }
 0xa61   :  { %v880_v59 = vadd.f32 %v876_v58, %v9477_v57  ;;  %v7182_v60 = vpop.f32.mrb[7].mxu0 }
 0xa63   :  { %8203 = vtanh.f32 %v880_v59  ;;  %v6823_v62 = vmul.f32 -1.442695, %v880_v59 }
 0xa65   :  { %8205 = vpow2.f32 %v6823_v62  ;;  %v472_v62 = vld [vmem:[#allocation12] sm:$0xff] }
 0xa6d   :  { %v8204_v61 = vpop.eup %8203 }
 0xa6e   :  { %890 = vrot.lane.b32.xlu0 %v8204_v61, %s8996_s16 }
 0xa6f   :  { %v8206_v63 = vpop.eup %8205 }
 0xa70   :  { %v884_v3 = vadd.f32 1.0, %v8206_v63  ;;  %v473_v63 = vld [vmem:[#allocation12 + $0x8] sm:$0xff] }
 0xa72   :  { %8207 = vrcp.f32 %v884_v3  ;;  %v9523_v3 = vpack.c.bf16 %v473_v63, %v472_v62 }
 0xa7c   :  { %v8208_v4 = vpop.eup %8207 }
 0xa7d   :  { %v888_v8 = vmul.f32 %v8208_v4, %v788_v41 }
 0xae0   :  { %v891_v5 = vpop.permute.xlu0 %890 }
 0xae1   :  { %v893_v6 = vmul.f32 %v8208_v4, %v891_v5  ;;  %v475_v5 = vld [vmem:[#allocation12 + $0x18] sm:$0xff] }
 0xae3   :  { %895 = vrot.lane.b32.xlu1 %v893_v6, %s8982_s14 }
 0xb55   :  { %v896_v12 = vpop.permute.xlu1 %895 }
 0xb56   :  { %v898_v15 = vadd.f32 %v896_v12, %v888_v8  ;;  %v9546_v12 = vrot.slane %v443_v11, %v9367_v14 }
 0xb58   :  { %8209 = vtanh.f32 %v898_v15 }
 0xb62   :  { %v8210_v17 = vpop.eup %8209 }
 0xb63   :  { %901 = vrot.lane.b32.xlu0 %v8210_v17, %s8996_s16 }
 0xbd5   :  { %v902_v18 = vpop.permute.xlu0 %901 }
 0xbd6   :  { %v904_v19 = vmul.f32 %v8208_v4, %v902_v18  ;;  %v474_v4 = vld [vmem:[#allocation12 + $0x10] sm:$0xff] }
 0xbd7   :  { %v9528_v8 = vpack.c.bf16 %v475_v5, %v474_v4 }
 0xbd8   :  { %v912_v20 = vrot.slane %v904_v19, %v9367_v14  ;;  %v9551_v19 = vcombine.high %v9546_v12, %v9546_v12 }
 0xbda   :  { %913 = vrot.lane.b32.xlu1 %v912_v20, %s8982_s14  ;;  %v1428_v20 = vrot.slane %v9551_v19, 2 }
 0xc4c   :  { %v914_v21 = vpop.permute.xlu1 %913 }
 0xc4d   :  { %917 = vst.msk [vmem:[#allocation2 + $0x6] sm:$0x3] %vm586_vm2, %v914_v21  ;;  %7192 = vmatmul.mubr.msk.f32.vlgmr.msra.gmra.mrb[4].mxu1 %vm476_vm3, %v914_v21 }
 0xc4e   :  { %7628 = vmatpush3.bf16.msra.mxu1 %v9369_v16  ;;  %7213 = vmatprep.mubr.msk.f32.mxu1 %vm8995_vm0, %v8993_v2 }
 0xc4f   :  { %7629 = vmatprep.subr.bf16.mxu1 %v8992_v1 }
 0xc52   :  { %7631 = vmatpush3.bf16.msra.mxu1 %v9372_v25 }
 0xc53   :  { %7638 = vmatprep.subr.bf16.mxu1 %v8992_v1 }
 0xd20   :  { %v986_v23 = vpop.f32.mrb[4].mxu1 }
 0xd21   :  { %v990_v24 = vadd.f32 %v986_v23, %v9497_v22  ;;  %v7193_v26 = vpop.f32.mrb[5].mxu1 }
 0xd23   :  { %8211 = vtanh.f32 %v990_v24  ;;  %v6825_v28 = vmul.f32 -1.442695, %v990_v24 }
 0xd25   :  { %8213 = vpow2.f32 %v6825_v28 }
 0xd2d   :  { %v8212_v27 = vpop.eup %8211 }
 0xd2e   :  { %1000 = vrot.lane.b32.xlu0 %v8212_v27, %s8996_s16 }
 0xd2f   :  { %v8214_v30 = vpop.eup %8213 }
 0xd30   :  { %v994_v32 = vadd.f32 1.0, %v8214_v30 }
 0xd32   :  { %8215 = vrcp.f32 %v994_v32 }
 0xd3c   :  { %v8216_v33 = vpop.eup %8215 }
 0xd3d   :  { %v998_v10 = vmul.f32 %v8216_v33, %v898_v15 }
 0xda0   :  { %v1001_v34 = vpop.permute.xlu0 %1000 }
 0xda1   :  { %v1003_v36 = vmul.f32 %v8216_v33, %v1001_v34 }
 0xda3   :  { %1005 = vrot.lane.b32.xlu1 %v1003_v36, %s8982_s14 }
 0xe15   :  { %v1006_v37 = vpop.permute.xlu1 %1005 }
 0xe16   :  { %v1008_v40 = vadd.f32 %v1006_v37, %v998_v10 }
 0xe18   :  { %8217 = vtanh.f32 %v1008_v40 }
 0xe22   :  { %v8218_v43 = vpop.eup %8217 }
 0xe23   :  { %1011 = vrot.lane.b32.xlu0 %v8218_v43, %s8996_s16 }
 0xe95   :  { %v1012_v44 = vpop.permute.xlu0 %1011 }
 0xe96   :  { %v1014_v45 = vmul.f32 %v8216_v33, %v1012_v44 }
 0xe98   :  { %v1022_v46 = vrot.slane %v1014_v45, %v9367_v14 }
 0xe9a   :  { %1023 = vrot.lane.b32.xlu1 %v1022_v46, %s8982_s14 }
 0xf0c   :  { %v1024_v47 = vpop.permute.xlu1 %1023 }
 0xf0d   :  { %1027 = vst.msk [vmem:[#allocation2 + $0x8] sm:$0x3] %vm586_vm2, %v1024_v47  ;;  %7203 = vmatmul.mubr.msk.f32.vlgmr.msra.gmra.mrb[8].mxu0 %vm476_vm3, %v1024_v47 }
 0xf0e   :  { %7634 = vmatpush3.bf16.msra.mxu0 %v9369_v16  ;;  %7224 = vmatprep.mubr.msk.f32.mxu0 %vm8995_vm0, %v8993_v2 }
 0xf0f   :  { %7635 = vmatprep.subr.bf16.mxu0 %v8992_v1 }
 0xf12   :  { %7637 = vmatpush3.bf16.msra.mxu0 %v9372_v25 }
 0xf13   :  { %7644 = vmatprep.subr.bf16.mxu0 %v8992_v1 }
 0xfe0   :  { %v1096_v49 = vpop.f32.mrb[8].mxu0 }
 0xfe1   :  { %v1100_v50 = vadd.f32 %v1096_v49, %v9515_v48  ;;  %v7204_v51 = vpop.f32.mrb[9].mxu0 }
 0xfe3   :  { %8219 = vtanh.f32 %v1100_v50  ;;  %v6827_v16 = vmul.f32 -1.442695, %v1100_v50 }
 0xfe5   :  { %8221 = vpow2.f32 %v6827_v16 }
 0xfed   :  { %v8220_v35 = vpop.eup %8219 }
 0xfee   :  { %1110 = vrot.lane.b32.xlu0 %v8220_v35, %s8996_s16 }
 0xfef   :  { %v8222_v38 = vpop.eup %8221 }
 0xff0   :  { %v1104_v41 = vadd.f32 1.0, %v8222_v38 }
 0xff2   :  { %8223 = vrcp.f32 %v1104_v41 }
 0xffc   :  { %v8224_v25 = vpop.eup %8223 }
 0xffd   :  { %v1108_v54 = vmul.f32 %v8224_v25, %v1008_v40 }
0x1060   :  { %v1111_v52 = vpop.permute.xlu0 %1110 }
0x1061   :  { %v1113_v53 = vmul.f32 %v8224_v25, %v1111_v52 }
0x1063   :  { %1115 = vrot.lane.b32.xlu1 %v1113_v53, %s8982_s14 }
0x10d5   :  { %v1116_v55 = vpop.permute.xlu1 %1115 }
0x10d6   :  { %v1118_v56 = vadd.f32 %v1116_v55, %v1108_v54 }
0x10d8   :  { %8225 = vtanh.f32 %v1118_v56 }
0x10e2   :  { %v8226_v58 = vpop.eup %8225 }
0x10e3   :  { %1121 = vrot.lane.b32.xlu0 %v8226_v58, %s8996_s16  ;;  %v1540_v58 = vrot.slane %v9546_v12, 2 }
0x1155   :  { %v1122_v59 = vpop.permute.xlu0 %1121 }
0x1156   :  { %v1124_v60 = vmul.f32 %v8224_v25, %v1122_v59 }
0x1158   :  { %v1132_v61 = vrot.slane %v1124_v60, %v9367_v14 }
0x115a   :  { %1133 = vrot.lane.b32.xlu1 %v1132_v61, %s8982_s14 }
0x11cc   :  { %v1134_v6 = vpop.permute.xlu1 %1133 }
0x11cd   :  { %1137 = vst.msk [vmem:[#allocation2 + $0xa] sm:$0x3] %vm586_vm2, %v1134_v6  ;;  %7214 = vmatmul.mubr.msk.f32.vlgmr.msra.gmra.mrb[6].mxu1 %vm476_vm3, %v1134_v6 }
0x11ce   :  { %7640 = vmatpush3.bf16.msra.mxu1 %v9523_v3  ;;  %7235 = vmatprep.mubr.msk.f32.mxu1 %vm8995_vm0, %v8993_v2 }
0x11cf   :  { %7641 = vmatprep.subr.bf16.mxu1 %v8992_v1 }
0x11d2   :  { %7643 = vmatpush3.bf16.msra.mxu1 %v9528_v8 }
0x11d3   :  { %7650 = vmatprep.subr.bf16.mxu1 %v8992_v1 }
0x11d5   :  { %7236 = vmatmul.mubr.f32.vlgmr.msra.gmra.mrb[8].mxu1 %v8993_v2 }
0x11d6   :  { %7652 = vmatpush3.bf16.msra.mxu1 %v9523_v3  ;;  %7257 = vmatprep.mubr.msk.f32.mxu1 %vm8995_vm0, %v8993_v2 }
0x11d7   :  { %7653 = vmatprep.subr.bf16.mxu1 %v8992_v1 }
0x11da   :  { %7655 = vmatpush3.bf16.msra.mxu1 %v9528_v8 }
0x11db   :  { %7662 = vmatprep.subr.bf16.mxu1 %v8992_v1 }
0x12a0   :  { %v1206_v15 = vpop.f32.mrb[6].mxu1 }
0x12a1   :  { %v1210_v17 = vadd.f32 %v1206_v15, %v9546_v12  ;;  %v7215_v18 = vpop.f32.mrb[7].mxu1 }
0x12a3   :  { %8227 = vtanh.f32 %v1210_v17  ;;  %v6829_v9 = vmul.f32 -1.442695, %v1210_v17 }
0x12a8   :  { %v1424_v21 = vpop.f32.mrb[8].mxu1 }
0x12a9   :  { %v1430_v23 = vadd.f32 %v1428_v20, %v1424_v21  ;;  %v7237_v24 = vpop.f32.mrb[9].mxu1 }
0x12ab   :  { %8229 = vtanh.f32 %v1430_v23  ;;  %v6832_v11 = vmul.f32 -1.442695, %v1430_v23 }
0x12ac   :  { %8231 = vpow2.f32 %v6829_v9  ;;  %v1652_v9 = vrot.slane %v9515_v48, 2 }
0x12ad   :  { %v8228_v26 = vpop.eup %8227  ;;  %8233 = vpow2.f32 %v6832_v11 }
0x12ae   :  { %1220 = vrot.lane.b32.xlu0 %v8228_v26, %s8996_s16 }
0x12b5   :  { %v8230_v7 = vpop.eup %8229 }
0x12b6   :  { %1440 = vrot.lane.b32.xlu1 %v8230_v7, %s8996_s16  ;;  %v8232_v27 = vpop.eup %8231 }
0x12b7   :  { %v1214_v28 = vadd.f32 1.0, %v8232_v27  ;;  %v8234_v30 = vpop.eup %8233 }
0x12b8   :  { %v1434_v32 = vadd.f32 1.0, %v8234_v30 }
0x12b9   :  { %8235 = vrcp.f32 %v1214_v28 }
0x12ba   :  { %8237 = vrcp.f32 %v1434_v32 }
0x12c3   :  { %v8236_v33 = vpop.eup %8235 }
0x12c4   :  { %v8238_v10 = vpop.eup %8237  ;;  %v1218_v43 = vmul.f32 %v8236_v33, %v1118_v56 }
0x12c5   :  { %v1438_v46 = vmul.f32 0.0, %v8238_v10 }
0x1320   :  { %v1221_v34 = vpop.permute.xlu0 %1220 }
0x1321   :  { %v1223_v36 = vmul.f32 %v8236_v33, %v1221_v34 }
0x1323   :  { %1225 = vrot.lane.b32.xlu0 %v1223_v36, %s8982_s14 }
0x1328   :  { %v1441_v37 = vpop.permute.xlu1 %1440 }
0x1329   :  { %v1443_v40 = vmul.f32 %v8238_v10, %v1441_v37 }
0x132b   :  { %1445 = vrot.lane.b32.xlu1 %v1443_v40, %s8982_s14 }
0x1395   :  { %v1226_v44 = vpop.permute.xlu0 %1225 }
0x1396   :  { %v9558_v45 = vadd.f32 %v1226_v44, %v1218_v43 }
0x1398   :  { %8239 = vtanh.f32 %v9558_v45 }
0x139d   :  { %v1446_v47 = vpop.permute.xlu1 %1445 }
0x139e   :  { %v1448_v49 = vadd.f32 %v1446_v47, %v1438_v46 }
0x13a0   :  { %8241 = vtanh.f32 %v1448_v49 }
0x13a2   :  { %v8240_v50 = vpop.eup %8239 }
0x13a3   :  { %1231 = vrot.lane.b32.xlu0 %v8240_v50, %s8996_s16 }
0x13aa   :  { %v8242_v51 = vpop.eup %8241 }
0x13ab   :  { %1451 = vrot.lane.b32.xlu1 %v8242_v51, %s8996_s16  ;;  %v1764_v51 = vrot.slane %v9497_v22, 2 }
0x1415   :  { %v1232_v35 = vpop.permute.xlu0 %1231 }
0x1416   :  { %v1234_v16 = vmul.f32 %v8236_v33, %v1232_v35 }
0x1418   :  { %v1242_v38 = vrot.slane %v1234_v16, %v9367_v14 }
0x141a   :  { %1243 = vrot.lane.b32.xlu0 %v1242_v38, %s8982_s14 }
0x141d   :  { %v1452_v41 = vpop.permute.xlu1 %1451 }
0x141e   :  { %v1454_v25 = vmul.f32 %v8238_v10, %v1452_v41 }
0x1420   :  { %v1462_v52 = vrot.slane %v1454_v25, %v9367_v14 }
0x1422   :  { %1463 = vrot.lane.b32.xlu1 %v1462_v52, %s8982_s14 }
0x148c   :  { %v1244_v53 = vpop.permute.xlu0 %1243 }
0x148d   :  { %1247 = vst.msk [vmem:[#allocation2 + $0xc] sm:$0x3] %vm586_vm2, %v1244_v53  ;;  %7225 = vmatmul.mubr.msk.f32.vlgmr.msra.gmra.mrb[10].mxu0 %vm476_vm3, %v1244_v53 }
0x148e   :  { %7646 = vmatpush3.bf16.msra.mxu0 %v9523_v3  ;;  %7246 = vmatprep.mubr.msk.f32.mxu0 %vm8995_vm0, %v8993_v2 }
0x148f   :  { %7647 = vmatprep.subr.bf16.mxu0 %v8992_v1 }
0x1492   :  { %7649 = vmatpush3.bf16.msra.mxu0 %v9528_v8 }
0x1493   :  { %7656 = vmatprep.subr.bf16.mxu0 %v8992_v1 }
0x1494   :  { %v1464_v54 = vpop.permute.xlu1 %1463 }
0x1495   :  { %1467 = vst.msk [vmem:[#allocation3 + $0xe] sm:$0x3] %vm586_vm2, %v1464_v54  ;;  %7247 = vmatmul.mubr.msk.f32.vlgmr.msra.gmra.mrb[12].mxu0 %vm476_vm3, %v1464_v54 }
0x1496   :  { %7658 = vmatpush3.bf16.msra.mxu0 %v9523_v3  ;;  %7268 = vmatprep.mubr.msk.f32.mxu0 %vm8995_vm0, %v8993_v2 }
0x1497   :  { %7659 = vmatprep.subr.bf16.mxu0 %v8992_v1 }
0x149a   :  { %7661 = vmatpush3.bf16.msra.mxu0 %v9528_v8 }
0x149b   :  { %7668 = vmatprep.subr.bf16.mxu0 %v8992_v1 }
0x1560   :  { %v9583_v55 = vpop.f32.mrb[10].mxu0 }
0x1561   :  { %v7226_v56 = vpop.f32.mrb[11].mxu0 }
0x1568   :  { %v1536_v59 = vpop.f32.mrb[12].mxu0 }
0x1569   :  { %v1542_v60 = vadd.f32 %v1540_v58, %v1536_v59  ;;  %v7248_v61 = vpop.f32.mrb[13].mxu0 }
0x156b   :  { %8243 = vtanh.f32 %v1542_v60  ;;  %v6834_v63 = vmul.f32 -1.442695, %v1542_v60 }
0x156d   :  { %8245 = vpow2.f32 %v6834_v63 }
0x1575   :  { %v8244_v62 = vpop.eup %8243 }
0x1576   :  { %1552 = vrot.lane.b32.xlu0 %v8244_v62, %s8996_s16 }
0x1577   :  { %v8246_v4 = vpop.eup %8245 }
0x1578   :  { %v1546_v5 = vadd.f32 1.0, %v8246_v4 }
0x157a   :  { %8247 = vrcp.f32 %v1546_v5 }
0x1584   :  { %v8248_v6 = vpop.eup %8247 }
0x1585   :  { %v1550_v18 = vmul.f32 %v8248_v6, %v1448_v49 }
0x15e8   :  { %v1553_v15 = vpop.permute.xlu0 %1552 }
0x15e9   :  { %v1555_v17 = vmul.f32 %v8248_v6, %v1553_v15 }
0x15eb   :  { %1557 = vrot.lane.b32.xlu1 %v1555_v17, %s8982_s14 }
0x165d   :  { %v1558_v20 = vpop.permute.xlu1 %1557 }
0x165e   :  { %v1560_v12 = vadd.f32 %v1558_v20, %v1550_v18 }
0x1660   :  { %8249 = vtanh.f32 %v1560_v12 }
0x166a   :  { %v8250_v21 = vpop.eup %8249 }
0x166b   :  { %1563 = vrot.lane.b32.xlu0 %v8250_v21, %s8996_s16 }
0x16dd   :  { %v1564_v23 = vpop.permute.xlu0 %1563 }
0x16de   :  { %v1566_v24 = vmul.f32 %v8248_v6, %v1564_v23  ;;  %v1876_v6 = vrot.slane %v9477_v57, 2 }
0x16e0   :  { %v1574_v26 = vrot.slane %v1566_v24, %v9367_v14 }
0x16e2   :  { %1575 = vrot.lane.b32.xlu1 %v1574_v26, %s8982_s14 }
0x1754   :  { %v1576_v7 = vpop.permute.xlu1 %1575 }
0x1755   :  { %1579 = vst.msk [vmem:[#allocation3 + $0xc] sm:$0x3] %vm586_vm2, %v1576_v7  ;;  %7258 = vmatmul.mubr.msk.f32.vlgmr.msra.gmra.mrb[10].mxu1 %vm476_vm3, %v1576_v7 }
0x1756   :  { %7664 = vmatpush3.bf16.msra.mxu1 %v9523_v3  ;;  %7279 = vmatprep.mubr.msk.f32.mxu1 %vm8995_vm0, %v8993_v2 }
0x1757   :  { %7665 = vmatprep.subr.bf16.mxu1 %v8992_v1 }
0x175a   :  { %7667 = vmatpush3.bf16.msra.mxu1 %v9528_v8 }
0x175b   :  { %7674 = vmatprep.subr.bf16.mxu1 %v8992_v1 }
0x1828   :  { %v1648_v11 = vpop.f32.mrb[10].mxu1 }
0x1829   :  { %v1654_v27 = vadd.f32 %v1652_v9, %v1648_v11  ;;  %v7259_v28 = vpop.f32.mrb[11].mxu1 }
0x182b   :  { %8251 = vtanh.f32 %v1654_v27  ;;  %v6836_v32 = vmul.f32 -1.442695, %v1654_v27 }
0x182d   :  { %8253 = vpow2.f32 %v6836_v32 }
0x1835   :  { %v8252_v30 = vpop.eup %8251 }
0x1836   :  { %1664 = vrot.lane.b32.xlu0 %v8252_v30, %s8996_s16 }
0x1837   :  { %v8254_v33 = vpop.eup %8253 }
0x1838   :  { %v1658_v34 = vadd.f32 1.0, %v8254_v33 }
0x183a   :  { %8255 = vrcp.f32 %v1658_v34  ;;  %v1988_v34 = vrot.slane %v9459_v39, 2 }
0x1844   :  { %v8256_v36 = vpop.eup %8255 }
0x1845   :  { %v1662_v40 = vmul.f32 %v8256_v36, %v1560_v12 }
0x18a8   :  { %v1665_v10 = vpop.permute.xlu0 %1664 }
0x18a9   :  { %v1667_v37 = vmul.f32 %v8256_v36, %v1665_v10 }
0x18ab   :  { %1669 = vrot.lane.b32.xlu1 %v1667_v37, %s8982_s14 }
0x191d   :  { %v1670_v43 = vpop.permute.xlu1 %1669 }
0x191e   :  { %v1672_v48 = vadd.f32 %v1670_v43, %v1662_v40 }
0x1920   :  { %8257 = vtanh.f32 %v1672_v48 }
0x192a   :  { %v8258_v44 = vpop.eup %8257 }
0x192b   :  { %1675 = vrot.lane.b32.xlu0 %v8258_v44, %s8996_s16 }
0x199d   :  { %v1676_v46 = vpop.permute.xlu0 %1675 }
0x199e   :  { %v1678_v47 = vmul.f32 %v8256_v36, %v1676_v46 }
0x19a0   :  { %v1686_v49 = vrot.slane %v1678_v47, %v9367_v14 }
0x19a2   :  { %1687 = vrot.lane.b32.xlu1 %v1686_v49, %s8982_s14 }
0x1a14   :  { %v1688_v50 = vpop.permute.xlu1 %1687 }
0x1a15   :  { %1691 = vst.msk [vmem:[#allocation3 + $0xa] sm:$0x3] %vm586_vm2, %v1688_v50  ;;  %7269 = vmatmul.mubr.msk.f32.vlgmr.msra.gmra.mrb[14].mxu0 %vm476_vm3, %v1688_v50 }
0x1a16   :  { %7670 = vmatpush3.bf16.msra.mxu0 %v9523_v3  ;;  %7290 = vmatprep.mubr.msk.f32.mxu0 %vm8995_vm0, %v8993_v2 }
0x1a17   :  { %7671 = vmatprep.subr.bf16.mxu0 %v8992_v1 }
0x1a1a   :  { %7673 = vmatpush3.bf16.msra.mxu0 %v9528_v8 }
0x1a1b   :  { %7680 = vmatprep.subr.bf16.mxu0 %v8992_v1 }
0x1ae8   :  { %v1760_v35 = vpop.f32.mrb[14].mxu0 }
0x1ae9   :  { %v1766_v16 = vadd.f32 %v1764_v51, %v1760_v35  ;;  %v7270_v38 = vpop.f32.mrb[15].mxu0 }
0x1aeb   :  { %8259 = vtanh.f32 %v1766_v16  ;;  %v6838_v25 = vmul.f32 -1.442695, %v1766_v16 }
0x1aed   :  { %8261 = vpow2.f32 %v6838_v25 }
0x1af5   :  { %v8260_v41 = vpop.eup %8259 }
0x1af6   :  { %1776 = vrot.lane.b32.xlu0 %v8260_v41, %s8996_s16  ;;  %v2100_v41 = vrot.slane %v9439_v13, 2 }
0x1af7   :  { %v8262_v52 = vpop.eup %8261 }
0x1af8   :  { %v1770_v53 = vadd.f32 1.0, %v8262_v52 }
0x1afa   :  { %8263 = vrcp.f32 %v1770_v53 }
0x1b04   :  { %v8264_v54 = vpop.eup %8263 }
0x1b05   :  { %v1774_v59 = vmul.f32 %v8264_v54, %v1672_v48 }
0x1b68   :  { %v1777_v56 = vpop.permute.xlu0 %1776 }
0x1b69   :  { %v1779_v58 = vmul.f32 %v8264_v54, %v1777_v56 }
0x1b6b   :  { %1781 = vrot.lane.b32.xlu1 %v1779_v58, %s8982_s14 }
0x1bdd   :  { %v1782_v60 = vpop.permute.xlu1 %1781 }
0x1bde   :  { %v1784_v22 = vadd.f32 %v1782_v60, %v1774_v59 }
0x1be0   :  { %8265 = vtanh.f32 %v1784_v22 }
0x1bea   :  { %v8266_v61 = vpop.eup %8265 }
0x1beb   :  { %1787 = vrot.lane.b32.xlu0 %v8266_v61, %s8996_s16 }
0x1c5d   :  { %v1788_v62 = vpop.permute.xlu0 %1787 }
0x1c5e   :  { %v1790_v63 = vmul.f32 %v8264_v54, %v1788_v62 }
0x1c60   :  { %v1798_v4 = vrot.slane %v1790_v63, %v9367_v14 }
0x1c62   :  { %1799 = vrot.lane.b32.xlu1 %v1798_v4, %s8982_s14 }
0x1cd4   :  { %v1800_v5 = vpop.permute.xlu1 %1799 }
0x1cd5   :  { %1803 = vst.msk [vmem:[#allocation3 + $0x8] sm:$0x3] %vm586_vm2, %v1800_v5  ;;  %7280 = vmatmul.mubr.msk.f32.vlgmr.msra.gmra.mrb[12].mxu1 %vm476_vm3, %v1800_v5 }
0x1cd6   :  { %7676 = vmatpush3.bf16.msra.mxu1 %v9523_v3  ;;  %7301 = vmatprep.mubr.msk.f32.mxu1 %vm8995_vm0, %v8993_v2 }
0x1cd7   :  { %7677 = vmatprep.subr.bf16.mxu1 %v8992_v1 }
0x1cda   :  { %7679 = vmatpush3.bf16.msra.mxu1 %v9528_v8 }
0x1da8   :  { %v1872_v15 = vpop.f32.mrb[12].mxu1 }
0x1da9   :  { %v1878_v17 = vadd.f32 %v1876_v6, %v1872_v15  ;;  %v7281_v18 = vpop.f32.mrb[13].mxu1 }
0x1daa   :  { %v2212_v18 = vrot.slane %v9408_v42, 2 }
0x1dab   :  { %8267 = vtanh.f32 %v1878_v17  ;;  %v6840_v12 = vmul.f32 -1.442695, %v1878_v17 }
0x1dad   :  { %8269 = vpow2.f32 %v6840_v12 }
0x1db5   :  { %v8268_v20 = vpop.eup %8267 }
0x1db6   :  { %1888 = vrot.lane.b32.xlu0 %v8268_v20, %s8996_s16 }
0x1db7   :  { %v8270_v21 = vpop.eup %8269 }
0x1db8   :  { %v1882_v23 = vadd.f32 1.0, %v8270_v21 }
0x1dba   :  { %8271 = vrcp.f32 %v1882_v23 }
0x1dc4   :  { %v8272_v24 = vpop.eup %8271 }
0x1dc5   :  { %v1886_v9 = vmul.f32 %v8272_v24, %v1784_v22 }
0x1e28   :  { %v1889_v26 = vpop.permute.xlu0 %1888 }
0x1e29   :  { %v1891_v7 = vmul.f32 %v8272_v24, %v1889_v26 }
0x1e2b   :  { %1893 = vrot.lane.b32.xlu1 %v1891_v7, %s8982_s14 }
0x1e9d   :  { %v1894_v11 = vpop.permute.xlu1 %1893 }
0x1e9e   :  { %v1896_v57 = vadd.f32 %v1894_v11, %v1886_v9 }
0x1ea0   :  { %8273 = vtanh.f32 %v1896_v57 }
0x1eaa   :  { %v8274_v27 = vpop.eup %8273 }
0x1eab   :  { %1899 = vrot.lane.b32.xlu0 %v8274_v27, %s8996_s16 }
0x1f1d   :  { %v1900_v28 = vpop.permute.xlu0 %1899 }
0x1f1e   :  { %v1902_v30 = vmul.f32 %v8272_v24, %v1900_v28 }
0x1f20   :  { %v1910_v32 = vrot.slane %v1902_v30, %v9367_v14 }
0x1f22   :  { %1911 = vrot.lane.b32.xlu1 %v1910_v32, %s8982_s14  ;;  %v2276_v32 = vld [vmem:[#allocation15 + $0x8] sm:$0xff] }
0x1f94   :  { %v1912_v33 = vpop.permute.xlu1 %1911 }
0x1f95   :  { %1915 = vst.msk [vmem:[#allocation3 + $0x6] sm:$0x3] %vm586_vm2, %v1912_v33  ;;  %7291 = vmatmul.mubr.msk.f32.vlgmr.msra.gmra.mrb[16].mxu0 %vm476_vm3, %v1912_v33  ;;  %v2278_v33 = vld [vmem:[#allocation15 + $0x18] sm:$0xff] }
0x1f96   :  { %7682 = vmatpush3.bf16.msra.mxu0 %v9523_v3  ;;  %7312 = vmatprep.mubr.msk.f32.mxu0 %vm8995_vm0, %v8993_v2 }
0x1f97   :  { %7683 = vmatprep.subr.bf16.mxu0 %v8992_v1 }
0x1f9a   :  { %7685 = vmatpush3.bf16.msra.mxu0 %v9528_v8 }
0x1f9b   :  { %7702 = vmatprep.subr.bf16.mxu0 %v8992_v1 }
0x2068   :  { %v1984_v36 = vpop.f32.mrb[16].mxu0 }
0x2069   :  { %v1990_v10 = vadd.f32 %v1988_v34, %v1984_v36  ;;  %v7292_v37 = vpop.f32.mrb[17].mxu0  ;;  %v2275_v34 = vld [vmem:[#allocation15] sm:$0xff]  ;;  %v7686_v36 = vpack.c.bf16 %v2278_v33, %v2276_v32 }
0x206a   :  { %v2280_v37 = vld [vmem:[#allocation15 + $0x28] sm:$0xff] }
0x206b   :  { %8275 = vtanh.f32 %v1990_v10  ;;  %v6842_v43 = vmul.f32 -1.442695, %v1990_v10  ;;  %v2277_v10 = vld [vmem:[#allocation15 + $0x10] sm:$0xff]  ;;  %7687 = vmatprep.subr.bf16.mxu1 %v7686_v36 }
0x206d   :  { %8277 = vpow2.f32 %v6842_v43  ;;  %v7688_v43 = vpack.c.bf16 %v2277_v10, %v2275_v34 }
0x2075   :  { %v8276_v40 = vpop.eup %8275 }
0x2076   :  { %2000 = vrot.lane.b32.xlu0 %v8276_v40, %s8996_s16  ;;  %v2282_v40 = vld [vmem:[#allocation15 + $0x38] sm:$0xff] }
0x2077   :  { %v8278_v3 = vpop.eup %8277 }
0x2078   :  { %v1994_v48 = vadd.f32 1.0, %v8278_v3  ;;  %v7690_v3 = vpack.c.bf16 %v2282_v40, %v2280_v37 }
0x207a   :  { %8279 = vrcp.f32 %v1994_v48  ;;  %v2279_v48 = vld [vmem:[#allocation15 + $0x20] sm:$0xff] }
0x2084   :  { %v8280_v44 = vpop.eup %8279 }
0x2085   :  { %v1998_v8 = vmul.f32 %v8280_v44, %v1896_v57 }
0x20e8   :  { %v2001_v46 = vpop.permute.xlu0 %2000 }
0x20e9   :  { %v2003_v47 = vmul.f32 %v8280_v44, %v2001_v46  ;;  %v2268_v46 = vld [vmem:[#allocation13 + $0x8] sm:$0xff] }
0x20eb   :  { %2005 = vrot.lane.b32.xlu1 %v2003_v47, %s8982_s14  ;;  %v2270_v47 = vld [vmem:[#allocation13 + $0x18] sm:$0xff] }
0x215d   :  { %v2006_v49 = vpop.permute.xlu1 %2005 }
0x215e   :  { %v2008_v39 = vadd.f32 %v2006_v49, %v1998_v8  ;;  %v7694_v49 = vpack.c.bf16 %v2270_v47, %v2268_v46 }
0x2160   :  { %8281 = vtanh.f32 %v2008_v39 }
0x216a   :  { %v8282_v50 = vpop.eup %8281 }
0x216b   :  { %2011 = vrot.lane.b32.xlu0 %v8282_v50, %s8996_s16 }
0x21dd   :  { %v2012_v51 = vpop.permute.xlu0 %2011 }
0x21de   :  { %v2014_v35 = vmul.f32 %v8280_v44, %v2012_v51  ;;  %v2281_v44 = vld [vmem:[#allocation15 + $0x30] sm:$0xff] }
0x21df   :  { %v7692_v8 = vpack.c.bf16 %v2281_v44, %v2279_v48  ;;  %v2529_v48 = vld [vmem:[#allocation16] sm:$0x3] }
0x21e0   :  { %v2022_v16 = vrot.slane %v2014_v35, %v9367_v14  ;;  %v2593_v35 = vld [vmem:[#allocation18] sm:$0xff]  ;;  %v9705_v44 = vrot.slane %v2529_v48, %v9393_v29  ;;  %v9708_v46 = vrot.slane %v2529_v48, %v9395_v31 }
0x21e2   :  { %2023 = vrot.lane.b32.xlu1 %v2022_v16, %s8982_s14  ;;  %v2594_v16 = vld [vmem:[#allocation18 + $0x8] sm:$0xff] }
0x2254   :  { %v2024_v38 = vpop.permute.xlu1 %2023 }
0x2255   :  { %2027 = vst.msk [vmem:[#allocation3 + $0x4] sm:$0x3] %vm586_vm2, %v2024_v38  ;;  %7302 = vmatmul.mubr.msk.f32.vlgmr.msra.gmra.mrb[14].mxu1 %vm476_vm3, %v2024_v38  ;;  %v9671_v38 = vpack.c.bf16 %v2594_v16, %v2593_v35 }
0x2256   :  { %2393 = vmatprep.mubr.f32.mxu1 %v8993_v2  ;;  %7689 = vmatpush1.bf16.msra.mxu1 %v7688_v43 }
0x2257   :  { %7691 = vmatprep.subr.bf16.mxu1 %v7690_v3 }
0x225a   :  { %7693 = vmatpush1.bf16.msra.mxu1 %v7692_v8 }
0x225b   :  { %7695 = vmatprep.subr.bf16.mxu1 %v7694_v49 }
0x2328   :  { %v2096_v25 = vpop.f32.mrb[14].mxu1 }
0x2329   :  { %v2102_v52 = vadd.f32 %v2100_v41, %v2096_v25  ;;  %v7303_v53 = vpop.f32.mrb[15].mxu1  ;;  %v2595_v41 = vld [vmem:[#allocation18 + $0x10] sm:$0xff]  ;;  %v2596_v25 = vld [vmem:[#allocation18 + $0x18] sm:$0xff] }
0x232b   :  { %8283 = vtanh.f32 %v2102_v52  ;;  %v6844_v56 = vmul.f32 -1.442695, %v2102_v52  ;;  %v9675_v52 = vpack.c.bf16 %v2596_v25, %v2595_v41 }
0x232d   :  { %8285 = vpow2.f32 %v6844_v56  ;;  %v2262_v56 = vld [vmem:[#allocation3 + $0x6] sm:$0x3] }
0x2335   :  { %v8284_v54 = vpop.eup %8283 }
0x2336   :  { %2112 = vrot.lane.b32.xlu0 %v8284_v54, %s8996_s16  ;;  %v2261_v54 = vld [vmem:[#allocation3 + $0x4] sm:$0x3] }
0x2337   :  { %v8286_v58 = vpop.eup %8285 }
0x2338   :  { %v2106_v59 = vadd.f32 1.0, %v8286_v58  ;;  %v2263_v58 = vld [vmem:[#allocation3 + $0x8] sm:$0x3] }
0x233a   :  { %8287 = vrcp.f32 %v2106_v59  ;;  %v2292_v59 = vcombine.low %v2261_v54, %v2262_v56 }
0x2344   :  { %v8288_v60 = vpop.eup %8287 }
0x2345   :  { %v2110_v62 = vmul.f32 %v8288_v60, %v2008_v39 }
0x23a8   :  { %v2113_v22 = vpop.permute.xlu0 %2112 }
0x23a9   :  { %v2115_v61 = vmul.f32 %v8288_v60, %v2113_v22 }
0x23ab   :  { %2117 = vrot.lane.b32.xlu1 %v2115_v61, %s8982_s14 }
0x241d   :  { %v2118_v63 = vpop.permute.xlu1 %2117 }
0x241e   :  { %v2120_v13 = vadd.f32 %v2118_v63, %v2110_v62  ;;  %v2264_v62 = vld [vmem:[#allocation3 + $0xa] sm:$0x3] }
0x2420   :  { %8289 = vtanh.f32 %v2120_v13 }
0x242a   :  { %v8290_v4 = vpop.eup %8289 }
0x242b   :  { %2123 = vrot.lane.b32.xlu0 %v8290_v4, %s8996_s16  ;;  %v2269_v4 = vld [vmem:[#allocation13 + $0x10] sm:$0xff] }
0x249d   :  { %v2124_v5 = vpop.permute.xlu0 %2123 }
0x249e   :  { %v2126_v6 = vmul.f32 %v8288_v60, %v2124_v5  ;;  %v2265_v60 = vld [vmem:[#allocation3 + $0xc] sm:$0x3]  ;;  %v2308_v5 = vcombine.low %v2263_v58, %v2264_v62 }
0x24a0   :  { %v2134_v15 = vrot.slane %v2126_v6, %v9367_v14  ;;  %v2254_v6 = vld [vmem:[#allocation2 + $0x6] sm:$0x3] }
0x24a2   :  { %2135 = vrot.lane.b32.xlu1 %v2134_v15, %s8982_s14  ;;  %v2272_v15 = vld [vmem:[#allocation13 + $0x28] sm:$0xff] }
0x2514   :  { %v2136_v17 = vpop.permute.xlu1 %2135 }
0x2515   :  { %2139 = vst.msk [vmem:[#allocation3 + $0x2] sm:$0x3] %vm586_vm2, %v2136_v17  ;;  %7313 = vmatmul.mubr.msk.f32.vlgmr.msra.gmra.mrb[18].mxu0 %vm476_vm3, %v2136_v17  ;;  %v2274_v17 = vld [vmem:[#allocation13 + $0x38] sm:$0xff] }
0x2516   :  { %7323 = vmatprep.mubr.msk.f32.mxu0 %vm8995_vm0, %v8993_v2  ;;  %7704 = vmatpush3.bf16.msra.mxu0 %v9671_v38 }
0x2517   :  { %7705 = vmatprep.subr.bf16.mxu0 %v8992_v1 }
0x251a   :  { %7707 = vmatpush3.bf16.msra.mxu0 %v9675_v52 }
0x251b   :  { %7708 = vmatprep.subr.bf16.mxu0 %v8992_v1 }
0x251c   :  { %v2260_v61 = vld [vmem:[#allocation3 + $0x2] sm:$0x3] }
0x251d   :  { %7324 = vmatmul.mubr.f32.vlgmr.msra.gmra.mrb[20].mxu0 %v8993_v2 }
0x251e   :  { %7710 = vmatpush3.bf16.msra.mxu0 %v9671_v38  ;;  %7334 = vmatprep.mubr.msk.f32.mxu0 %vm8995_vm0, %v8993_v2 }
0x251f   :  { %7711 = vmatprep.subr.bf16.mxu0 %v8992_v1 }
0x2522   :  { %7713 = vmatpush3.bf16.msra.mxu0 %v9675_v52 }
0x2523   :  { %7720 = vmatprep.subr.bf16.mxu0 %v8992_v1 }
0x25e8   :  { %v2208_v20 = vpop.f32.mrb[18].mxu0 }
0x25e9   :  { %v2214_v12 = vadd.f32 %v2212_v18, %v2208_v20  ;;  %v7314_v21 = vpop.f32.mrb[19].mxu0  ;;  %v2266_v18 = vld [vmem:[#allocation3 + $0xe] sm:$0x3] }
0x25ea   :  { %v2309_v21 = vcombine.low %v2265_v60, %v2266_v18 }
0x25eb   :  { %8291 = vtanh.f32 %v2214_v12  ;;  %v6846_v24 = vmul.f32 -1.442695, %v2214_v12  ;;  %v2306_v12 = vrot.slane %v2292_v59, %v9367_v14 }
0x25ec   :  { %v2323_v32 = vrot.slane %v2309_v21, %v9367_v14 }
0x25ed   :  { %8293 = vpow2.f32 %v6846_v24  ;;  %v2252_v24 = vld [vmem:[#allocation2 + $0x2] sm:$0x3] }
0x25f0   :  { %v2667_v43 = vpop.f32.mrb[20].mxu0 }
0x25f1   :  { %v7325_v3 = vpop.f32.mrb[21].mxu0 }
0x25f5   :  { %v8292_v23 = vpop.eup %8291 }
0x25f6   :  { %2224 = vrot.lane.b32.xlu0 %v8292_v23, %s8996_s16 }
0x25f7   :  { %v8294_v26 = vpop.eup %8293 }
0x25f8   :  { %v2218_v7 = vadd.f32 1.0, %v8294_v26  ;;  %v2253_v26 = vld [vmem:[#allocation2 + $0x4] sm:$0x3] }
0x25fa   :  { %8295 = vrcp.f32 %v2218_v7 }
0x2604   :  { %v8296_v9 = vpop.eup %8295 }
0x2605   :  { %v2222_v27 = vmul.f32 %v8296_v9, %v2120_v13  ;;  %v2267_v13 = vld [vmem:[#allocation13] sm:$0xff] }
0x2606   :  { %v7696_v23 = vpack.c.bf16 %v2269_v4, %v2267_v13 }
0x2668   :  { %v2225_v11 = vpop.permute.xlu0 %2224 }
0x2669   :  { %v2227_v57 = vmul.f32 %v8296_v9, %v2225_v11  ;;  %v2316_v11 = vrot.slane %v2308_v5, %v9367_v14 }
0x266b   :  { %2229 = vrot.lane.b32.xlu1 %v2227_v57, %s8982_s14  ;;  %v2271_v57 = vld [vmem:[#allocation13 + $0x20] sm:$0xff]  ;;  %v2324_v36 = vcombine.low %v2316_v11, %v2323_v32 }
0x26dd   :  { %v2230_v28 = vpop.permute.xlu1 %2229 }
0x26de   :  { %v9662_v42 = vadd.f32 %v2230_v28, %v2222_v27  ;;  %v2273_v27 = vld [vmem:[#allocation13 + $0x30] sm:$0xff]  ;;  %v2415_v28 = vcombine.low %v2253_v26, %v2254_v6 }
0x26df   :  { %v7700_v34 = vpack.c.bf16 %v2273_v27, %v2271_v57 }
0x26e0   :  { %8297 = vtanh.f32 %v9662_v42  ;;  %v2429_v10 = vrot.slane %v2415_v28, %v9367_v14 }
0x26ea   :  { %v8298_v30 = vpop.eup %8297 }
0x26eb   :  { %2235 = vrot.lane.b32.xlu0 %v8298_v30, %s8996_s16  ;;  %v2251_v30 = vld [vmem:[#allocation2] sm:$0x3] }
0x26ec   :  { %v2414_v33 = vcombine.low %v2251_v30, %v2252_v24 }
0x26ee   :  { %v2422_v37 = vrot.slane %v2414_v33, %v9367_v14 }
0x26f0   :  { %v2430_v40 = vcombine.low %v2422_v37, %v2429_v10  ;;  %v2257_v37 = vld [vmem:[#allocation2 + $0xc] sm:$0x3] }
0x275d   :  { %v2236_v39 = vpop.permute.xlu0 %2235 }
0x275e   :  { %v2238_v50 = vmul.f32 %v8296_v9, %v2236_v39  ;;  %v7698_v9 = vpack.c.bf16 %v2274_v17, %v2272_v15 }
0x2760   :  { %v9667_v51 = vrot.slane %v2238_v50, %v9367_v14 }
0x2762   :  { %2247 = vrot.lane.b32.xlu1 %v9667_v51, %s8982_s14 }
0x27d4   :  { %v2248_v53 = vpop.permute.xlu1 %2247 }
0x27d5   :  { %2250 = vst.msk [vmem:[#allocation3] sm:$0x3] %vm586_vm2, %v2248_v53 }
0x27dc   :  { %v2259_v22 = vld [vmem:[#allocation3] sm:$0x3] }
0x27dd   :  { %v2291_v63 = vcombine.low %v2259_v22, %v2260_v61 }
0x27df   :  { %v2299_v20 = vrot.slane %v2291_v63, %v9367_v14  ;;  %v1320_v63 = vadd.f32 %v9583_v55, %v9551_v19 }
0x27e1   :  { %v2307_v7 = vcombine.low %v2299_v20, %v2306_v12  ;;  %v6831_v5 = vmul.f32 -1.442695, %v1320_v63 }
0x27e3   :  { %6847 = vmatmul.mubr.msk.f32.vlgmr.msra.gmra.mrb[16].mxu1 %vm476_vm3, %v2307_v7 }
0x27e4   :  { %7697 = vmatpush1.bf16.msra.mxu1 %v7696_v23  ;;  %2399 = vmatprep.mubr.f32.mxu1 %v8993_v2 }
0x27e5   :  { %7699 = vmatprep.subr.bf16.mxu1 %v7698_v9 }
0x27e7   :  { %6848 = vmatmul.mubr.msk.f32.gmra.mrb[18].mxu1 %vm476_vm3, %v2324_v36  ;;  %v2255_v36 = vld [vmem:[#allocation2 + $0x8] sm:$0x3] }
0x27e8   :  { %7701 = vmatpush1.bf16.msra.mxu1 %v7700_v34  ;;  %2516 = vmatprep.mubr.f32.mxu1 %v8993_v2  ;;  %v2256_v34 = vld [vmem:[#allocation2 + $0xa] sm:$0x3] }
0x27e9   :  { %7714 = vmatprep.subr.bf16.mxu1 %v8992_v1  ;;  %v2431_v10 = vcombine.low %v2255_v36, %v2256_v34 }
0x27eb   :  { %6849 = vmatmul.mubr.msk.f32.vlgmr.msra.gmra.mrb[16].mxu1 %vm476_vm3, %v2430_v40  ;;  %v2439_v3 = vrot.slane %v2431_v10, %v9367_v14 }
0x27ec   :  { %2522 = vmatprep.mubr.f32.mxu1 %v8993_v2  ;;  %7716 = vmatpush3.bf16.msra.mxu1 %v9671_v38 }
0x27ed   :  { %7717 = vmatprep.subr.bf16.mxu1 %v8992_v1 }
0x27f0   :  { %7719 = vmatpush3.bf16.msra.mxu1 %v9675_v52 }
0x27f1   :  { %7726 = vmatprep.subr.bf16.mxu1 %v8992_v1 }
0x28be   :  { %v2518_v47 = vpop.f32.mrb[16].mxu1 }
0x28bf   :  { %v9711_v8 = vadd.f32 %v9705_v44, %v2518_v47  ;;  %v2520_v49 = vpop.f32.mrb[17].mxu1 }
0x28c0   :  { %v9714_v39 = vadd.f32 %v9708_v46, %v2520_v49 }
0x28c2   :  { %v2549_v50 = vcombine.low %v9711_v8, %v9714_v39  ;;  %v2550_v35 = vcombine.high %v9711_v8, %v9714_v39 }
0x28c4   :  { %v9721_v16 = vrot.slane %v2549_v50, %v9367_v14 }
0x28c6   :  { %v2671_v41 = vadd.f32 %v2667_v43, %v9721_v16  ;;  %v9752_v57 = vcombine.high %v9721_v16, %v9721_v16 }
0x28c8   :  { %8299 = vtanh.f32 %v2671_v41  ;;  %v6851_v53 = vmul.f32 -1.442695, %v2671_v41 }
0x28ca   :  { %8301 = vpow2.f32 %v6851_v53 }
0x28d2   :  { %v8300_v25 = vpop.eup %8299 }
0x28d3   :  { %2681 = vrot.lane.b32.xlu0 %v8300_v25, %s8996_s16 }
0x28d4   :  { %v8302_v54 = vpop.eup %8301 }
0x28d5   :  { %v2675_v56 = vadd.f32 1.0, %v8302_v54 }
0x28d7   :  { %8303 = vrcp.f32 %v2675_v56 }
0x28e1   :  { %v8304_v58 = vpop.eup %8303 }
0x28e2   :  { %v2679_v22 = vmul.f32 0.0, %v8304_v58 }
0x2945   :  { %v2682_v59 = vpop.permute.xlu0 %2681 }
0x2946   :  { %v2684_v60 = vmul.f32 %v8304_v58, %v2682_v59 }
0x2948   :  { %2686 = vrot.lane.b32.xlu1 %v2684_v60, %s8982_s14 }
0x29ba   :  { %v2687_v61 = vpop.permute.xlu1 %2686 }
0x29bb   :  { %v9726_v62 = vadd.f32 %v2687_v61, %v2679_v22 }
0x29bd   :  { %8305 = vtanh.f32 %v9726_v62 }
0x29be   :  { %8307 = vtanh.f32 %v1320_v63 }
0x29bf   :  { %8309 = vpow2.f32 %v6831_v5 }
0x29c7   :  { %v8306_v13 = vpop.eup %8305 }
0x29c8   :  { %2692 = vrot.lane.b32.xlu0 %v8306_v13, %s8996_s16  ;;  %v8308_v4 = vpop.eup %8307 }
0x29c9   :  { %v8310_v6 = vpop.eup %8309 }
0x29ca   :  { %v1324_v15 = vadd.f32 1.0, %v8310_v6 }
0x29cc   :  { %1330 = vrot.lane.b32.xlu0 %v8308_v4, %s8996_s16  ;;  %8311 = vrcp.f32 %v1324_v15 }
0x29d6   :  { %v8312_v12 = vpop.eup %8311 }
0x29d7   :  { %v1328_v23 = vmul.f32 %v8312_v12, %v9558_v45 }
0x2a3a   :  { %v2693_v17 = vpop.permute.xlu0 %2692 }
0x2a3b   :  { %v2695_v18 = vmul.f32 %v8304_v58, %v2693_v17 }
0x2a3d   :  { %v2703_v20 = vrot.slane %v2695_v18, %v9367_v14 }
0x2a3e   :  { %v1331_v19 = vpop.permute.xlu0 %1330 }
0x2a3f   :  { %2704 = vrot.lane.b32.xlu1 %v2703_v20, %s8982_s14  ;;  %v1333_v55 = vmul.f32 %v8312_v12, %v1331_v19 }
0x2a41   :  { %1335 = vrot.lane.b32.xlu0 %v1333_v55, %s8982_s14 }
0x2ab1   :  { %v2705_v21 = vpop.permute.xlu1 %2704 }
0x2ab2   :  { %7335 = vmatmul.mubr.msk.f32.vlgmr.msra.gmra.mrb[22].mxu0 %vm476_vm3, %v2705_v21 }
0x2ab3   :  { %v1336_v24 = vpop.permute.xlu0 %1335  ;;  %7722 = vmatpush3.bf16.msra.mxu0 %v9671_v38  ;;  %7356 = vmatprep.mubr.msk.f32.mxu0 %vm8995_vm0, %v8993_v2 }
0x2ab4   :  { %v9741_v26 = vadd.f32 %v1336_v24, %v1328_v23  ;;  %7723 = vmatprep.subr.bf16.mxu0 %v8992_v1 }
0x2ab6   :  { %8313 = vtanh.f32 %v9741_v26 }
0x2ab7   :  { %7725 = vmatpush3.bf16.msra.mxu0 %v9675_v52 }
0x2ab8   :  { %7732 = vmatprep.subr.bf16.mxu0 %v8992_v1 }
0x2ac0   :  { %v8314_v7 = vpop.eup %8313 }
0x2ac1   :  { %1341 = vrot.lane.b32.xlu0 %v8314_v7, %s8996_s16 }
0x2b33   :  { %v1342_v45 = vpop.permute.xlu0 %1341 }
0x2b34   :  { %v1344_v9 = vmul.f32 %v8312_v12, %v1342_v45 }
0x2b36   :  { %v1352_v11 = vrot.slane %v1344_v9, %v9367_v14 }
0x2b38   :  { %1353 = vrot.lane.b32.xlu0 %v1352_v11, %s8982_s14 }
0x2b85   :  { %v2774_v27 = vpop.f32.mrb[22].mxu0 }
0x2b86   :  { %v2778_v28 = vadd.f32 %v2774_v27, %v9752_v57  ;;  %v7336_v30 = vpop.f32.mrb[23].mxu0 }
0x2b88   :  { %8315 = vtanh.f32 %v2778_v28  ;;  %v6853_v49 = vmul.f32 -1.442695, %v2778_v28 }
0x2b8a   :  { %8317 = vpow2.f32 %v6853_v49 }
0x2b92   :  { %v8316_v32 = vpop.eup %8315 }
0x2b93   :  { %2788 = vrot.lane.b32.xlu1 %v8316_v32, %s8996_s16 }
0x2b94   :  { %v8318_v50 = vpop.eup %8317 }
0x2b95   :  { %v2782_v41 = vadd.f32 1.0, %v8318_v50 }
0x2b97   :  { %8319 = vrcp.f32 %v2782_v41 }
0x2ba1   :  { %v8320_v25 = vpop.eup %8319 }
0x2ba2   :  { %v2786_v56 = vmul.f32 %v8320_v25, %v9726_v62 }
0x2baa   :  { %v9756_v33 = vpop.permute.xlu0 %1353 }
0x2bab   :  { %1357 = vst.msk [vmem:[#allocation2 + $0xe] sm:$0x3] %vm586_vm2, %v9756_v33 }
0x2bb2   :  { %v2258_v40 = vld [vmem:[#allocation2 + $0xe] sm:$0x3] }
0x2bb3   :  { %v2432_v43 = vcombine.low %v2257_v37, %v2258_v40 }
0x2bb5   :  { %v2446_v48 = vrot.slane %v2432_v43, %v9367_v14 }
0x2bb7   :  { %v2447_v47 = vcombine.low %v2439_v3, %v2446_v48 }
0x2bb9   :  { %6850 = vmatmul.mubr.msk.f32.gmra.mrb[18].mxu1 %vm476_vm3, %v2447_v47 }
0x2bba   :  { %7345 = vmatprep.mubr.msk.f32.mxu1 %vm8995_vm0, %v8993_v2 }
0x2c05   :  { %v2789_v53 = vpop.permute.xlu1 %2788 }
0x2c06   :  { %v2791_v54 = vmul.f32 %v8320_v25, %v2789_v53 }
0x2c08   :  { %2793 = vrot.lane.b32.xlu1 %v2791_v54, %s8982_s14 }
0x2c7a   :  { %v2794_v58 = vpop.permute.xlu1 %2793 }
0x2c7b   :  { %v2796_v59 = vadd.f32 %v2794_v58, %v2786_v56 }
0x2c7d   :  { %8321 = vtanh.f32 %v2796_v59 }
0x2c87   :  { %v8322_v60 = vpop.eup %8321 }
0x2c88   :  { %2799 = vrot.lane.b32.xlu1 %v8322_v60, %s8996_s16 }
0x2c8c   :  { %v2524_v22 = vpop.f32.mrb[18].mxu1 }
0x2c8d   :  { %v9769_v61 = vadd.f32 %v9705_v44, %v2524_v22  ;;  %v2526_v63 = vpop.f32.mrb[19].mxu1  ;;  %v9791_v44 = vrot.slane %v2550_v35, %v9367_v14 }
0x2c8e   :  { %v9772_v13 = vadd.f32 %v9708_v46, %v2526_v63 }
0x2c8f   :  { %v9808_v30 = vcombine.high %v9791_v44, %v9791_v44 }
0x2c90   :  { %v2567_v4 = vcombine.low %v9769_v61, %v9772_v13  ;;  %v2568_v62 = vcombine.high %v9769_v61, %v9772_v13 }
0x2cfa   :  { %v2800_v5 = vpop.permute.xlu1 %2799 }
0x2cfb   :  { %v2802_v6 = vmul.f32 %v8320_v25, %v2800_v5 }
0x2cfd   :  { %v2810_v15 = vrot.slane %v2802_v6, %v9367_v14 }
0x2cff   :  { %2811 = vrot.lane.b32.xlu1 %v2810_v15, %s8982_s14 }
0x2d71   :  { %v2812_v17 = vpop.permute.xlu1 %2811 }
0x2d72   :  { %7346 = vmatmul.mubr.msk.f32.vlgmr.msra.gmra.mrb[20].mxu1 %vm476_vm3, %v2812_v17 }
0x2d73   :  { %7728 = vmatpush3.bf16.msra.mxu1 %v9671_v38  ;;  %7367 = vmatprep.mubr.msk.f32.mxu1 %vm8995_vm0, %v8993_v2 }
0x2d74   :  { %7729 = vmatprep.subr.bf16.mxu1 %v8992_v1 }
0x2d77   :  { %7731 = vmatpush3.bf16.msra.mxu1 %v9675_v52 }
0x2d78   :  { %7738 = vmatprep.subr.bf16.mxu1 %v8992_v1 }
0x2e45   :  { %v2881_v46 = vpop.f32.mrb[20].mxu1 }
0x2e46   :  { %v2885_v18 = vadd.f32 %v2881_v46, %v9791_v44  ;;  %v7347_v20 = vpop.f32.mrb[21].mxu1 }
0x2e48   :  { %8323 = vtanh.f32 %v2885_v18  ;;  %v6855_v19 = vmul.f32 -1.442695, %v2885_v18 }
0x2e4a   :  { %8325 = vpow2.f32 %v6855_v19 }
0x2e52   :  { %v8324_v12 = vpop.eup %8323 }
0x2e53   :  { %2895 = vrot.lane.b32.xlu0 %v8324_v12, %s8996_s16 }
0x2e54   :  { %v8326_v55 = vpop.eup %8325 }
0x2e55   :  { %v2889_v21 = vadd.f32 1.0, %v8326_v55 }
0x2e57   :  { %8327 = vrcp.f32 %v2889_v21 }
0x2e61   :  { %v8328_v23 = vpop.eup %8327 }
0x2e62   :  { %v2893_v8 = vmul.f32 %v8328_v23, %v2796_v59  ;;  %v9827_v59 = vrot.slane %v2567_v4, %v9367_v14 }
0x2ec5   :  { %v2896_v24 = vpop.permute.xlu0 %2895 }
0x2ec6   :  { %v2898_v7 = vmul.f32 %v8328_v23, %v2896_v24 }
0x2ec8   :  { %2900 = vrot.lane.b32.xlu1 %v2898_v7, %s8982_s14 }
0x2f3a   :  { %v2901_v39 = vpop.permute.xlu1 %2900 }
0x2f3b   :  { %v2903_v35 = vadd.f32 %v2901_v39, %v2893_v8  ;;  %v9844_v8 = vcombine.high %v9827_v59, %v9827_v59 }
0x2f3d   :  { %8329 = vtanh.f32 %v2903_v35 }
0x2f47   :  { %v8330_v45 = vpop.eup %8329 }
0x2f48   :  { %2906 = vrot.lane.b32.xlu0 %v8330_v45, %s8996_s16 }
0x2fba   :  { %v2907_v9 = vpop.permute.xlu0 %2906 }
0x2fbb   :  { %v2909_v11 = vmul.f32 %v8328_v23, %v2907_v9 }
0x2fbd   :  { %v2917_v27 = vrot.slane %v2909_v11, %v9367_v14 }
0x2fbf   :  { %2918 = vrot.lane.b32.xlu1 %v2917_v27, %s8982_s14 }
0x3031   :  { %v2919_v28 = vpop.permute.xlu1 %2918 }
0x3032   :  { %7357 = vmatmul.mubr.msk.f32.vlgmr.msra.gmra.mrb[24].mxu0 %vm476_vm3, %v2919_v28 }
0x3033   :  { %7734 = vmatpush3.bf16.msra.mxu0 %v9671_v38  ;;  %7378 = vmatprep.mubr.msk.f32.mxu0 %vm8995_vm0, %v8993_v2 }
0x3034   :  { %7735 = vmatprep.subr.bf16.mxu0 %v8992_v1 }
0x3037   :  { %7737 = vmatpush3.bf16.msra.mxu0 %v9675_v52 }
0x3038   :  { %7744 = vmatprep.subr.bf16.mxu0 %v8992_v1 }
0x3105   :  { %v2988_v32 = vpop.f32.mrb[24].mxu0 }
0x3106   :  { %v2992_v34 = vadd.f32 %v2988_v32, %v9808_v30  ;;  %v7358_v36 = vpop.f32.mrb[25].mxu0 }
0x3108   :  { %8331 = vtanh.f32 %v2992_v34  ;;  %v6857_v37 = vmul.f32 -1.442695, %v2992_v34 }
0x310a   :  { %8333 = vpow2.f32 %v6857_v37 }
0x3112   :  { %v8332_v10 = vpop.eup %8331 }
0x3113   :  { %3002 = vrot.lane.b32.xlu0 %v8332_v10, %s8996_s16 }
0x3114   :  { %v8334_v40 = vpop.eup %8333 }
0x3115   :  { %v2996_v43 = vadd.f32 1.0, %v8334_v40 }
0x3117   :  { %8335 = vrcp.f32 %v2996_v43 }
0x3121   :  { %v8336_v3 = vpop.eup %8335 }
0x3122   :  { %v3000_v49 = vmul.f32 %v8336_v3, %v2903_v35 }
0x3185   :  { %v3003_v48 = vpop.permute.xlu0 %3002 }
0x3186   :  { %v3005_v47 = vmul.f32 %v8336_v3, %v3003_v48  ;;  %v2597_v48 = vld [vmem:[#allocation19] sm:$0xff] }
0x3188   :  { %3007 = vrot.lane.b32.xlu1 %v3005_v47, %s8982_s14  ;;  %v2598_v47 = vld [vmem:[#allocation19 + $0x8] sm:$0xff] }
0x31fa   :  { %v3008_v50 = vpop.permute.xlu1 %3007 }
0x31fb   :  { %v3010_v41 = vadd.f32 %v3008_v50, %v3000_v49  ;;  %v9852_v49 = vpack.c.bf16 %v2598_v47, %v2597_v48  ;;  %v2599_v50 = vld [vmem:[#allocation19 + $0x10] sm:$0xff] }
0x31fd   :  { %8337 = vtanh.f32 %v3010_v41 }
0x3207   :  { %v8338_v25 = vpop.eup %8337 }
0x3208   :  { %3013 = vrot.lane.b32.xlu0 %v8338_v25, %s8996_s16 }
0x327a   :  { %v3014_v53 = vpop.permute.xlu0 %3013 }
0x327b   :  { %v3016_v54 = vmul.f32 %v8336_v3, %v3014_v53 }
0x327d   :  { %v3024_v56 = vrot.slane %v3016_v54, %v9367_v14  ;;  %v9874_v54 = vrot.slane %v2568_v62, %v9367_v14 }
0x327f   :  { %3025 = vrot.lane.b32.xlu1 %v3024_v56, %s8982_s14  ;;  %v3624_v48 = vrot.slane %v9874_v54, 2 }
0x32f1   :  { %v3026_v58 = vpop.permute.xlu1 %3025 }
0x32f2   :  { %7368 = vmatmul.mubr.msk.f32.vlgmr.msra.gmra.mrb[22].mxu1 %vm476_vm3, %v3026_v58 }
0x32f3   :  { %7740 = vmatpush3.bf16.msra.mxu1 %v9671_v38  ;;  %7389 = vmatprep.mubr.msk.f32.mxu1 %vm8995_vm0, %v8993_v2 }
0x32f4   :  { %7741 = vmatprep.subr.bf16.mxu1 %v8992_v1 }
0x32f7   :  { %7743 = vmatpush3.bf16.msra.mxu1 %v9675_v52 }
0x32f8   :  { %7750 = vmatprep.subr.bf16.mxu1 %v8992_v1 }
0x33c5   :  { %v3095_v60 = vpop.f32.mrb[22].mxu1 }
0x33c6   :  { %v3099_v22 = vadd.f32 %v3095_v60, %v9827_v59  ;;  %v7369_v63 = vpop.f32.mrb[23].mxu1 }
0x33c8   :  { %8339 = vtanh.f32 %v3099_v22  ;;  %v6859_v6 = vmul.f32 -1.442695, %v3099_v22  ;;  %v9879_v22 = vcombine.high %v9874_v54, %v9874_v54 }
0x33ca   :  { %8341 = vpow2.f32 %v6859_v6  ;;  %v3515_v63 = vrot.slane %v9879_v22, 2 }
0x33d2   :  { %v8340_v5 = vpop.eup %8339 }
0x33d3   :  { %3109 = vrot.lane.b32.xlu0 %v8340_v5, %s8996_s16 }
0x33d4   :  { %v8342_v15 = vpop.eup %8341 }
0x33d5   :  { %v3103_v17 = vadd.f32 1.0, %v8342_v15 }
0x33d7   :  { %8343 = vrcp.f32 %v3103_v17 }
0x33e1   :  { %v8344_v46 = vpop.eup %8343 }
0x33e2   :  { %v3107_v4 = vmul.f32 %v8344_v46, %v3010_v41  ;;  %v2600_v41 = vld [vmem:[#allocation19 + $0x18] sm:$0xff] }
0x33e3   :  { %v9856_v53 = vpack.c.bf16 %v2600_v41, %v2599_v50 }
0x3445   :  { %v3110_v18 = vpop.permute.xlu0 %3109 }
0x3446   :  { %v3112_v20 = vmul.f32 %v8344_v46, %v3110_v18 }
0x3448   :  { %3114 = vrot.lane.b32.xlu1 %v3112_v20, %s8982_s14 }
0x34ba   :  { %v3115_v12 = vpop.permute.xlu1 %3114 }
0x34bb   :  { %v3117_v19 = vadd.f32 %v3115_v12, %v3107_v4 }
0x34bd   :  { %8345 = vtanh.f32 %v3117_v19 }
0x34c7   :  { %v8346_v55 = vpop.eup %8345 }
0x34c8   :  { %3120 = vrot.lane.b32.xlu0 %v8346_v55, %s8996_s16 }
0x353a   :  { %v3121_v21 = vpop.permute.xlu0 %3120 }
0x353b   :  { %v3123_v23 = vmul.f32 %v8344_v46, %v3121_v21 }
0x353d   :  { %v3131_v24 = vrot.slane %v3123_v23, %v9367_v14 }
0x353f   :  { %3132 = vrot.lane.b32.xlu1 %v3131_v24, %s8982_s14 }
0x35b1   :  { %v3133_v7 = vpop.permute.xlu1 %3132 }
0x35b2   :  { %7379 = vmatmul.mubr.msk.f32.vlgmr.msra.gmra.mrb[26].mxu0 %vm476_vm3, %v3133_v7 }
0x35b3   :  { %7746 = vmatpush3.bf16.msra.mxu0 %v9671_v38  ;;  %7400 = vmatprep.mubr.msk.f32.mxu0 %vm8995_vm0, %v8993_v2 }
0x35b4   :  { %7747 = vmatprep.subr.bf16.mxu0 %v8992_v1 }
0x35b7   :  { %7749 = vmatpush3.bf16.msra.mxu0 %v9675_v52 }
0x35b8   :  { %7756 = vmatprep.subr.bf16.mxu0 %v8992_v1 }
0x3685   :  { %v3202_v39 = vpop.f32.mrb[26].mxu0 }
0x3686   :  { %v3206_v35 = vadd.f32 %v3202_v39, %v9844_v8  ;;  %v7380_v45 = vpop.f32.mrb[27].mxu0 }
0x3688   :  { %8347 = vtanh.f32 %v3206_v35  ;;  %v6861_v38 = vmul.f32 -1.442695, %v3206_v35 }
0x368a   :  { %8349 = vpow2.f32 %v6861_v38 }
0x3692   :  { %v8348_v9 = vpop.eup %8347 }
0x3693   :  { %3216 = vrot.lane.b32.xlu0 %v8348_v9, %s8996_s16 }
0x3694   :  { %v8350_v11 = vpop.eup %8349 }
0x3695   :  { %v3210_v27 = vadd.f32 1.0, %v8350_v11 }
0x3697   :  { %8351 = vrcp.f32 %v3210_v27 }
0x36a1   :  { %v8352_v52 = vpop.eup %8351 }
0x36a2   :  { %v3214_v34 = vmul.f32 %v8352_v52, %v3117_v19 }
0x3705   :  { %v3217_v28 = vpop.permute.xlu0 %3216 }
0x3706   :  { %v3219_v32 = vmul.f32 %v8352_v52, %v3217_v28 }
0x3708   :  { %3221 = vrot.lane.b32.xlu1 %v3219_v32, %s8982_s14 }
0x377a   :  { %v3222_v36 = vpop.permute.xlu1 %3221 }
0x377b   :  { %v3224_v10 = vadd.f32 %v3222_v36, %v3214_v34 }
0x377d   :  { %8353 = vtanh.f32 %v3224_v10 }
0x3787   :  { %v8354_v37 = vpop.eup %8353 }
0x3788   :  { %3227 = vrot.lane.b32.xlu0 %v8354_v37, %s8996_s16 }
0x37fa   :  { %v3228_v40 = vpop.permute.xlu0 %3227 }
0x37fb   :  { %v3230_v43 = vmul.f32 %v8352_v52, %v3228_v40 }
0x37fd   :  { %v3238_v3 = vrot.slane %v3230_v43, %v9367_v14 }
0x37ff   :  { %3239 = vrot.lane.b32.xlu1 %v3238_v3, %s8982_s14 }
0x3871   :  { %v3240_v25 = vpop.permute.xlu1 %3239 }
0x3872   :  { %7390 = vmatmul.mubr.msk.f32.vlgmr.msra.gmra.mrb[24].mxu1 %vm476_vm3, %v3240_v25 }
0x3873   :  { %7752 = vmatpush3.bf16.msra.mxu1 %v9852_v49  ;;  %7411 = vmatprep.mubr.msk.f32.mxu1 %vm8995_vm0, %v8993_v2 }
0x3874   :  { %7753 = vmatprep.subr.bf16.mxu1 %v8992_v1 }
0x3877   :  { %7755 = vmatpush3.bf16.msra.mxu1 %v9856_v53 }
0x3878   :  { %7762 = vmatprep.subr.bf16.mxu1 %v8992_v1 }
0x387a   :  { %7412 = vmatmul.mubr.f32.vlgmr.msra.gmra.mrb[26].mxu1 %v8993_v2 }
0x387b   :  { %7764 = vmatpush3.bf16.msra.mxu1 %v9852_v49  ;;  %7433 = vmatprep.mubr.msk.f32.mxu1 %vm8995_vm0, %v8993_v2 }
0x387c   :  { %7765 = vmatprep.subr.bf16.mxu1 %v8992_v1 }
0x387f   :  { %7767 = vmatpush3.bf16.msra.mxu1 %v9856_v53 }
0x3880   :  { %7774 = vmatprep.subr.bf16.mxu1 %v8992_v1 }
0x3945   :  { %v3309_v56 = vpop.f32.mrb[24].mxu1 }
0x3946   :  { %v3313_v58 = vadd.f32 %v3309_v56, %v9874_v54  ;;  %v7391_v60 = vpop.f32.mrb[25].mxu1 }
0x3948   :  { %8355 = vtanh.f32 %v3313_v58  ;;  %v6863_v13 = vmul.f32 -1.442695, %v3313_v58 }
0x394d   :  { %v3511_v5 = vpop.f32.mrb[26].mxu1 }
0x394e   :  { %v3517_v6 = vadd.f32 %v3515_v63, %v3511_v5  ;;  %v7413_v15 = vpop.f32.mrb[27].mxu1 }
0x3950   :  { %8357 = vtanh.f32 %v3517_v6  ;;  %v6866_v62 = vmul.f32 -1.442695, %v3517_v6 }
0x3951   :  { %8359 = vpow2.f32 %v6863_v13 }
0x3952   :  { %v8356_v17 = vpop.eup %8355  ;;  %8361 = vpow2.f32 %v6866_v62 }
0x3953   :  { %3323 = vrot.lane.b32.xlu0 %v8356_v17, %s8996_s16 }
0x395a   :  { %v8358_v61 = vpop.eup %8357 }
0x395b   :  { %3527 = vrot.lane.b32.xlu1 %v8358_v61, %s8996_s16  ;;  %v8360_v46 = vpop.eup %8359 }
0x395c   :  { %v3317_v18 = vadd.f32 1.0, %v8360_v46  ;;  %v8362_v20 = vpop.eup %8361 }
0x395d   :  { %v3521_v4 = vadd.f32 1.0, %v8362_v20  ;;  %v3733_v20 = vrot.slane %v9844_v8, 2 }
0x395e   :  { %8363 = vrcp.f32 %v3317_v18 }
0x395f   :  { %8365 = vrcp.f32 %v3521_v4 }
0x3968   :  { %v8364_v12 = vpop.eup %8363 }
0x3969   :  { %v8366_v21 = vpop.eup %8365  ;;  %v3321_v7 = vmul.f32 %v8364_v12, %v3224_v10 }
0x396a   :  { %v3525_v45 = vmul.f32 0.0, %v8366_v21 }
0x39c5   :  { %v3324_v19 = vpop.permute.xlu0 %3323 }
0x39c6   :  { %v3326_v55 = vmul.f32 %v8364_v12, %v3324_v19 }
0x39c8   :  { %3328 = vrot.lane.b32.xlu0 %v3326_v55, %s8982_s14 }
0x39cd   :  { %v3528_v23 = vpop.permute.xlu1 %3527 }
0x39ce   :  { %v3530_v24 = vmul.f32 %v8366_v21, %v3528_v23 }
0x39d0   :  { %3532 = vrot.lane.b32.xlu1 %v3530_v24, %s8982_s14 }
0x3a3a   :  { %v3329_v39 = vpop.permute.xlu0 %3328 }
0x3a3b   :  { %v9886_v35 = vadd.f32 %v3329_v39, %v3321_v7 }
0x3a3d   :  { %8367 = vtanh.f32 %v9886_v35 }
0x3a42   :  { %v3533_v9 = vpop.permute.xlu1 %3532 }
0x3a43   :  { %v3535_v38 = vadd.f32 %v3533_v9, %v3525_v45 }
0x3a45   :  { %8369 = vtanh.f32 %v3535_v38 }
0x3a47   :  { %v8368_v11 = vpop.eup %8367 }
0x3a48   :  { %3334 = vrot.lane.b32.xlu0 %v8368_v11, %s8996_s16 }
0x3a4f   :  { %v8370_v27 = vpop.eup %8369 }
0x3a50   :  { %3538 = vrot.lane.b32.xlu1 %v8370_v27, %s8996_s16 }
0x3aba   :  { %v3335_v52 = vpop.permute.xlu0 %3334 }
0x3abb   :  { %v3337_v28 = vmul.f32 %v8364_v12, %v3335_v52 }
0x3abd   :  { %v3345_v32 = vrot.slane %v3337_v28, %v9367_v14 }
0x3abf   :  { %3346 = vrot.lane.b32.xlu0 %v3345_v32, %s8982_s14 }
0x3ac2   :  { %v3539_v34 = vpop.permute.xlu1 %3538 }
0x3ac3   :  { %v3541_v36 = vmul.f32 %v8366_v21, %v3539_v34  ;;  %v3842_v34 = vrot.slane %v9827_v59, 2 }
0x3ac5   :  { %v3549_v10 = vrot.slane %v3541_v36, %v9367_v14 }
0x3ac7   :  { %3550 = vrot.lane.b32.xlu1 %v3549_v10, %s8982_s14 }
0x3b31   :  { %v3347_v37 = vpop.permute.xlu0 %3346 }
0x3b32   :  { %7401 = vmatmul.mubr.msk.f32.vlgmr.msra.gmra.mrb[28].mxu0 %vm476_vm3, %v3347_v37 }
0x3b33   :  { %7758 = vmatpush3.bf16.msra.mxu0 %v9852_v49  ;;  %7422 = vmatprep.mubr.msk.f32.mxu0 %vm8995_vm0, %v8993_v2 }
0x3b34   :  { %7759 = vmatprep.subr.bf16.mxu0 %v8992_v1 }
0x3b37   :  { %7761 = vmatpush3.bf16.msra.mxu0 %v9856_v53 }
0x3b38   :  { %7768 = vmatprep.subr.bf16.mxu0 %v8992_v1 }
0x3b39   :  { %v3551_v40 = vpop.permute.xlu1 %3550 }
0x3b3a   :  { %7423 = vmatmul.mubr.msk.f32.vlgmr.msra.gmra.mrb[30].mxu0 %vm476_vm3, %v3551_v40 }
0x3b3b   :  { %7770 = vmatpush3.bf16.msra.mxu0 %v9852_v49  ;;  %7444 = vmatprep.mubr.msk.f32.mxu0 %vm8995_vm0, %v8993_v2 }
0x3b3c   :  { %7771 = vmatprep.subr.bf16.mxu0 %v8992_v1 }
0x3b3f   :  { %7773 = vmatpush3.bf16.msra.mxu0 %v9856_v53 }
0x3b40   :  { %7780 = vmatprep.subr.bf16.mxu0 %v8992_v1 }
0x3c05   :  { %v9909_v43 = vpop.f32.mrb[28].mxu0 }
0x3c06   :  { %v7402_v3 = vpop.f32.mrb[29].mxu0 }
0x3c0d   :  { %v3620_v47 = vpop.f32.mrb[30].mxu0 }
0x3c0e   :  { %v3626_v50 = vadd.f32 %v3624_v48, %v3620_v47  ;;  %v7424_v41 = vpop.f32.mrb[31].mxu0 }
0x3c10   :  { %8371 = vtanh.f32 %v3626_v50  ;;  %v6868_v56 = vmul.f32 -1.442695, %v3626_v50 }
0x3c12   :  { %8373 = vpow2.f32 %v6868_v56 }
0x3c1a   :  { %v8372_v25 = vpop.eup %8371 }
0x3c1b   :  { %3636 = vrot.lane.b32.xlu0 %v8372_v25, %s8996_s16 }
0x3c1c   :  { %v8374_v58 = vpop.eup %8373 }
0x3c1d   :  { %v3630_v60 = vadd.f32 1.0, %v8374_v58 }
0x3c1f   :  { %8375 = vrcp.f32 %v3630_v60 }
0x3c29   :  { %v8376_v63 = vpop.eup %8375 }
0x3c2a   :  { %v3634_v15 = vmul.f32 %v8376_v63, %v3535_v38 }
0x3c8d   :  { %v3637_v5 = vpop.permute.xlu0 %3636 }
0x3c8e   :  { %v3639_v6 = vmul.f32 %v8376_v63, %v3637_v5 }
0x3c90   :  { %3641 = vrot.lane.b32.xlu1 %v3639_v6, %s8982_s14 }
0x3d02   :  { %v3642_v17 = vpop.permute.xlu1 %3641 }
0x3d03   :  { %v3644_v54 = vadd.f32 %v3642_v17, %v3634_v15  ;;  %v3951_v17 = vrot.slane %v9808_v30, 2 }
0x3d05   :  { %8377 = vtanh.f32 %v3644_v54 }
0x3d0f   :  { %v8378_v61 = vpop.eup %8377 }
0x3d10   :  { %3647 = vrot.lane.b32.xlu0 %v8378_v61, %s8996_s16 }
0x3d82   :  { %v3648_v13 = vpop.permute.xlu0 %3647 }
0x3d83   :  { %v3650_v62 = vmul.f32 %v8376_v63, %v3648_v13 }
0x3d85   :  { %v3658_v46 = vrot.slane %v3650_v62, %v9367_v14 }
0x3d87   :  { %3659 = vrot.lane.b32.xlu1 %v3658_v46, %s8982_s14 }
0x3df9   :  { %v3660_v18 = vpop.permute.xlu1 %3659 }
0x3dfa   :  { %7434 = vmatmul.mubr.msk.f32.vlgmr.msra.gmra.mrb[28].mxu1 %vm476_vm3, %v3660_v18 }
0x3dfb   :  { %7776 = vmatpush3.bf16.msra.mxu1 %v9852_v49  ;;  %7455 = vmatprep.mubr.msk.f32.mxu1 %vm8995_vm0, %v8993_v2 }
0x3dfc   :  { %7777 = vmatprep.subr.bf16.mxu1 %v8992_v1 }
0x3dff   :  { %7779 = vmatpush3.bf16.msra.mxu1 %v9856_v53 }
0x3e00   :  { %7786 = vmatprep.subr.bf16.mxu1 %v8992_v1 }
0x3ecd   :  { %v3729_v4 = vpop.f32.mrb[28].mxu1 }
0x3ece   :  { %v3735_v12 = vadd.f32 %v3733_v20, %v3729_v4  ;;  %v7435_v19 = vpop.f32.mrb[29].mxu1 }
0x3ed0   :  { %8379 = vtanh.f32 %v3735_v12  ;;  %v6870_v21 = vmul.f32 -1.442695, %v3735_v12 }
0x3ed2   :  { %8381 = vpow2.f32 %v6870_v21 }
0x3eda   :  { %v8380_v55 = vpop.eup %8379 }
0x3edb   :  { %3745 = vrot.lane.b32.xlu0 %v8380_v55, %s8996_s16 }
0x3edc   :  { %v8382_v23 = vpop.eup %8381 }
0x3edd   :  { %v3739_v24 = vadd.f32 1.0, %v8382_v23 }
0x3edf   :  { %8383 = vrcp.f32 %v3739_v24 }
0x3ee9   :  { %v8384_v7 = vpop.eup %8383 }
0x3eea   :  { %v3743_v9 = vmul.f32 %v8384_v7, %v3644_v54 }
0x3f4d   :  { %v3746_v39 = vpop.permute.xlu0 %3745 }
0x3f4e   :  { %v3748_v45 = vmul.f32 %v8384_v7, %v3746_v39 }
0x3f50   :  { %3750 = vrot.lane.b32.xlu1 %v3748_v45, %s8982_s14 }
0x3fc2   :  { %v3751_v38 = vpop.permute.xlu1 %3750 }
0x3fc3   :  { %v3753_v8 = vadd.f32 %v3751_v38, %v3743_v9  ;;  %v4060_v9 = vrot.slane %v9791_v44, 2 }
0x3fc5   :  { %8385 = vtanh.f32 %v3753_v8 }
0x3fcf   :  { %v8386_v11 = vpop.eup %8385 }
0x3fd0   :  { %3756 = vrot.lane.b32.xlu0 %v8386_v11, %s8996_s16 }
0x4042   :  { %v3757_v27 = vpop.permute.xlu0 %3756 }
0x4043   :  { %v3759_v52 = vmul.f32 %v8384_v7, %v3757_v27 }
0x4045   :  { %v3767_v28 = vrot.slane %v3759_v52, %v9367_v14 }
0x4047   :  { %3768 = vrot.lane.b32.xlu1 %v3767_v28, %s8982_s14 }
0x40b9   :  { %v3769_v32 = vpop.permute.xlu1 %3768 }
0x40ba   :  { %7445 = vmatmul.mubr.msk.f32.vlgmr.msra.gmra.mrb[32].mxu0 %vm476_vm3, %v3769_v32 }
0x40bb   :  { %7782 = vmatpush3.bf16.msra.mxu0 %v9852_v49  ;;  %7466 = vmatprep.mubr.msk.f32.mxu0 %vm8995_vm0, %v8993_v2 }
0x40bc   :  { %7783 = vmatprep.subr.bf16.mxu0 %v8992_v1 }
0x40bf   :  { %7785 = vmatpush3.bf16.msra.mxu0 %v9856_v53 }
0x40c0   :  { %7792 = vmatprep.subr.bf16.mxu0 %v8992_v1 }
0x418d   :  { %v3838_v36 = vpop.f32.mrb[32].mxu0 }
0x418e   :  { %v3844_v10 = vadd.f32 %v3842_v34, %v3838_v36  ;;  %v7446_v37 = vpop.f32.mrb[33].mxu0 }
0x4190   :  { %8387 = vtanh.f32 %v3844_v10  ;;  %v6872_v3 = vmul.f32 -1.442695, %v3844_v10 }
0x4192   :  { %8389 = vpow2.f32 %v6872_v3 }
0x419a   :  { %v8388_v40 = vpop.eup %8387 }
0x419b   :  { %3854 = vrot.lane.b32.xlu0 %v8388_v40, %s8996_s16 }
0x419c   :  { %v8390_v48 = vpop.eup %8389 }
0x419d   :  { %v3848_v47 = vadd.f32 1.0, %v8390_v48 }
0x419f   :  { %8391 = vrcp.f32 %v3848_v47 }
0x41a9   :  { %v8392_v50 = vpop.eup %8391 }
0x41aa   :  { %v3852_v56 = vmul.f32 %v8392_v50, %v3753_v8 }
0x420d   :  { %v3855_v41 = vpop.permute.xlu0 %3854 }
0x420e   :  { %v3857_v25 = vmul.f32 %v8392_v50, %v3855_v41 }
0x4210   :  { %3859 = vrot.lane.b32.xlu1 %v3857_v25, %s8982_s14 }
0x4282   :  { %v3860_v58 = vpop.permute.xlu1 %3859 }
0x4283   :  { %v3862_v59 = vadd.f32 %v3860_v58, %v3852_v56 }
0x4285   :  { %8393 = vtanh.f32 %v3862_v59 }
0x428f   :  { %v8394_v60 = vpop.eup %8393 }
0x4290   :  { %3865 = vrot.lane.b32.xlu0 %v8394_v60, %s8996_s16 }
0x4302   :  { %v3866_v63 = vpop.permute.xlu0 %3865 }
0x4303   :  { %v3868_v5 = vmul.f32 %v8392_v50, %v3866_v63  ;;  %v4169_v50 = vrot.slane %v9752_v57, 2  ;;  %v4358_v57 = vld [vmem:[#allocation22] sm:$0xff] }
0x4305   :  { %v3876_v6 = vrot.slane %v3868_v5, %v9367_v14 }
0x4307   :  { %3877 = vrot.lane.b32.xlu1 %v3876_v6, %s8982_s14 }
0x4379   :  { %v3878_v15 = vpop.permute.xlu1 %3877 }
0x437a   :  { %7456 = vmatmul.mubr.msk.f32.vlgmr.msra.gmra.mrb[30].mxu1 %vm476_vm3, %v3878_v15 }
0x437b   :  { %7788 = vmatpush3.bf16.msra.mxu1 %v9852_v49  ;;  %7477 = vmatprep.mubr.msk.f32.mxu1 %vm8995_vm0, %v8993_v2 }
0x437c   :  { %7789 = vmatprep.subr.bf16.mxu1 %v8992_v1 }
0x437f   :  { %7791 = vmatpush3.bf16.msra.mxu1 %v9856_v53 }
0x444d   :  { %v3947_v54 = vpop.f32.mrb[30].mxu1 }
0x444e   :  { %v3953_v61 = vadd.f32 %v3951_v17, %v3947_v54  ;;  %v7457_v13 = vpop.f32.mrb[31].mxu1  ;;  %v4359_v17 = vld [vmem:[#allocation22 + $0x8] sm:$0xff]  ;;  %v4361_v54 = vld [vmem:[#allocation22 + $0x18] sm:$0xff] }
0x444f   :  { %v4360_v13 = vld [vmem:[#allocation22 + $0x10] sm:$0xff] }
0x4450   :  { %8395 = vtanh.f32 %v3953_v61  ;;  %v6874_v46 = vmul.f32 -1.442695, %v3953_v61  ;;  %v7798_v61 = vpack.c.bf16 %v4361_v54, %v4359_v17  ;;  %v4472_v17 = vld [vmem:[%s10546_s13 + $0x58] sm:$0xff] }
0x4452   :  { %8397 = vpow2.f32 %v6874_v46  ;;  %v4365_v46 = vld [vmem:[#allocation22 + $0x38] sm:$0xff]  ;;  %7799 = vmatprep.subr.bf16.mxu1 %v7798_v61 }
0x4453   :  { %v4469_v61 = vld [vmem:[%s10546_s13 + $0x40] sm:$0xff] }
0x445a   :  { %v8396_v62 = vpop.eup %8395 }
0x445b   :  { %3963 = vrot.lane.b32.xlu0 %v8396_v62, %s8996_s16  ;;  %v4363_v62 = vld [vmem:[#allocation22 + $0x28] sm:$0xff] }
0x445c   :  { %v8398_v18 = vpop.eup %8397 }
0x445d   :  { %v3957_v20 = vadd.f32 1.0, %v8398_v18  ;;  %v7800_v18 = vpack.c.bf16 %v4360_v13, %v4358_v57  ;;  %v4471_v13 = vld [vmem:[%s10546_s13 + $0x50] sm:$0xff] }
0x445f   :  { %8399 = vrcp.f32 %v3957_v20  ;;  %v7802_v20 = vpack.c.bf16 %v4365_v46, %v4363_v62 }
0x4469   :  { %v8400_v4 = vpop.eup %8399 }
0x446a   :  { %v3961_v55 = vmul.f32 %v8400_v4, %v3862_v59 }
0x44cd   :  { %v3964_v12 = vpop.permute.xlu0 %3963 }
0x44ce   :  { %v3966_v19 = vmul.f32 %v8400_v4, %v3964_v12  ;;  %v4364_v12 = vld [vmem:[#allocation22 + $0x30] sm:$0xff] }
0x44d0   :  { %3968 = vrot.lane.b32.xlu1 %v3966_v19, %s8982_s14 }
0x4542   :  { %v3969_v21 = vpop.permute.xlu1 %3968 }
0x4543   :  { %v3971_v30 = vadd.f32 %v3969_v21, %v3961_v55  ;;  %v4356_v55 = vld [vmem:[#allocation21] sm:$0xff]  ;;  %v4357_v21 = vld [vmem:[#allocation21 + $0x8] sm:$0xff] }
0x4545   :  { %8401 = vtanh.f32 %v3971_v30 }
0x454f   :  { %v8402_v23 = vpop.eup %8401 }
0x4550   :  { %3974 = vrot.lane.b32.xlu0 %v8402_v23, %s8996_s16 }
0x45c2   :  { %v3975_v24 = vpop.permute.xlu0 %3974 }
0x45c3   :  { %v3977_v7 = vmul.f32 %v8400_v4, %v3975_v24  ;;  %v4362_v4 = vld [vmem:[#allocation22 + $0x20] sm:$0xff] }
0x45c4   :  { %v7804_v19 = vpack.c.bf16 %v4364_v12, %v4362_v4  ;;  %v10060_v12 = vpack.c.bf16 %v4471_v13, %v4469_v61  ;;  %v4495_v61 = vld [vmem:[#allocation28 + $0x10] sm:$0xff]  ;;  %v4498_v13 = vld [vmem:[#allocation28 + $0x28] sm:$0xff] }
0x45c5   :  { %v3985_v39 = vrot.slane %v3977_v7, %v9367_v14  ;;  %v4462_v7 = vld [vmem:[%s10546_s13 + $0x8] sm:$0xff] }
0x45c7   :  { %3986 = vrot.lane.b32.xlu1 %v3985_v39, %s8982_s14  ;;  %v4464_v39 = vld [vmem:[%s10546_s13 + $0x18] sm:$0xff] }
0x4639   :  { %v3987_v45 = vpop.permute.xlu1 %3986 }
0x463a   :  { %7467 = vmatmul.mubr.msk.f32.vlgmr.msra.gmra.mrb[34].mxu0 %vm476_vm3, %v3987_v45  ;;  %v9985_v45 = vpack.c.bf16 %v4464_v39, %v4462_v7 }
0x463b   :  { %7794 = vmatpush3.bf16.msra.mxu0 %v9852_v49  ;;  %7488 = vmatprep.mubr.msk.f32.mxu0 %vm8995_vm0, %v8993_v2 }
0x463c   :  { %7795 = vmatprep.subr.bf16.mxu0 %v8992_v1 }
0x463f   :  { %7797 = vmatpush3.bf16.msra.mxu0 %v9856_v53 }
0x4640   :  { %7807 = vmatprep.subr.bf16.mxu0 %v9985_v45 }
0x470d   :  { %v4056_v38 = vpop.f32.mrb[34].mxu0 }
0x470e   :  { %v4062_v8 = vadd.f32 %v4060_v9, %v4056_v38  ;;  %v7468_v11 = vpop.f32.mrb[35].mxu0  ;;  %v3420_v38 = vadd.f32 %v9909_v43, %v9879_v22 }
0x4710   :  { %8403 = vtanh.f32 %v4062_v8  ;;  %v6876_v52 = vmul.f32 -1.442695, %v4062_v8 }
0x4712   :  { %8405 = vpow2.f32 %v6876_v52 }
0x471a   :  { %v8404_v27 = vpop.eup %8403 }
0x471b   :  { %4072 = vrot.lane.b32.xlu0 %v8404_v27, %s8996_s16  ;;  %v4366_v27 = vld [vmem:[#allocation24] sm:$0x3] }
0x471c   :  { %v8406_v28 = vpop.eup %8405 }
0x471d   :  { %v4066_v49 = vadd.f32 1.0, %v8406_v28 }
0x471f   :  { %8407 = vrcp.f32 %v4066_v49  ;;  %v4371_v49 = vrot.slane %v4366_v27, %v9393_v29 }
0x4729   :  { %v8408_v32 = vpop.eup %8407 }
0x472a   :  { %v4070_v53 = vmul.f32 %v8408_v32, %v3971_v30 }
0x478d   :  { %v4073_v34 = vpop.permute.xlu0 %4072 }
0x478e   :  { %v4075_v36 = vmul.f32 %v8408_v32, %v4073_v34 }
0x4790   :  { %4077 = vrot.lane.b32.xlu1 %v4075_v36, %s8982_s14 }
0x4802   :  { %v4078_v10 = vpop.permute.xlu1 %4077 }
0x4803   :  { %v4080_v44 = vadd.f32 %v4078_v10, %v4070_v53 }
0x4805   :  { %8409 = vtanh.f32 %v4080_v44 }
0x480f   :  { %v8410_v37 = vpop.eup %8409 }
0x4810   :  { %4083 = vrot.lane.b32.xlu0 %v8410_v37, %s8996_s16 }
0x4882   :  { %v4084_v40 = vpop.permute.xlu0 %4083 }
0x4883   :  { %v4086_v3 = vmul.f32 %v8408_v32, %v4084_v40  ;;  %v4375_v32 = vrot.slane %v4366_v27, %v9395_v31 }
0x4885   :  { %v4094_v48 = vrot.slane %v4086_v3, %v9367_v14  ;;  %v10003_v3 = vand.u32 127, %v286_v0  ;;  %v4463_v0 = vld [vmem:[%s10546_s13 + $0x10] sm:$0xff] }
0x4887   :  { %4095 = vrot.lane.b32.xlu1 %v4094_v48, %s8982_s14  ;;  %vm4538_vm4 = vcmp.eq.s32.totalorder %v10003_v3, 2 }
0x4888   :  { %v6884_v48 = vsel %vm4538_vm4, 1.0, %v8993_v2 }
0x4889   :  { %4542 = vst.msk [vmem:[#allocation30] sm:$0x3] %vm4541_vm5, %v6884_v48 }
0x48f9   :  { %v4096_v47 = vpop.permute.xlu1 %4095 }
0x48fa   :  { %7478 = vmatmul.mubr.msk.f32.vlgmr.msra.gmra.mrb[32].mxu1 %vm476_vm3, %v4096_v47  ;;  %v6865_v47 = vmul.f32 -1.442695, %v3420_v38 }
0x48fb   :  { %4448 = vmatprep.mubr.f32.mxu1 %v8993_v2  ;;  %7801 = vmatpush1.bf16.msra.mxu1 %v7800_v18  ;;  %v4474_v18 = vld [vmem:[%s10546_s13 + $0x68] sm:$0xff] }
0x48fc   :  { %7803 = vmatprep.subr.bf16.mxu1 %v7802_v20  ;;  %v4476_v20 = vld [vmem:[%s10546_s13 + $0x78] sm:$0xff] }
0x48ff   :  { %7805 = vmatpush1.bf16.msra.mxu1 %v7804_v19  ;;  %v10064_v19 = vpack.c.bf16 %v4476_v20, %v4474_v18  ;;  %v4497_v20 = vld [vmem:[#allocation28 + $0x20] sm:$0xff] }
0x4902   :  { %6881 = vmatmul.mubr.msk.f32.vlgmr.msra.gmra.mrb[34].mxu1 %vm476_vm3, %v4356_v55  ;;  %v4473_v55 = vld [vmem:[%s10546_s13 + $0x60] sm:$0xff] }
0x4903   :  { %4454 = vmatprep.mubr.f32.mxu1 %v8993_v2 }
0x4906   :  { %6882 = vmatmul.mubr.msk.f32.gmra.mrb[36].mxu1 %vm476_vm3, %v4357_v21  ;;  %v4475_v21 = vld [vmem:[%s10546_s13 + $0x70] sm:$0xff] }
0x4907   :  { %4785 = vmatprep.mubr.f32.mxu1 %v8993_v2 }
0x49cd   :  { %v4165_v41 = vpop.f32.mrb[32].mxu1 }
0x49ce   :  { %v4171_v25 = vadd.f32 %v4169_v50, %v4165_v41  ;;  %v7479_v56 = vpop.f32.mrb[33].mxu1 }
0x49cf   :  { %v4466_v56 = vld [vmem:[%s10546_s13 + $0x28] sm:$0xff] }
0x49d0   :  { %8411 = vtanh.f32 %v4171_v25  ;;  %v6878_v59 = vmul.f32 -1.442695, %v4171_v25  ;;  %v4461_v25 = vld [vmem:[%s10546_s13] sm:$0xff] }
0x49d2   :  { %8413 = vpow2.f32 %v6878_v59  ;;  %v10020_v59 = vpack.c.bf16 %v4463_v0, %v4461_v25 }
0x49d5   :  { %v4450_v52 = vpop.f32.mrb[34].mxu1 }
0x49d6   :  { %v4452_v34 = vpop.f32.mrb[35].mxu1  ;;  %v4451_v36 = vadd.f32 %v4450_v52, %v4371_v49 }
0x49d7   :  { %v4453_v53 = vadd.f32 %v4452_v34, %v4375_v32 }
0x49da   :  { %v8412_v58 = vpop.eup %8411 }
0x49db   :  { %4181 = vrot.lane.b32.xlu0 %v8412_v58, %s8996_s16  ;;  %v4468_v58 = vld [vmem:[%s10546_s13 + $0x38] sm:$0xff] }
0x49dc   :  { %v8414_v60 = vpop.eup %8413 }
0x49dd   :  { %v4175_v63 = vadd.f32 1.0, %v8414_v60  ;;  %v10022_v60 = vpack.c.bf16 %v4468_v58, %v4466_v56 }
0x49df   :  { %8415 = vrcp.f32 %v4175_v63  ;;  %v4465_v63 = vld [vmem:[%s10546_s13 + $0x20] sm:$0xff] }
0x49e9   :  { %v8416_v5 = vpop.eup %8415 }
0x49ea   :  { %v4179_v30 = vmul.f32 %v8416_v5, %v4080_v44 }
0x4a4d   :  { %v4182_v6 = vpop.permute.xlu0 %4181 }
0x4a4e   :  { %v4184_v15 = vmul.f32 %v8416_v5, %v4182_v6 }
0x4a50   :  { %4186 = vrot.lane.b32.xlu1 %v4184_v15, %s8982_s14  ;;  %v4470_v15 = vld [vmem:[%s10546_s13 + $0x48] sm:$0xff] }
0x4a51   :  { %v10042_v57 = vpack.c.bf16 %v4472_v17, %v4470_v15  ;;  %v4493_v15 = vld [vmem:[#allocation28] sm:$0xff] }
0x4ac2   :  { %v4187_v23 = vpop.permute.xlu1 %4186 }
0x4ac3   :  { %v9976_v24 = vadd.f32 %v4187_v23, %v4179_v30  ;;  %v4316_v30 = vrot.slane %v9741_v26, %v9367_v14  ;;  %v10075_v23 = vpack.c.bf16 %v4475_v21, %v4473_v55  ;;  %v4278_v26 = vrot.slane %v9721_v16, 2  ;;  %v4502_v55 = vld [vmem:[#allocation28 + $0x48] sm:$0xff]  ;;  %v4504_v21 = vld [vmem:[#allocation28 + $0x58] sm:$0xff] }
0x4ac5   :  { %8417 = vtanh.f32 %v9976_v24 }
0x4ac6   :  { %8419 = vtanh.f32 %v3420_v38 }
0x4ac7   :  { %8421 = vpow2.f32 %v6865_v47 }
0x4acf   :  { %v8418_v9 = vpop.eup %8417 }
0x4ad0   :  { %4192 = vrot.lane.b32.xlu0 %v8418_v9, %s8996_s16  ;;  %v8420_v43 = vpop.eup %8419 }
0x4ad1   :  { %v8422_v50 = vpop.eup %8421 }
0x4ad2   :  { %v3424_v41 = vadd.f32 1.0, %v8422_v50 }
0x4ad4   :  { %4305 = vrot.lane.b32.xlu0 %v9667_v51, %s8996_s16  ;;  %v4456_v51 = vpop.f32.mrb[36].mxu1  ;;  %8423 = vrcp.f32 %v3424_v41 }
0x4ad5   :  { %v4457_v10 = vadd.f32 %v4456_v51, %v4371_v49  ;;  %v4458_v44 = vpop.f32.mrb[37].mxu1 }
0x4ad6   :  { %v4459_v22 = vadd.f32 %v4458_v44, %v4375_v32 }
0x4ad7   :  { %v9997_v37 = vpack.c.bf16 %v4457_v10, %v4451_v36 }
0x4ad8   :  { %v10000_v40 = vpack.c.bf16 %v4459_v22, %v4453_v53 }
0x4ade   :  { %v10050_v62 = vpop.eup %8423 }
0x4adf   :  { %v3428_v34 = vmul.f32 %v10050_v62, %v9886_v35 }
0x4b42   :  { %v4193_v8 = vpop.permute.xlu0 %4192 }
0x4b43   :  { %v4195_v11 = vmul.f32 %v8416_v5, %v4193_v8  ;;  %v4467_v5 = vld [vmem:[%s10546_s13 + $0x30] sm:$0xff] }
0x4b44   :  { %v10038_v54 = vpack.c.bf16 %v4467_v5, %v4465_v63  ;;  %v4494_v5 = vld [vmem:[#allocation28 + $0x8] sm:$0xff] }
0x4b45   :  { %v4203_v28 = vrot.slane %v4195_v11, %v9367_v14 }
0x4b46   :  { %v4306_v7 = vpop.permute.xlu0 %4305 }
0x4b47   :  { %4204 = vrot.lane.b32.xlu1 %v4203_v28, %s8982_s14  ;;  %v4308_v39 = vsel %vm476_vm3, %v9756_v33, %v4306_v7  ;;  %v10129_v7 = vpack.c.bf16 %v4504_v21, %v4502_v55  ;;  %v4485_v21 = vld [vmem:[#allocation25 + $0x40] sm:$0xff] }
0x4b4b   :  { %3430 = vrot.lane.b32.xlu1 %v8420_v43, %s8996_s16 }
0x4bb9   :  { %v4205_v6 = vpop.permute.xlu1 %4204 }
0x4bba   :  { %7489 = vmatmul.mubr.msk.f32.vlgmr.msra.gmra.mrb[36].mxu0 %vm476_vm3, %v4205_v6  ;;  %v4496_v6 = vld [vmem:[#allocation28 + $0x18] sm:$0xff] }
0x4bbb   :  { %7809 = vmatpush1.bf16.msra.mxu0 %v10020_v59  ;;  %4611 = vmatprep.mubr.f32.mxu0 %v8993_v2  ;;  %v10118_v17 = vpack.c.bf16 %v4496_v6, %v4494_v5 }
0x4bbc   :  { %7811 = vmatprep.subr.bf16.mxu0 %v10022_v60 }
0x4bbd   :  { %v3431_v46 = vpop.permute.xlu1 %3430  ;;  %7827 = vmatprep.subr.bf16.mxu1 %v10118_v17 }
0x4bbe   :  { %v3433_v4 = vmul.f32 %v10050_v62, %v3431_v46  ;;  %v10120_v46 = vpack.c.bf16 %v4495_v61, %v4493_v15 }
0x4bbf   :  { %7813 = vmatpush1.bf16.msra.mxu0 %v10038_v54 }
0x4bc0   :  { %3435 = vrot.lane.b32.xlu1 %v3433_v4, %s8982_s14  ;;  %7815 = vmatprep.subr.bf16.mxu0 %v10042_v57  ;;  %v4499_v4 = vld [vmem:[#allocation28 + $0x30] sm:$0xff] }
0x4bc1   :  { %7829 = vmatpush1.bf16.msra.mxu1 %v10120_v46 }
0x4bc3   :  { %7817 = vmatpush1.bf16.msra.mxu0 %v10060_v12 }
0x4bc4   :  { %4317 = vrot.lane.b32.xlu1 %v4316_v30, %s8997_s0  ;;  %7819 = vmatprep.subr.bf16.mxu0 %v10064_v19  ;;  %v10126_v30 = vpack.c.bf16 %v4499_v4, %v4497_v20 }
0x4bc7   :  { %7821 = vmatpush1.bf16.msra.mxu0 %v10075_v23 }
0x4bc8   :  { %7823 = vmatprep.subr.bf16.mxu0 %v10000_v40 }
0x4bca   :  { %6885 = vmatmul.mubr.msk.f32.vlgmr.msra.gmra.mrb[38].mxu0 %vm4543_vm6, %v4308_v39  ;;  %v4501_v39 = vld [vmem:[#allocation28 + $0x40] sm:$0xff] }
0x4bcb   :  { %7825 = vmatpush1.bf16.msra.mxu0 %v9997_v37  ;;  %4685 = vmatprep.mubr.f32.mxu0 %v8993_v2 }
0x4bcc   :  { %7858 = vmatprep.subr.bf16.mxu0 %v8992_v1 }
0x4bd2   :  { %6886 = vmatmul.mubr.msk.f32.vlgmr.msra.gmra.mrb[38].mxu0 %vm338_vm1, %v6884_v48 }
0x4bd3   :  { %7507 = vmatprep.mubr.msk.f32.mxu0 %vm8995_vm0, %v8993_v2 }
0x4c32   :  { %v3436_v32 = vpop.permute.xlu1 %3435 }
0x4c33   :  { %v10096_v16 = vadd.f32 %v3436_v32, %v3428_v34  ;;  %v4478_v32 = vld [vmem:[#allocation25 + $0x8] sm:$0xff]  ;;  %v4480_v34 = vld [vmem:[#allocation25 + $0x18] sm:$0xff] }
0x4c36   :  { %v4318_v44 = vpop.permute.xlu1 %4317 }
0x4c37   :  { %v4320_v22 = vsel %vm476_vm3, %v4318_v44, %v9662_v42 }
0x4c8d   :  { %v4274_v9 = vpop.f32.mrb[36].mxu0 }
0x4c8e   :  { %v4280_v38 = vadd.f32 %v4278_v26, %v4274_v9  ;;  %v7490_v8 = vpop.f32.mrb[37].mxu0  ;;  %v4503_v26 = vld [vmem:[#allocation28 + $0x50] sm:$0xff]  ;;  %v4506_v9 = vld [vmem:[#allocation28 + $0x68] sm:$0xff] }
0x4c8f   :  { %v10132_v8 = vpack.c.bf16 %v4503_v26, %v4501_v39  ;;  %v4487_v39 = vld [vmem:[#allocation25 + $0x50] sm:$0xff] }
0x4c90   :  { %8425 = vtanh.f32 %v4280_v38  ;;  %v6880_v52 = vmul.f32 -1.442695, %v4280_v38  ;;  %v4508_v38 = vld [vmem:[#allocation28 + $0x78] sm:$0xff] }
0x4c92   :  { %8427 = vpow2.f32 %v6880_v52  ;;  %v4507_v52 = vld [vmem:[#allocation28 + $0x70] sm:$0xff] }
0x4c9a   :  { %v8426_v33 = vpop.eup %8425 }
0x4c9b   :  { %4290 = vrot.lane.b32.xlu0 %v8426_v33, %s8996_s16  ;;  %v10135_v33 = vpack.c.bf16 %v4508_v38, %v4506_v9  ;;  %v4490_v9 = vld [vmem:[#allocation25 + $0x68] sm:$0xff]  ;;  %v4492_v38 = vld [vmem:[#allocation25 + $0x78] sm:$0xff] }
0x4c9c   :  { %v8428_v28 = vpop.eup %8427 }
0x4c9d   :  { %v4284_v49 = vadd.f32 1.0, %v8428_v28 }
0x4c9f   :  { %8429 = vrcp.f32 %v4284_v49 }
0x4ca0   :  { %8431 = vtanh.f32 %v10096_v16 }
0x4ca5   :  { %v4687_v11 = vpop.f32.mrb[38].mxu0 }
0x4ca6   :  { %v10092_v27 = vpop.f32.mrb[39].mxu0  ;;  %v6887_v35 = vmul.f32 -1.442695, %v4687_v11  ;;  %v4505_v11 = vld [vmem:[#allocation28 + $0x60] sm:$0xff] }
0x4ca7   :  { %v10138_v28 = vpack.c.bf16 %v4507_v52, %v4505_v11  ;;  %v6888_v49 = vmul.f32 -1.442695, %v10092_v27  ;;  %v10173_v11 = vpack.c.bf16 %v4487_v39, %v4485_v21  ;;  %v10176_v52 = vpack.c.bf16 %v4492_v38, %v4490_v9 }
0x4ca8   :  { %8433 = vpow2.f32 %v6887_v35 }
0x4ca9   :  { %v10099_v36 = vpop.eup %8429 }
0x4caa   :  { %v8432_v10 = vpop.eup %8431  ;;  %v4288_v47 = vmul.f32 %v10099_v36, %v9976_v24 }
0x4cb2   :  { %v8434_v43 = vpop.eup %8433 }
0x4cb3   :  { %v4698_v48 = vadd.f32 1.0, %v8434_v43 }
0x4cb5   :  { %8435 = vrcp.f32 %v4698_v48 }
0x4cbf   :  { %v8436_v56 = vpop.eup %8435 }
0x4d0d   :  { %v4291_v53 = vpop.permute.xlu0 %4290 }
0x4d0e   :  { %v4293_v51 = vmul.f32 %v10099_v36, %v4291_v53  ;;  %v10143_v53 = vpack.c.bf16 %v4480_v34, %v4478_v32  ;;  %v4491_v32 = vld [vmem:[#allocation25 + $0x70] sm:$0xff] }
0x4d10   :  { %4295 = vrot.lane.b32.xlu0 %v4293_v51, %s8982_s14 }
0x4d14   :  { %3441 = vrot.lane.b32.xlu0 %v8432_v10, %s8996_s16 }
0x4d18   :  { %4706 = vrot.lane.b32.xlu0 %v4320_v22, %s8996_s16 }
0x4d82   :  { %v4296_v50 = vpop.permute.xlu0 %4295 }
0x4d83   :  { %v10109_v41 = vadd.f32 %v4296_v50, %v4288_v47 }
0x4d85   :  { %8437 = vtanh.f32 %v10109_v41 }
0x4d86   :  { %v3442_v25 = vpop.permute.xlu0 %3441  ;;  %8439 = vtanh.f32 %v10092_v27  ;;  %v4351_v27 = vrot.slane %v10096_v16, %v9367_v14  ;;  %v4483_v16 = vld [vmem:[#allocation25 + $0x30] sm:$0xff] }
0x4d87   :  { %v3444_v42 = vmul.f32 %v10050_v62, %v3442_v25  ;;  %v4500_v62 = vld [vmem:[#allocation28 + $0x38] sm:$0xff]  ;;  %8441 = vpow2.f32 %v6888_v49 }
0x4d88   :  { %v10122_v18 = vpack.c.bf16 %v4500_v62, %v4498_v13  ;;  %v4486_v13 = vld [vmem:[#allocation25 + $0x48] sm:$0xff]  ;;  %v4488_v62 = vld [vmem:[#allocation25 + $0x58] sm:$0xff]  ;;  %v4489_v49 = vld [vmem:[#allocation25 + $0x60] sm:$0xff] }
0x4d89   :  { %v4328_v0 = vrot.slane %v3444_v42, %v9367_v14  ;;  %v10167_v55 = vpack.c.bf16 %v4488_v62, %v4486_v13  ;;  %v10179_v34 = vpack.c.bf16 %v4491_v32, %v4489_v49  ;;  %v4528_v13 = vld [vmem:[%s10550_s17 + $0x38] sm:$0xff] }
0x4d8a   :  { %7831 = vmatprep.subr.bf16.mxu1 %v10122_v18  ;;  %v4707_v10 = vpop.permute.xlu0 %4706 }
0x4d8b   :  { %4329 = vrot.lane.b32.xlu0 %v4328_v0, %s8982_s14  ;;  %7833 = vmatpush1.bf16.msra.mxu1 %v10126_v30  ;;  %v4709_v43 = vmul.f32 %v8436_v56, %v4707_v10  ;;  %v4477_v0 = vld [vmem:[#allocation25] sm:$0xff] }
0x4d8c   :  { %7835 = vmatprep.subr.bf16.mxu1 %v10129_v7 }
0x4d8f   :  { %v8438_v58 = vpop.eup %8437  ;;  %7837 = vmatpush1.bf16.msra.mxu1 %v10132_v8 }
0x4d90   :  { %4301 = vrot.lane.b32.xlu1 %v8438_v58, %s8996_s16  ;;  %v8440_v24 = vpop.eup %8439  ;;  %7839 = vmatprep.subr.bf16.mxu1 %v10135_v33  ;;  %v4482_v58 = vld [vmem:[#allocation25 + $0x28] sm:$0xff] }
0x4d91   :  { %v4710_v63 = vmul.f32 %v8440_v24, %v8436_v56  ;;  %v8442_v51 = vpop.eup %8441  ;;  %v4479_v56 = vld [vmem:[#allocation25 + $0x10] sm:$0xff]  ;;  %v4484_v24 = vld [vmem:[#allocation25 + $0x38] sm:$0xff] }
0x4d92   :  { %v4699_v35 = vadd.f32 1.0, %v8442_v51  ;;  %v10158_v15 = vpack.c.bf16 %v4484_v24, %v4482_v58  ;;  %v4509_v51 = vld [vmem:[#allocation27] sm:$0x3]  ;;  %v4524_v24 = vld [vmem:[%s10550_s17 + $0x18] sm:$0xff] }
0x4d93   :  { %7841 = vmatpush1.bf16.msra.mxu1 %v10138_v28  ;;  %v10198_v10 = vrot.slane %v4509_v51, %v9393_v29  ;;  %v4521_v29 = vld [vmem:[%s10550_s17] sm:$0xff] }
0x4d94   :  { %4712 = vrot.lane.b32.xlu1 %v4710_v63, %s8996_s16  ;;  %7843 = vmatprep.subr.bf16.mxu1 %v10143_v53  ;;  %8443 = vrcp.f32 %v4699_v35  ;;  %v10156_v63 = vpack.c.bf16 %v4479_v56, %v4477_v0  ;;  %v4523_v56 = vld [vmem:[%s10550_s17 + $0x10] sm:$0xff] }
0x4d9e   :  { %v8444_v25 = vpop.eup %8443 }
0x4dfd   :  { %v4330_v5 = vpop.permute.xlu0 %4329 }
0x4e02   :  { %v4302_v44 = vpop.permute.xlu1 %4301 }
0x4e03   :  { %v4304_v22 = vmul.f32 %v10099_v36, %v4302_v44 }
0x4e05   :  { %v4339_v48 = vrot.slane %v4304_v22, %v9367_v14  ;;  %v4481_v14 = vld [vmem:[#allocation25 + $0x20] sm:$0xff] }
0x4e06   :  { %v4713_v47 = vpop.permute.xlu1 %4712  ;;  %v10163_v20 = vpack.c.bf16 %v4483_v16, %v4481_v14  ;;  %v4526_v14 = vld [vmem:[%s10550_s17 + $0x28] sm:$0xff] }
0x4e07   :  { %v10148_v50 = vadd.f32 %v4713_v47, %v4709_v43  ;;  %4340 = vrot.lane.b32.xlu1 %v4339_v48, %s8996_s16  ;;  %v10202_v48 = vrot.slane %v4509_v51, %v9395_v31  ;;  %v4522_v31 = vld [vmem:[%s10550_s17 + $0x8] sm:$0xff] }
0x4e08   :  { %v10215_v58 = vpack.c.bf16 %v4522_v31, %v4521_v29 }
0x4e09   :  { %8445 = vtanh.f32 %v10148_v50 }
0x4e0a   :  { %7860 = vmatpush3.bf16.msra.mxu0 %v10215_v58 }
0x4e0b   :  { %4352 = vrot.lane.b32.xlu1 %v4351_v27, %s8997_s0  ;;  %7861 = vmatprep.subr.bf16.mxu0 %v8992_v1 }
0x4e13   :  { %v8446_v42 = vpop.eup %8445 }
0x4e14   :  { %v4717_v36 = vmul.f32 %v8446_v42, %v8444_v25 }
0x4e16   :  { %4793 = vrot.lane.b32.xlu0 %v4717_v36, %s8996_s16 }
0x4e79   :  { %v4341_v6 = vpop.permute.xlu1 %4340 }
0x4e7a   :  { %v4343_v61 = vsel %vm476_vm3, %v4330_v5, %v4341_v6  ;;  %v10221_v5 = vpack.c.bf16 %v4524_v24, %v4523_v56  ;;  %v4525_v6 = vld [vmem:[%s10550_s17 + $0x20] sm:$0xff] }
0x4e7b   :  { %6889 = vmatmul.mubr.msk.f32.vlgmr.msra.gmra.mrb[38].mxu1 %vm4543_vm6, %v4343_v61  ;;  %v10231_v16 = vpack.c.bf16 %v4526_v14, %v4525_v6  ;;  %v4527_v61 = vld [vmem:[%s10550_s17 + $0x30] sm:$0xff] }
0x4e7c   :  { %7845 = vmatpush1.bf16.msra.mxu1 %v10156_v63  ;;  %4861 = vmatprep.mubr.f32.mxu1 %v8993_v2  ;;  %v10241_v62 = vpack.c.bf16 %v4528_v13, %v4527_v61 }
0x4e7d   :  { %v4353_v4 = vpop.permute.xlu1 %4352  ;;  %7847 = vmatprep.subr.bf16.mxu1 %v10158_v15  ;;  %7863 = vmatpush3.bf16.msra.mxu0 %v10221_v5 }
0x4e7e   :  { %v4355_v26 = vsel %vm476_vm3, %v4353_v4, %v10109_v41  ;;  %7864 = vmatprep.subr.bf16.mxu0 %v8992_v1 }
0x4e7f   :  { %4884 = vrot.lane.b32.xlu0 %v4355_v26, %s8996_s16 }
0x4e80   :  { %7849 = vmatpush1.bf16.msra.mxu1 %v10163_v20 }
0x4e81   :  { %7851 = vmatprep.subr.bf16.mxu1 %v10167_v55  ;;  %7866 = vmatpush3.bf16.msra.mxu0 %v10231_v16 }
0x4e82   :  { %7867 = vmatprep.subr.bf16.mxu0 %v8992_v1 }
0x4e84   :  { %7853 = vmatpush1.bf16.msra.mxu1 %v10173_v11 }
0x4e85   :  { %7855 = vmatprep.subr.bf16.mxu1 %v10176_v52  ;;  %7869 = vmatpush3.bf16.msra.mxu0 %v10241_v62 }
0x4e86   :  { %7871 = vmatprep.subr.bf16.mxu0 %v9985_v45 }
0x4e88   :  { %7857 = vmatpush1.bf16.msra.mxu1 %v10179_v34  ;;  %v10183_v41 = vpop.permute.xlu0 %4793 }
0x4e89   :  { %7891 = vmatprep.subr.bf16.mxu1 %v10118_v17 }
0x4e8b   :  { %6890 = vmatmul.mubr.msk.f32.vlgmr.msra.gmra.mrb[38].mxu1 %vm4543_vm6, %v10183_v41 }
0x4e8c   :  { %7893 = vmatpush1.bf16.msra.mxu1 %v10120_v46  ;;  %5240 = vmatprep.mubr.f32.mxu1 %v8993_v2 }
0x4e8d   :  { %7895 = vmatprep.subr.bf16.mxu1 %v10122_v18 }
0x4e90   :  { %7897 = vmatpush1.bf16.msra.mxu1 %v10126_v30 }
0x4e91   :  { %7899 = vmatprep.subr.bf16.mxu1 %v10129_v7 }
0x4e94   :  { %7901 = vmatpush1.bf16.msra.mxu1 %v10132_v8 }
0x4e95   :  { %7903 = vmatprep.subr.bf16.mxu1 %v10135_v33 }
0x4e98   :  { %7905 = vmatpush1.bf16.msra.mxu1 %v10138_v28 }
0x4e99   :  { %7907 = vmatprep.subr.bf16.mxu1 %v10143_v53 }
0x4ef1   :  { %v4885_v39 = vpop.permute.xlu0 %4884 }
0x4f5e   :  { %v4863_v44 = vpop.f32.mrb[38].mxu1 }
0x4f5f   :  { %v4868_v22 = vadd.f32 %v4863_v44, %v10198_v10  ;;  %v4865_v35 = vpop.f32.mrb[39].mxu1 }
0x4f60   :  { %v4869_v47 = vadd.f32 %v4865_v35, %v10202_v48  ;;  %v10278_v35 = vld [vmem:[%s10575_s10] ss:$0 sm:$0xff] }
0x4f61   :  { %v6891_v43 = vmul.f32 -1.442695, %v4868_v22 }
0x4f62   :  { %v6892_v4 = vmul.f32 -1.442695, %v4869_v47 }
0x4f63   :  { %8447 = vpow2.f32 %v6891_v43 }
0x4f64   :  { %8449 = vtanh.f32 %v4869_v47 }
0x4f6d   :  { %v8448_v27 = vpop.eup %8447 }
0x4f6e   :  { %v4876_v25 = vadd.f32 1.0, %v8448_v27  ;;  %v8450_v42 = vpop.eup %8449 }
0x4f70   :  { %8451 = vrcp.f32 %v4876_v25 }
0x4f71   :  { %8453 = vpow2.f32 %v6892_v4 }
0x4f7a   :  { %v8452_v36 = vpop.eup %8451 }
0x4f7b   :  { %v4888_v0 = vmul.f32 %v8452_v36, %v8450_v42  ;;  %v8454_v21 = vpop.eup %8453  ;;  %v4887_v9 = vmul.f32 %v8452_v36, %v4885_v39 }
0x4f7c   :  { %v4877_v26 = vadd.f32 1.0, %v8454_v21 }
0x4f7d   :  { %4890 = vrot.lane.b32.xlu1 %v4888_v0, %s8996_s16 }
0x4f7e   :  { %8455 = vrcp.f32 %v4877_v26 }
0x4f88   :  { %v8456_v32 = vpop.eup %8455 }
0x4fef   :  { %v4891_v38 = vpop.permute.xlu1 %4890 }
0x4ff0   :  { %v10246_v49 = vadd.f32 %v4891_v38, %v4887_v9 }
0x4ff2   :  { %8457 = vtanh.f32 %v10246_v49 }
0x4ffc   :  { %v8458_v51 = vpop.eup %8457 }
0x4ffd   :  { %v4895_v44 = vmul.f32 %v8458_v51, %v8456_v32 }
0x4fff   :  { %4897 = vrot.lane.b32.xlu0 %v4895_v44, %s8996_s16 }
0x5071   :  { %v4898_v22 = vpop.permute.xlu0 %4897 }
0x5072   :  { %7508 = vmatmul.mubr.msk.f32.vlgmr.msra.gmra.mrb[40].mxu0 %vm4543_vm6, %v4898_v22  ;;  %6899 = vmatmul.mubr.msk.f32.vlgmr.msra.gmra.mrb[40].mxu1 %vm4543_vm6, %v4898_v22 }
0x5073   :  { %7873 = vmatpush1.bf16.msra.mxu0 %v10020_v59  ;;  %5073 = vmatprep.mubr.f32.mxu0 %v8993_v2 }
0x5074   :  { %7875 = vmatprep.subr.bf16.mxu0 %v10022_v60  ;;  %7909 = vmatpush1.bf16.msra.mxu1 %v10156_v63 }
0x5075   :  { %7911 = vmatprep.subr.bf16.mxu1 %v10158_v15  ;;  %5316 = vmatprep.mubr.f32.mxu1 %v8993_v2 }
0x5077   :  { %7877 = vmatpush1.bf16.msra.mxu0 %v10038_v54 }
0x5078   :  { %7879 = vmatprep.subr.bf16.mxu0 %v10042_v57  ;;  %7913 = vmatpush1.bf16.msra.mxu1 %v10163_v20 }
0x5079   :  { %7915 = vmatprep.subr.bf16.mxu1 %v10167_v55 }
0x507b   :  { %7881 = vmatpush1.bf16.msra.mxu0 %v10060_v12 }
0x507c   :  { %7883 = vmatprep.subr.bf16.mxu0 %v10064_v19  ;;  %7917 = vmatpush1.bf16.msra.mxu1 %v10173_v11 }
0x507d   :  { %7919 = vmatprep.subr.bf16.mxu1 %v10176_v52 }
0x507f   :  { %7885 = vmatpush1.bf16.msra.mxu0 %v10075_v23 }
0x5080   :  { %7887 = vmatprep.subr.bf16.mxu0 %v10000_v40  ;;  %7921 = vmatpush1.bf16.msra.mxu1 %v10179_v34 }
0x5081   :  { %7935 = vmatprep.subr.bf16.mxu1 %v9985_v45 }
0x5082   :  { %6895 = vmatmul.mubr.msk.f32.vlgmr.msra.gmra.mrb[42].mxu0 %vm4543_vm6, %v10183_v41 }
0x5083   :  { %7889 = vmatpush1.bf16.msra.mxu0 %v9997_v37  ;;  %5147 = vmatprep.mubr.f32.mxu0 %v8993_v2 }
0x5084   :  { %7922 = vmatprep.subr.bf16.mxu0 %v8992_v1 }
0x5145   :  { %v4967_v43 = vpop.f32.mrb[40].mxu0 }
0x5146   :  { %v4968_v47 = vadd.f32 %v10278_v35, %v4967_v43  ;;  %v7509_v27 = vpop.f32.mrb[41].mxu0 }
0x5148   :  { %v4971_v25 = vsel %vm4541_vm5, %v4968_v47, -inf }
0x5149   :  { %4972 = vmax.xlane.f32.xlu1 %v4971_v25 }
0x51d6   :  { %v4973_v42 = vpop.xlane.xlu1 %4972 }
0x51d7   :  { %v4974_v41 = vsub.f32 %v4968_v47, %v4973_v42 }
0x51d9   :  { %v4975_v36 = vmul.f32 1.442695, %v4974_v41 }
0x51db   :  { %8459 = vpow2.f32 %v4975_v36 }
0x51e5   :  { %v8460_v0 = vpop.eup %8459 }
0x51e6   :  { %v4977_v29 = vsel %vm4541_vm5, %v8460_v0, 0.0 }
0x51e7   :  { %4978 = vadd.xlane.f32.xlu0 %v4977_v29 }
0x5274   :  { %v4979_v31 = vpop.xlane.xlu0 %4978 }
0x5275   :  { %8461 = vlog2.f32 %v4979_v31 }
0x527f   :  { %v8462_v56 = vpop.eup %8461 }
0x5280   :  { %v4981_v24 = vmul.f32 0.6931472, %v8462_v56 }
0x5282   :  { %v4982_v6 = vadd.f32 %v4981_v24, %v4973_v42 }
0x5284   :  { %v4983_v14 = vsub.f32 %v4968_v47, %v4982_v6 }
0x5286   :  { %v4986_v61 = vsel %vm4541_vm5, %v4983_v14, -inf  ;;  %4985 = vst.msk [vmem:[#allocation30 + $0x2] sm:$0x3] %vm4541_vm5, %v4983_v14 }
0x5287   :  { %4987 = vmax.xlane.f32.xlu0 %v4986_v61 }
0x5314   :  { %v4988_v13 = vpop.xlane.xlu0 %4987 }
0x5315   :  { %vm4989_vm7 = vcmp.eq.f32.partialorder %v4983_v14, %v4988_v13 }
0x5316   :  { %v4990_v4 = vsel %vm4989_vm7, %v10003_v3, 16 }
0x5317   :  { %v4991_v21 = vsel %vm4541_vm5, %v4990_v4, 2147483647 }
0x5318   :  { %v4993_v39 = vshra.s32 %v4991_v21, 16  ;;  %v4992_v9 = vand.u32 65535, %v4991_v21 }
0x531a   :  { %v4995_v26 = vcvt.s32.f32 %v4993_v39  ;;  %v4994_v32 = vcvt.s32.f32 %v4992_v9 }
0x531c   :  { %4996 = vmin.xlane.f32.xlu1 %v4995_v26 }
0x53a9   :  { %v4997_v38 = vpop.xlane.xlu1 %4996 }
0x53aa   :  { %vm4998_vm8 = vcmp.eq.f32.partialorder %v4995_v26, %v4997_v38  ;;  %v5003_v44 = vcvt.f32.s32 %v4997_v38 }
0x53ab   :  { %v4999_v51 = vsel %vm4998_vm8, %v4994_v32, inf }
0x53ac   :  { %5000 = vmin.xlane.f32.xlu0 %v4999_v51  ;;  %v5004_v43 = vshll.u32 %v5003_v44, 16 }
0x5439   :  { %v5001_v22 = vpop.xlane.xlu0 %5000 }
0x543a   :  { %v5002_v47 = vcvt.f32.s32 %v5001_v22 }
0x543c   :  { %v5005_v27 = vadd.s32 %v5004_v43, %v5002_v47 }
0x543e   :  { %vm5006_vm9 = vcmp.eq.s32.totalorder %v10003_v3, %v5005_v27 }
0x543f   :  { %v6894_v25 = vsel %vm5006_vm9, 1.0, %v8993_v2 }
0x5440   :  { %6896 = vmatmul.mubr.msk.f32.vlgmr.msra.gmra.mrb[42].mxu0 %vm338_vm1, %v6894_v25 }
0x5441   :  { %7924 = vmatpush3.bf16.msra.mxu0 %v10215_v58  ;;  %7526 = vmatprep.mubr.msk.f32.mxu0 %vm8995_vm0, %v8993_v2 }
0x5442   :  { %7925 = vmatprep.subr.bf16.mxu0 %v8992_v1 }
0x5445   :  { %7927 = vmatpush3.bf16.msra.mxu0 %v10221_v5 }
0x5446   :  { %7928 = vmatprep.subr.bf16.mxu0 %v8992_v1 }
0x5449   :  { %7930 = vmatpush3.bf16.msra.mxu0 %v10231_v16 }
0x544a   :  { %7931 = vmatprep.subr.bf16.mxu0 %v8992_v1 }
0x544d   :  { %7933 = vmatpush3.bf16.msra.mxu0 %v10241_v62 }
0x544e   :  { %7955 = vmatprep.subr.bf16.mxu0 %v10118_v17 }
0x5513   :  { %v5149_v42 = vpop.f32.mrb[42].mxu0 }
0x5514   :  { %v6897_v41 = vmul.f32 -1.442695, %v5149_v42  ;;  %v5151_v36 = vpop.f32.mrb[43].mxu0 }
0x5515   :  { %v6898_v6 = vmul.f32 -1.442695, %v5151_v36 }
0x5516   :  { %8463 = vpow2.f32 %v6897_v41 }
0x5517   :  { %8465 = vtanh.f32 %v5151_v36 }
0x5520   :  { %v8464_v0 = vpop.eup %8463 }
0x5521   :  { %v5160_v29 = vadd.f32 1.0, %v8464_v0  ;;  %v8466_v31 = vpop.eup %8465 }
0x5523   :  { %8467 = vrcp.f32 %v5160_v29 }
0x5524   :  { %8469 = vpow2.f32 %v6898_v6 }
0x552d   :  { %v8468_v56 = vpop.eup %8467 }
0x552e   :  { %v5168_v24 = vmul.f32 %v8468_v56, %v8466_v31  ;;  %v8470_v14 = vpop.eup %8469  ;;  %v5167_v13 = vmul.f32 %v8468_v56, %v10148_v50 }
0x552f   :  { %v5161_v61 = vadd.f32 1.0, %v8470_v14 }
0x5530   :  { %5170 = vrot.lane.b32.xlu1 %v5168_v24, %s8996_s16 }
0x5531   :  { %8471 = vrcp.f32 %v5161_v61 }
0x553b   :  { %v8472_v39 = vpop.eup %8471 }
0x55a2   :  { %v5171_v4 = vpop.permute.xlu1 %5170 }
0x55a3   :  { %v10302_v21 = vadd.f32 %v5171_v4, %v5167_v13 }
0x55a5   :  { %8473 = vtanh.f32 %v10302_v21 }
0x55af   :  { %v8474_v26 = vpop.eup %8473 }
0x55b0   :  { %v5175_v9 = vmul.f32 %v8474_v26, %v8472_v39 }
0x55b2   :  { %5248 = vrot.lane.b32.xlu0 %v5175_v9, %s8996_s16 }
0x5624   :  { %v5249_v38 = vpop.permute.xlu0 %5248 }
0x5625   :  { %6900 = vmatmul.mubr.msk.f32.vlgmr.msra.gmra.mrb[40].mxu1 %vm4543_vm6, %v5249_v38 }
0x5626   :  { %7937 = vmatpush1.bf16.msra.mxu1 %v10020_v59  ;;  %5524 = vmatprep.mubr.f32.mxu1 %v8993_v2 }
0x5627   :  { %7939 = vmatprep.subr.bf16.mxu1 %v10022_v60 }
0x562a   :  { %7941 = vmatpush1.bf16.msra.mxu1 %v10038_v54 }
0x562b   :  { %7943 = vmatprep.subr.bf16.mxu1 %v10042_v57 }
0x562e   :  { %7945 = vmatpush1.bf16.msra.mxu1 %v10060_v12 }
0x562f   :  { %7947 = vmatprep.subr.bf16.mxu1 %v10064_v19 }
0x5632   :  { %7949 = vmatpush1.bf16.msra.mxu1 %v10075_v23 }
0x5633   :  { %7951 = vmatprep.subr.bf16.mxu1 %v10000_v40 }
0x5635   :  { %6905 = vmatmul.mubr.msk.f32.vlgmr.msra.gmra.mrb[42].mxu1 %vm4543_vm6, %v5249_v38 }
0x5636   :  { %7953 = vmatpush1.bf16.msra.mxu1 %v9997_v37  ;;  %5598 = vmatprep.mubr.f32.mxu1 %v8993_v2 }
0x5637   :  { %7986 = vmatprep.subr.bf16.mxu1 %v8992_v1 }
0x56f8   :  { %v5318_v50 = vpop.f32.mrb[40].mxu1 }
0x56f9   :  { %v5323_v32 = vadd.f32 %v5318_v50, %v10198_v10  ;;  %v5320_v51 = vpop.f32.mrb[41].mxu1 }
0x56fa   :  { %v5324_v22 = vadd.f32 %v5320_v51, %v10202_v48 }
0x56fb   :  { %v6901_v44 = vmul.f32 -1.442695, %v5323_v32 }
0x56fc   :  { %v6902_v41 = vmul.f32 -1.442695, %v5324_v22 }
0x56fd   :  { %8475 = vpow2.f32 %v6901_v44 }
0x56fe   :  { %8477 = vtanh.f32 %v5324_v22 }
0x5707   :  { %v8476_v43 = vpop.eup %8475 }
0x5708   :  { %v5331_v47 = vadd.f32 1.0, %v8476_v43  ;;  %v8478_v27 = vpop.eup %8477 }
0x570a   :  { %8479 = vrcp.f32 %v5331_v47 }
0x570b   :  { %8481 = vpow2.f32 %v6902_v41 }
0x5714   :  { %v8480_v25 = vpop.eup %8479 }
0x5715   :  { %v5339_v42 = vmul.f32 %v8480_v25, %v8478_v27  ;;  %v8482_v36 = vpop.eup %8481  ;;  %v5338_v29 = vmul.f32 %v8480_v25, %v10246_v49 }
0x5716   :  { %v5332_v0 = vadd.f32 1.0, %v8482_v36 }
0x5717   :  { %5341 = vrot.lane.b32.xlu1 %v5339_v42, %s8996_s16 }
0x5718   :  { %8483 = vrcp.f32 %v5332_v0 }
0x5722   :  { %v8484_v24 = vpop.eup %8483 }
0x5789   :  { %v5342_v31 = vpop.permute.xlu1 %5341 }
0x578a   :  { %v10324_v56 = vadd.f32 %v5342_v31, %v5338_v29 }
0x578c   :  { %8485 = vtanh.f32 %v10324_v56 }
0x5796   :  { %v8486_v6 = vpop.eup %8485 }
0x5797   :  { %v5346_v14 = vmul.f32 %v8486_v6, %v8484_v24 }
0x5799   :  { %5348 = vrot.lane.b32.xlu1 %v5346_v14, %s8996_s16 }
0x580b   :  { %v5349_v61 = vpop.permute.xlu1 %5348 }
0x580c   :  { %7527 = vmatmul.mubr.msk.f32.vlgmr.msra.gmra.mrb[44].mxu0 %vm4543_vm6, %v5349_v61 }
0x580d   :  { %7957 = vmatpush1.bf16.msra.mxu0 %v10120_v46  ;;  %5691 = vmatprep.mubr.f32.mxu0 %v8993_v2 }
0x580e   :  { %7959 = vmatprep.subr.bf16.mxu0 %v10122_v18 }
0x5811   :  { %7961 = vmatpush1.bf16.msra.mxu0 %v10126_v30 }
0x5812   :  { %7963 = vmatprep.subr.bf16.mxu0 %v10129_v7 }
0x5815   :  { %7965 = vmatpush1.bf16.msra.mxu0 %v10132_v8 }
0x5816   :  { %7967 = vmatprep.subr.bf16.mxu0 %v10135_v33 }
0x5819   :  { %7969 = vmatpush1.bf16.msra.mxu0 %v10138_v28 }
0x581a   :  { %7971 = vmatprep.subr.bf16.mxu0 %v10143_v53 }
0x581c   :  { %6909 = vmatmul.mubr.msk.f32.vlgmr.msra.gmra.mrb[46].mxu0 %vm4543_vm6, %v5349_v61 }
0x581d   :  { %7973 = vmatpush1.bf16.msra.mxu0 %v10156_v63  ;;  %5767 = vmatprep.mubr.f32.mxu0 %v8993_v2 }
0x581e   :  { %7975 = vmatprep.subr.bf16.mxu0 %v10158_v15 }
0x5821   :  { %7977 = vmatpush1.bf16.msra.mxu0 %v10163_v20 }
0x5822   :  { %7979 = vmatprep.subr.bf16.mxu0 %v10167_v55 }
0x5825   :  { %7981 = vmatpush1.bf16.msra.mxu0 %v10173_v11 }
0x5826   :  { %7983 = vmatprep.subr.bf16.mxu0 %v10176_v52 }
0x5829   :  { %7985 = vmatpush1.bf16.msra.mxu0 %v10179_v34 }
0x582a   :  { %7999 = vmatprep.subr.bf16.mxu0 %v9985_v45 }
0x58df   :  { %v5418_v49 = vpop.f32.mrb[44].mxu0 }
0x58e0   :  { %v5419_v13 = vadd.f32 %v10278_v35, %v5418_v49  ;;  %v7528_v4 = vpop.f32.mrb[45].mxu0 }
0x58e2   :  { %v5422_v39 = vsel %vm4541_vm5, %v5419_v13, -inf }
0x58e3   :  { %5423 = vmax.xlane.f32.xlu0 %v5422_v39 }
0x5970   :  { %v5424_v26 = vpop.xlane.xlu0 %5423 }
0x5971   :  { %v5425_v9 = vsub.f32 %v5419_v13, %v5424_v26 }
0x5973   :  { %v5426_v38 = vmul.f32 1.442695, %v5425_v9 }
0x5975   :  { %8487 = vpow2.f32 %v5426_v38 }
0x597f   :  { %v8488_v50 = vpop.eup %8487 }
0x5980   :  { %v5428_v32 = vsel %vm4541_vm5, %v8488_v50, 0.0 }
0x5981   :  { %5429 = vadd.xlane.f32.xlu1 %v5428_v32 }
0x5a0e   :  { %v5430_v51 = vpop.xlane.xlu1 %5429 }
0x5a0f   :  { %8489 = vlog2.f32 %v5430_v51 }
0x5a19   :  { %v8490_v44 = vpop.eup %8489 }
0x5a1a   :  { %v5432_v22 = vmul.f32 0.6931472, %v8490_v44 }
0x5a1c   :  { %v5433_v43 = vadd.f32 %v5432_v22, %v5424_v26 }
0x5a1e   :  { %v5434_v47 = vsub.f32 %v5419_v13, %v5433_v43 }
0x5a20   :  { %v5437_v27 = vsel %vm4541_vm5, %v5434_v47, -inf  ;;  %5436 = vst.msk [vmem:[#allocation30 + $0x4] sm:$0x3] %vm4541_vm5, %v5434_v47 }
0x5a21   :  { %5438 = vmax.xlane.f32.xlu0 %v5437_v27 }
0x5aae   :  { %v5439_v25 = vpop.xlane.xlu0 %5438 }
0x5aaf   :  { %vm5440_vm10 = vcmp.eq.f32.partialorder %v5434_v47, %v5439_v25 }
0x5ab0   :  { %v5441_v42 = vsel %vm5440_vm10, %v10003_v3, 16 }
0x5ab1   :  { %v5442_v41 = vsel %vm4541_vm5, %v5441_v42, 2147483647 }
0x5ab2   :  { %v5444_v36 = vshra.s32 %v5442_v41, 16  ;;  %v5443_v29 = vand.u32 65535, %v5442_v41 }
0x5ab4   :  { %v5446_v0 = vcvt.s32.f32 %v5444_v36  ;;  %v5445_v24 = vcvt.s32.f32 %v5443_v29 }
0x5ab6   :  { %5447 = vmin.xlane.f32.xlu0 %v5446_v0 }
0x5b43   :  { %v5448_v31 = vpop.xlane.xlu0 %5447 }
0x5b44   :  { %vm5449_vm11 = vcmp.eq.f32.partialorder %v5446_v0, %v5448_v31  ;;  %v5454_v14 = vcvt.f32.s32 %v5448_v31 }
0x5b45   :  { %v5450_v6 = vsel %vm5449_vm11, %v5445_v24, inf }
0x5b46   :  { %5451 = vmin.xlane.f32.xlu1 %v5450_v6  ;;  %v5455_v49 = vshll.u32 %v5454_v14, 16 }
0x5bd3   :  { %v5452_v61 = vpop.xlane.xlu1 %5451 }
0x5bd4   :  { %v5453_v13 = vcvt.f32.s32 %v5452_v61 }
0x5bd6   :  { %v5456_v4 = vadd.s32 %v5455_v49, %v5453_v13 }
0x5bd8   :  { %vm5457_vm12 = vcmp.eq.s32.totalorder %v10003_v3, %v5456_v4 }
0x5bd9   :  { %v6904_v39 = vsel %vm5457_vm12, 1.0, %v8993_v2 }
0x5bda   :  { %6906 = vmatmul.mubr.msk.f32.vlgmr.msra.gmra.mrb[42].mxu1 %vm338_vm1, %v6904_v39 }
0x5bdb   :  { %7988 = vmatpush3.bf16.msra.mxu1 %v10215_v58  ;;  %7545 = vmatprep.mubr.msk.f32.mxu1 %vm8995_vm0, %v8993_v2 }
0x5bdc   :  { %7989 = vmatprep.subr.bf16.mxu1 %v8992_v1 }
0x5bdf   :  { %7991 = vmatpush3.bf16.msra.mxu1 %v10221_v5 }
0x5be0   :  { %7992 = vmatprep.subr.bf16.mxu1 %v8992_v1 }
0x5be3   :  { %7994 = vmatpush3.bf16.msra.mxu1 %v10231_v16 }
0x5be4   :  { %7995 = vmatprep.subr.bf16.mxu1 %v8992_v1 }
0x5be7   :  { %7997 = vmatpush3.bf16.msra.mxu1 %v10241_v62 }
0x5be8   :  { %8019 = vmatprep.subr.bf16.mxu1 %v10118_v17 }
0x5cad   :  { %v5600_v26 = vpop.f32.mrb[42].mxu1 }
0x5cae   :  { %v6907_v9 = vmul.f32 -1.442695, %v5600_v26  ;;  %v5602_v38 = vpop.f32.mrb[43].mxu1 }
0x5caf   :  { %v6908_v43 = vmul.f32 -1.442695, %v5602_v38 }
0x5cb0   :  { %8491 = vpow2.f32 %v6907_v9 }
0x5cb1   :  { %8493 = vtanh.f32 %v5602_v38 }
0x5cba   :  { %v8492_v50 = vpop.eup %8491 }
0x5cbb   :  { %v5611_v32 = vadd.f32 1.0, %v8492_v50  ;;  %v8494_v51 = vpop.eup %8493 }
0x5cbd   :  { %8495 = vrcp.f32 %v5611_v32 }
0x5cbe   :  { %8497 = vpow2.f32 %v6908_v43 }
0x5cc7   :  { %v8496_v44 = vpop.eup %8495 }
0x5cc8   :  { %v5619_v22 = vmul.f32 %v8496_v44, %v8494_v51  ;;  %v8498_v47 = vpop.eup %8497  ;;  %v5618_v25 = vmul.f32 %v8496_v44, %v10302_v21 }
0x5cc9   :  { %v5612_v27 = vadd.f32 1.0, %v8498_v47 }
0x5cca   :  { %5621 = vrot.lane.b32.xlu0 %v5619_v22, %s8996_s16 }
0x5ccb   :  { %8499 = vrcp.f32 %v5612_v27 }
0x5cd5   :  { %v8500_v36 = vpop.eup %8499 }
0x5d3c   :  { %v5622_v42 = vpop.permute.xlu0 %5621 }
0x5d3d   :  { %v10370_v41 = vadd.f32 %v5622_v42, %v5618_v25 }
0x5d3f   :  { %8501 = vtanh.f32 %v10370_v41 }
0x5d49   :  { %v8502_v0 = vpop.eup %8501 }
0x5d4a   :  { %v5626_v29 = vmul.f32 %v8502_v0, %v8500_v36 }
0x5d4c   :  { %5699 = vrot.lane.b32.xlu1 %v5626_v29, %s8996_s16 }
0x5dbe   :  { %v5700_v31 = vpop.permute.xlu1 %5699 }
0x5dbf   :  { %6910 = vmatmul.mubr.msk.f32.vlgmr.msra.gmra.mrb[46].mxu0 %vm4543_vm6, %v5700_v31 }
0x5dc0   :  { %8001 = vmatpush1.bf16.msra.mxu0 %v10020_v59  ;;  %5975 = vmatprep.mubr.f32.mxu0 %v8993_v2 }
0x5dc1   :  { %8003 = vmatprep.subr.bf16.mxu0 %v10022_v60 }
0x5dc4   :  { %8005 = vmatpush1.bf16.msra.mxu0 %v10038_v54 }
0x5dc5   :  { %8007 = vmatprep.subr.bf16.mxu0 %v10042_v57 }
0x5dc8   :  { %8009 = vmatpush1.bf16.msra.mxu0 %v10060_v12 }
0x5dc9   :  { %8011 = vmatprep.subr.bf16.mxu0 %v10064_v19 }
0x5dcc   :  { %8013 = vmatpush1.bf16.msra.mxu0 %v10075_v23 }
0x5dcd   :  { %8015 = vmatprep.subr.bf16.mxu0 %v10000_v40 }
0x5dcf   :  { %6915 = vmatmul.mubr.msk.f32.vlgmr.msra.gmra.mrb[48].mxu0 %vm4543_vm6, %v5700_v31 }
0x5dd0   :  { %8017 = vmatpush1.bf16.msra.mxu0 %v9997_v37  ;;  %6049 = vmatprep.mubr.f32.mxu0 %v8993_v2 }
0x5dd1   :  { %8050 = vmatprep.subr.bf16.mxu0 %v8992_v1 }
0x5e92   :  { %v5769_v21 = vpop.f32.mrb[46].mxu0 }
0x5e93   :  { %v5774_v24 = vadd.f32 %v5769_v21, %v10198_v10  ;;  %v5771_v6 = vpop.f32.mrb[47].mxu0 }
0x5e94   :  { %v5775_v61 = vadd.f32 %v5771_v6, %v10202_v48 }
0x5e95   :  { %v6911_v14 = vmul.f32 -1.442695, %v5774_v24 }
0x5e96   :  { %v6912_v9 = vmul.f32 -1.442695, %v5775_v61 }
0x5e97   :  { %8503 = vpow2.f32 %v6911_v14 }
0x5e98   :  { %8505 = vtanh.f32 %v5775_v61 }
0x5ea1   :  { %v8504_v49 = vpop.eup %8503 }
0x5ea2   :  { %v5782_v13 = vadd.f32 1.0, %v8504_v49  ;;  %v8506_v4 = vpop.eup %8505 }
0x5ea4   :  { %8507 = vrcp.f32 %v5782_v13 }
0x5ea5   :  { %8509 = vpow2.f32 %v6912_v9 }
0x5eae   :  { %v8508_v39 = vpop.eup %8507 }
0x5eaf   :  { %v5790_v26 = vmul.f32 %v8508_v39, %v8506_v4  ;;  %v8510_v38 = vpop.eup %8509  ;;  %v5789_v32 = vmul.f32 %v8508_v39, %v10324_v56 }
0x5eb0   :  { %v5783_v50 = vadd.f32 1.0, %v8510_v38 }
0x5eb1   :  { %5792 = vrot.lane.b32.xlu1 %v5790_v26, %s8996_s16 }
0x5eb2   :  { %8511 = vrcp.f32 %v5783_v50 }
0x5ebc   :  { %v8512_v22 = vpop.eup %8511 }
0x5f23   :  { %v5793_v51 = vpop.permute.xlu1 %5792 }
0x5f24   :  { %v10392_v44 = vadd.f32 %v5793_v51, %v5789_v32 }
0x5f26   :  { %8513 = vtanh.f32 %v10392_v44 }
0x5f30   :  { %v8514_v43 = vpop.eup %8513 }
0x5f31   :  { %v5797_v47 = vmul.f32 %v8514_v43, %v8512_v22 }
0x5f33   :  { %5799 = vrot.lane.b32.xlu0 %v5797_v47, %s8996_s16 }
0x5fa5   :  { %v5800_v27 = vpop.permute.xlu0 %5799 }
0x5fa6   :  { %7546 = vmatmul.mubr.msk.f32.vlgmr.msra.gmra.mrb[44].mxu1 %vm4543_vm6, %v5800_v27 }
0x5fa7   :  { %8021 = vmatpush1.bf16.msra.mxu1 %v10120_v46  ;;  %6142 = vmatprep.mubr.f32.mxu1 %v8993_v2 }
0x5fa8   :  { %8023 = vmatprep.subr.bf16.mxu1 %v10122_v18 }
0x5fab   :  { %8025 = vmatpush1.bf16.msra.mxu1 %v10126_v30 }
0x5fac   :  { %8027 = vmatprep.subr.bf16.mxu1 %v10129_v7 }
0x5faf   :  { %8029 = vmatpush1.bf16.msra.mxu1 %v10132_v8 }
0x5fb0   :  { %8031 = vmatprep.subr.bf16.mxu1 %v10135_v33 }
0x5fb3   :  { %8033 = vmatpush1.bf16.msra.mxu1 %v10138_v28 }
0x5fb4   :  { %8035 = vmatprep.subr.bf16.mxu1 %v10143_v53 }
0x5fb6   :  { %6919 = vmatmul.mubr.msk.f32.vlgmr.msra.gmra.mrb[46].mxu1 %vm4543_vm6, %v5800_v27 }
0x5fb7   :  { %8037 = vmatpush1.bf16.msra.mxu1 %v10156_v63  ;;  %6218 = vmatprep.mubr.f32.mxu1 %v8993_v2 }
0x5fb8   :  { %8039 = vmatprep.subr.bf16.mxu1 %v10158_v15 }
0x5fbb   :  { %8041 = vmatpush1.bf16.msra.mxu1 %v10163_v20 }
0x5fbc   :  { %8043 = vmatprep.subr.bf16.mxu1 %v10167_v55 }
0x5fbf   :  { %8045 = vmatpush1.bf16.msra.mxu1 %v10173_v11 }
0x5fc0   :  { %8047 = vmatprep.subr.bf16.mxu1 %v10176_v52 }
0x5fc3   :  { %8049 = vmatpush1.bf16.msra.mxu1 %v10179_v34 }
0x5fc4   :  { %8063 = vmatprep.subr.bf16.mxu1 %v9985_v45 }
0x6079   :  { %v5869_v56 = vpop.f32.mrb[44].mxu1 }
0x607a   :  { %v5870_v25 = vadd.f32 %v10278_v35, %v5869_v56  ;;  %v7547_v42 = vpop.f32.mrb[45].mxu1 }
0x607c   :  { %v5873_v36 = vsel %vm4541_vm5, %v5870_v25, -inf }
0x607d   :  { %5874 = vmax.xlane.f32.xlu1 %v5873_v36 }
0x610a   :  { %v5875_v0 = vpop.xlane.xlu1 %5874 }
0x610b   :  { %v5876_v29 = vsub.f32 %v5870_v25, %v5875_v0 }
0x610d   :  { %v5877_v31 = vmul.f32 1.442695, %v5876_v29 }
0x610f   :  { %8515 = vpow2.f32 %v5877_v31 }
0x6119   :  { %v8516_v21 = vpop.eup %8515 }
0x611a   :  { %v5879_v24 = vsel %vm4541_vm5, %v8516_v21, 0.0 }
0x611b   :  { %5880 = vadd.xlane.f32.xlu0 %v5879_v24 }
0x61a8   :  { %v5881_v6 = vpop.xlane.xlu0 %5880 }
0x61a9   :  { %8517 = vlog2.f32 %v5881_v6 }
0x61b3   :  { %v8518_v14 = vpop.eup %8517 }
0x61b4   :  { %v5883_v61 = vmul.f32 0.6931472, %v8518_v14 }
0x61b6   :  { %v5884_v45 = vadd.f32 %v5883_v61, %v5875_v0 }
0x61b8   :  { %v5885_v49 = vsub.f32 %v5870_v25, %v5884_v45 }
0x61ba   :  { %v5888_v13 = vsel %vm4541_vm5, %v5885_v49, -inf  ;;  %5887 = vst.msk [vmem:[#allocation30 + $0x6] sm:$0x3] %vm4541_vm5, %v5885_v49 }
0x61bb   :  { %5889 = vmax.xlane.f32.xlu0 %v5888_v13 }
0x6248   :  { %v5890_v4 = vpop.xlane.xlu0 %5889 }
0x6249   :  { %vm5891_vm13 = vcmp.eq.f32.partialorder %v5885_v49, %v5890_v4 }
0x624a   :  { %v5892_v39 = vsel %vm5891_vm13, %v10003_v3, 16 }
0x624b   :  { %v5893_v26 = vsel %vm4541_vm5, %v5892_v39, 2147483647 }
0x624c   :  { %v5895_v9 = vshra.s32 %v5893_v26, 16  ;;  %v5894_v50 = vand.u32 65535, %v5893_v26 }
0x624e   :  { %v5897_v38 = vcvt.s32.f32 %v5895_v9  ;;  %v5896_v51 = vcvt.s32.f32 %v5894_v50 }
0x6250   :  { %5898 = vmin.xlane.f32.xlu1 %v5897_v38 }
0x62dd   :  { %v5899_v32 = vpop.xlane.xlu1 %5898 }
0x62de   :  { %vm5900_vm14 = vcmp.eq.f32.partialorder %v5897_v38, %v5899_v32  ;;  %v5905_v43 = vcvt.f32.s32 %v5899_v32 }
0x62df   :  { %v5901_v22 = vsel %vm5900_vm14, %v5896_v51, inf }
0x62e0   :  { %5902 = vmin.xlane.f32.xlu0 %v5901_v22  ;;  %v5906_v27 = vshll.u32 %v5905_v43, 16 }
0x636d   :  { %v5903_v47 = vpop.xlane.xlu0 %5902 }
0x636e   :  { %v5904_v56 = vcvt.f32.s32 %v5903_v47 }
0x6370   :  { %v5907_v25 = vadd.s32 %v5906_v27, %v5904_v56 }
0x6372   :  { %vm5908_vm15 = vcmp.eq.s32.totalorder %v10003_v3, %v5907_v25 }
0x6373   :  { %v6914_v42 = vsel %vm5908_vm15, 1.0, %v8993_v2 }
0x6374   :  { %6916 = vmatmul.mubr.msk.f32.vlgmr.msra.gmra.mrb[48].mxu0 %vm338_vm1, %v6914_v42 }
0x6375   :  { %8052 = vmatpush3.bf16.msra.mxu0 %v10215_v58  ;;  %7564 = vmatprep.mubr.msk.f32.mxu0 %vm8995_vm0, %v8993_v2 }
0x6376   :  { %8053 = vmatprep.subr.bf16.mxu0 %v8992_v1 }
0x6379   :  { %8055 = vmatpush3.bf16.msra.mxu0 %v10221_v5 }
0x637a   :  { %8056 = vmatprep.subr.bf16.mxu0 %v8992_v1 }
0x637d   :  { %8058 = vmatpush3.bf16.msra.mxu0 %v10231_v16 }
0x637e   :  { %8059 = vmatprep.subr.bf16.mxu0 %v8992_v1 }
0x6381   :  { %8061 = vmatpush3.bf16.msra.mxu0 %v10241_v62 }
0x6382   :  { %8083 = vmatprep.subr.bf16.mxu0 %v10118_v17 }
0x6447   :  { %v6051_v36 = vpop.f32.mrb[48].mxu0 }
0x6448   :  { %v6917_v0 = vmul.f32 -1.442695, %v6051_v36  ;;  %v6053_v29 = vpop.f32.mrb[49].mxu0 }
0x6449   :  { %v6918_v61 = vmul.f32 -1.442695, %v6053_v29 }
0x644a   :  { %8519 = vpow2.f32 %v6917_v0 }
0x644b   :  { %8521 = vtanh.f32 %v6053_v29 }
0x6454   :  { %v8520_v31 = vpop.eup %8519 }
0x6455   :  { %v6062_v21 = vadd.f32 1.0, %v8520_v31  ;;  %v8522_v24 = vpop.eup %8521 }
0x6457   :  { %8523 = vrcp.f32 %v6062_v21 }
0x6458   :  { %8525 = vpow2.f32 %v6918_v61 }
0x6461   :  { %v8524_v6 = vpop.eup %8523 }
0x6462   :  { %v6070_v14 = vmul.f32 %v8524_v6, %v8522_v24  ;;  %v8526_v45 = vpop.eup %8525  ;;  %v6069_v13 = vmul.f32 %v8524_v6, %v10370_v41 }
0x6463   :  { %v6063_v49 = vadd.f32 1.0, %v8526_v45 }
0x6464   :  { %6072 = vrot.lane.b32.xlu1 %v6070_v14, %s8996_s16 }
0x6465   :  { %8527 = vrcp.f32 %v6063_v49 }
0x646f   :  { %v8528_v39 = vpop.eup %8527 }
0x64d6   :  { %v6073_v17 = vpop.permute.xlu1 %6072 }
0x64d7   :  { %v10438_v4 = vadd.f32 %v6073_v17, %v6069_v13 }
0x64d9   :  { %8529 = vtanh.f32 %v10438_v4 }
0x64e3   :  { %v8530_v26 = vpop.eup %8529 }
0x64e4   :  { %v6077_v9 = vmul.f32 %v8530_v26, %v8528_v39 }
0x64e6   :  { %6150 = vrot.lane.b32.xlu0 %v6077_v9, %s8996_s16 }
0x6558   :  { %v6151_v38 = vpop.permute.xlu0 %6150 }
0x6559   :  { %6920 = vmatmul.mubr.msk.f32.vlgmr.msra.gmra.mrb[46].mxu1 %vm4543_vm6, %v6151_v38 }
0x655a   :  { %8065 = vmatpush1.bf16.msra.mxu1 %v10020_v59  ;;  %6426 = vmatprep.mubr.f32.mxu1 %v8993_v2 }
0x655b   :  { %8067 = vmatprep.subr.bf16.mxu1 %v10022_v60 }
0x655e   :  { %8069 = vmatpush1.bf16.msra.mxu1 %v10038_v54 }
0x655f   :  { %8071 = vmatprep.subr.bf16.mxu1 %v10042_v57 }
0x6562   :  { %8073 = vmatpush1.bf16.msra.mxu1 %v10060_v12 }
0x6563   :  { %8075 = vmatprep.subr.bf16.mxu1 %v10064_v19 }
0x6566   :  { %8077 = vmatpush1.bf16.msra.mxu1 %v10075_v23 }
0x6567   :  { %8079 = vmatprep.subr.bf16.mxu1 %v10000_v40 }
0x6569   :  { %6925 = vmatmul.mubr.msk.f32.vlgmr.msra.gmra.mrb[48].mxu1 %vm4543_vm6, %v6151_v38 }
0x656a   :  { %8081 = vmatpush1.bf16.msra.mxu1 %v9997_v37  ;;  %6500 = vmatprep.mubr.f32.mxu1 %v8993_v2 }
0x656b   :  { %8114 = vmatprep.subr.bf16.mxu1 %v8992_v1 }
0x662c   :  { %v6220_v59 = vpop.f32.mrb[46].mxu1 }
0x662d   :  { %v6225_v60 = vadd.f32 %v6220_v59, %v10198_v10  ;;  %v6222_v54 = vpop.f32.mrb[47].mxu1 }
0x662e   :  { %v6226_v12 = vadd.f32 %v6222_v54, %v10202_v48 }
0x662f   :  { %v6921_v57 = vmul.f32 -1.442695, %v6225_v60 }
0x6630   :  { %v6922_v37 = vmul.f32 -1.442695, %v6226_v12 }
0x6631   :  { %8531 = vpow2.f32 %v6921_v57 }
0x6632   :  { %8533 = vtanh.f32 %v6226_v12 }
0x663b   :  { %v8532_v19 = vpop.eup %8531 }
0x663c   :  { %v6233_v23 = vadd.f32 1.0, %v8532_v19  ;;  %v8534_v40 = vpop.eup %8533 }
0x663e   :  { %8535 = vrcp.f32 %v6233_v23 }
0x663f   :  { %8537 = vpow2.f32 %v6922_v37 }
0x6648   :  { %v8536_v41 = vpop.eup %8535 }
0x6649   :  { %v6241_v50 = vmul.f32 %v8536_v41, %v8534_v40  ;;  %v8538_v32 = vpop.eup %8537  ;;  %v6240_v22 = vmul.f32 %v8536_v41, %v10392_v44 }
0x664a   :  { %v6234_v51 = vadd.f32 1.0, %v8538_v32 }
0x664b   :  { %6243 = vrot.lane.b32.xlu1 %v6241_v50, %s8996_s16 }
0x664c   :  { %8539 = vrcp.f32 %v6234_v51 }
0x6656   :  { %v8540_v27 = vpop.eup %8539 }
0x66bd   :  { %v6244_v43 = vpop.permute.xlu1 %6243 }
0x66be   :  { %v10460_v47 = vadd.f32 %v6244_v43, %v6240_v22 }
0x66c0   :  { %8541 = vtanh.f32 %v10460_v47 }
0x66ca   :  { %v8542_v56 = vpop.eup %8541 }
0x66cb   :  { %v6248_v25 = vmul.f32 %v8542_v56, %v8540_v27 }
0x66cd   :  { %6250 = vrot.lane.b32.xlu1 %v6248_v25, %s8996_s16 }
0x673f   :  { %v6251_v42 = vpop.permute.xlu1 %6250 }
0x6740   :  { %7565 = vmatmul.mubr.msk.f32.vlgmr.msra.gmra.mrb[50].mxu0 %vm4543_vm6, %v6251_v42 }
0x6741   :  { %8085 = vmatpush1.bf16.msra.mxu0 %v10120_v46  ;;  %6593 = vmatprep.mubr.f32.mxu0 %v8993_v2 }
0x6742   :  { %8087 = vmatprep.subr.bf16.mxu0 %v10122_v18 }
0x6745   :  { %8089 = vmatpush1.bf16.msra.mxu0 %v10126_v30 }
0x6746   :  { %8091 = vmatprep.subr.bf16.mxu0 %v10129_v7 }
0x6749   :  { %8093 = vmatpush1.bf16.msra.mxu0 %v10132_v8 }
0x674a   :  { %8095 = vmatprep.subr.bf16.mxu0 %v10135_v33 }
0x674d   :  { %8097 = vmatpush1.bf16.msra.mxu0 %v10138_v28 }
0x674e   :  { %8099 = vmatprep.subr.bf16.mxu0 %v10143_v53 }
0x6750   :  { %6929 = vmatmul.mubr.msk.f32.vlgmr.msra.gmra.mrb[52].mxu0 %vm4543_vm6, %v6251_v42 }
0x6751   :  { %8101 = vmatpush1.bf16.msra.mxu0 %v10156_v63  ;;  %6669 = vmatprep.mubr.f32.mxu0 %v8993_v2 }
0x6752   :  { %8103 = vmatprep.subr.bf16.mxu0 %v10158_v15 }
0x6755   :  { %8105 = vmatpush1.bf16.msra.mxu0 %v10163_v20 }
0x6756   :  { %8107 = vmatprep.subr.bf16.mxu0 %v10167_v55 }
0x6759   :  { %8109 = vmatpush1.bf16.msra.mxu0 %v10173_v11 }
0x675a   :  { %8111 = vmatprep.subr.bf16.mxu0 %v10176_v52 }
0x675d   :  { %8113 = vmatpush1.bf16.msra.mxu0 %v10179_v34 }
0x6813   :  { %v6320_v46 = vpop.f32.mrb[50].mxu0 }
0x6814   :  { %v6321_v18 = vadd.f32 %v10278_v35, %v6320_v46  ;;  %v7566_v30 = vpop.f32.mrb[51].mxu0 }
0x6816   :  { %v6324_v7 = vsel %vm4541_vm5, %v6321_v18, -inf }
0x6817   :  { %6325 = vmax.xlane.f32.xlu0 %v6324_v7 }
0x68a4   :  { %v6326_v8 = vpop.xlane.xlu0 %6325 }
0x68a5   :  { %v6327_v33 = vsub.f32 %v6321_v18, %v6326_v8 }
0x68a7   :  { %v6328_v28 = vmul.f32 1.442695, %v6327_v33 }
0x68a9   :  { %8543 = vpow2.f32 %v6328_v28  ;;  %v8575_v28 = vld [vmem:[%s10575_s10] ss:$0 sm:$0xff] }
0x68b3   :  { %v8544_v53 = vpop.eup %8543 }
0x68b4   :  { %v6330_v63 = vsel %vm4541_vm5, %v8544_v53, 0.0 }
0x68b5   :  { %6331 = vadd.xlane.f32.xlu1 %v6330_v63 }
0x6942   :  { %v6332_v15 = vpop.xlane.xlu1 %6331 }
0x6943   :  { %8545 = vlog2.f32 %v6332_v15 }
0x694d   :  { %v8546_v20 = vpop.eup %8545 }
0x694e   :  { %v6334_v55 = vmul.f32 0.6931472, %v8546_v20 }
0x6950   :  { %v6335_v11 = vadd.f32 %v6334_v55, %v6326_v8 }
0x6952   :  { %v6336_v52 = vsub.f32 %v6321_v18, %v6335_v11 }
0x6954   :  { %v6339_v34 = vsel %vm4541_vm5, %v6336_v52, -inf  ;;  %6338 = vst.msk [vmem:[#allocation30 + $0x8] sm:$0x3] %vm4541_vm5, %v6336_v52 }
0x6955   :  { %6340 = vmax.xlane.f32.xlu0 %v6339_v34 }
0x69e2   :  { %v6341_v35 = vpop.xlane.xlu0 %6340 }
0x69e3   :  { %vm6342_vm2 = vcmp.eq.f32.partialorder %v6336_v52, %v6341_v35 }
0x69e4   :  { %v6343_v44 = vsel %vm6342_vm2, %v10003_v3, 16 }
0x69e5   :  { %v6344_v36 = vsel %vm4541_vm5, %v6343_v44, 2147483647 }
0x69e6   :  { %v6346_v0 = vshra.s32 %v6344_v36, 16  ;;  %v6345_v31 = vand.u32 65535, %v6344_v36 }
0x69e8   :  { %v6348_v29 = vcvt.s32.f32 %v6346_v0  ;;  %v6347_v24 = vcvt.s32.f32 %v6345_v31 }
0x69ea   :  { %6349 = vmin.xlane.f32.xlu0 %v6348_v29 }
0x6a77   :  { %v6350_v21 = vpop.xlane.xlu0 %6349 }
0x6a78   :  { %vm6351_vm3 = vcmp.eq.f32.partialorder %v6348_v29, %v6350_v21  ;;  %v6356_v14 = vcvt.f32.s32 %v6350_v21 }
0x6a79   :  { %v6352_v6 = vsel %vm6351_vm3, %v6347_v24, inf }
0x6a7a   :  { %6353 = vmin.xlane.f32.xlu1 %v6352_v6  ;;  %v6357_v45 = vshll.u32 %v6356_v14, 16 }
0x6b07   :  { %v6354_v61 = vpop.xlane.xlu1 %6353 }
0x6b08   :  { %v6355_v49 = vcvt.f32.s32 %v6354_v61 }
0x6b0a   :  { %v6358_v13 = vadd.s32 %v6357_v45, %v6355_v49 }
0x6b0c   :  { %vm6359_vm4 = vcmp.eq.s32.totalorder %v10003_v3, %v6358_v13 }
0x6b0d   :  { %v6924_v17 = vsel %vm6359_vm4, 1.0, %v8993_v2 }
0x6b0e   :  { %6926 = vmatmul.mubr.msk.f32.vlgmr.msra.gmra.mrb[48].mxu1 %vm338_vm1, %v6924_v17 }
0x6b0f   :  { %8116 = vmatpush3.bf16.msra.mxu1 %v10215_v58  ;;  %7583 = vmatprep.mubr.msk.f32.mxu1 %vm8995_vm0, %v8993_v2 }
0x6b10   :  { %8117 = vmatprep.subr.bf16.mxu1 %v8992_v1 }
0x6b13   :  { %8119 = vmatpush3.bf16.msra.mxu1 %v10221_v5 }
0x6b14   :  { %8120 = vmatprep.subr.bf16.mxu1 %v8992_v1 }
0x6b17   :  { %8122 = vmatpush3.bf16.msra.mxu1 %v10231_v16 }
0x6b18   :  { %8123 = vmatprep.subr.bf16.mxu1 %v8992_v1 }
0x6b1b   :  { %8125 = vmatpush3.bf16.msra.mxu1 %v10241_v62 }
0x6be1   :  { %v6502_v3 = vpop.f32.mrb[48].mxu1 }
0x6be2   :  { %v6927_v39 = vmul.f32 -1.442695, %v6502_v3  ;;  %v6504_v26 = vpop.f32.mrb[49].mxu1 }
0x6be3   :  { %v6928_v5 = vmul.f32 -1.442695, %v6504_v26 }
0x6be4   :  { %8547 = vpow2.f32 %v6927_v39 }
0x6be5   :  { %8549 = vtanh.f32 %v6504_v26 }
0x6bee   :  { %v8548_v58 = vpop.eup %8547 }
0x6bef   :  { %v6513_v9 = vadd.f32 1.0, %v8548_v58  ;;  %v8550_v2 = vpop.eup %8549 }
0x6bf1   :  { %8551 = vrcp.f32 %v6513_v9 }
0x6bf2   :  { %8553 = vpow2.f32 %v6928_v5 }
0x6bfb   :  { %v8552_v38 = vpop.eup %8551 }
0x6bfc   :  { %v6521_v59 = vmul.f32 %v8552_v38, %v8550_v2  ;;  %v8554_v16 = vpop.eup %8553  ;;  %v6520_v1 = vmul.f32 %v8552_v38, %v10438_v4 }
0x6bfd   :  { %v6514_v60 = vadd.f32 1.0, %v8554_v16 }
0x6bfe   :  { %6523 = vrot.lane.b32.xlu0 %v6521_v59, %s8996_s16 }
0x6bff   :  { %8555 = vrcp.f32 %v6514_v60 }
0x6c09   :  { %v8556_v57 = vpop.eup %8555 }
0x6c70   :  { %v6524_v62 = vpop.permute.xlu0 %6523 }
0x6c71   :  { %v6526_v54 = vadd.f32 %v6524_v62, %v6520_v1 }
0x6c73   :  { %8557 = vtanh.f32 %v6526_v54 }
0x6c7d   :  { %v8558_v12 = vpop.eup %8557 }
0x6c7e   :  { %v6528_v19 = vmul.f32 %v8558_v12, %v8556_v57 }
0x6c80   :  { %6601 = vrot.lane.b32.xlu1 %v6528_v19, %s8996_s16 }
0x6cf2   :  { %v6602_v23 = vpop.permute.xlu1 %6601 }
0x6cf3   :  { %6930 = vmatmul.mubr.msk.f32.vlgmr.msra.gmra.mrb[52].mxu0 %vm4543_vm6, %v6602_v23 }
0x6dc6   :  { %v6671_v40 = vpop.f32.mrb[52].mxu0 }
0x6dc7   :  { %v6676_v41 = vadd.f32 %v6671_v40, %v10198_v10  ;;  %v6673_v50 = vpop.f32.mrb[53].mxu0 }
0x6dc8   :  { %v6677_v4 = vadd.f32 %v6673_v50, %v10202_v48 }
0x6dc9   :  { %v6931_v37 = vmul.f32 -1.442695, %v6676_v41 }
0x6dca   :  { %v6932_v56 = vmul.f32 -1.442695, %v6677_v4 }
0x6dcb   :  { %8559 = vpow2.f32 %v6931_v37 }
0x6dcc   :  { %8561 = vtanh.f32 %v6677_v4 }
0x6dd5   :  { %v8560_v32 = vpop.eup %8559 }
0x6dd6   :  { %v6684_v51 = vadd.f32 1.0, %v8560_v32  ;;  %v8562_v22 = vpop.eup %8561 }
0x6dd8   :  { %8563 = vrcp.f32 %v6684_v51 }
0x6dd9   :  { %8565 = vpow2.f32 %v6932_v56 }
0x6de2   :  { %v8564_v43 = vpop.eup %8563 }
0x6de3   :  { %v6692_v27 = vmul.f32 %v8564_v43, %v8562_v22  ;;  %v8566_v25 = vpop.eup %8565  ;;  %v6691_v10 = vmul.f32 %v8564_v43, %v10460_v47 }
0x6de4   :  { %v6685_v42 = vadd.f32 1.0, %v8566_v25 }
0x6de5   :  { %6694 = vrot.lane.b32.xlu1 %v6692_v27, %s8996_s16 }
0x6de6   :  { %8567 = vrcp.f32 %v6685_v42 }
0x6df0   :  { %v8568_v48 = vpop.eup %8567 }
0x6e57   :  { %v6695_v46 = vpop.permute.xlu1 %6694 }
0x6e58   :  { %v6697_v18 = vadd.f32 %v6695_v46, %v6691_v10 }
0x6e5a   :  { %8569 = vtanh.f32 %v6697_v18 }
0x6e64   :  { %v8570_v30 = vpop.eup %8569 }
0x6e65   :  { %v6699_v7 = vmul.f32 %v8570_v30, %v8568_v48 }
0x6e67   :  { %6701 = vrot.lane.b32.xlu0 %v6699_v7, %s8996_s16  ;;  %s8998_s16 = smov [#allocation30]  }
0x6e68   :  { %s6795_s2 = sshll.u32 %s8998_s16, 4  ;;  %s6796_s2 = int_to_ptr.vmem [resolvable:$true] %s6795_s2 }
0x6e69   :  { %s8928_s28 = scalar_lea.vmem %s6796_s2, 192  ;;  %p8933_p3 = scmp.lt.s32.totalorder %s6796_s2, %s6796_s2 }
0x6e6a   :  { %p8929_p2 = scmp.ne.s32.totalorder %s6796_s2, %s8928_s28  ;;  %p8934_p4 = scmp.lt.s32.totalorder %s8928_s28, %s8928_s28 }
0x6e6c   :  { %p8935_p5 = por %p8934_p4, %p8933_p3 }
0x6e6e   :  { %p8936_p6 = pnand %p8935_p5, %p8929_p2 }
0x6ed9   :  { %v6702_v8 = vpop.permute.xlu0 %6701 }
0x6eda   :  { %7584 = vmatmul.mubr.msk.f32.vlgmr.msra.gmra.mrb[50].mxu1 %vm4543_vm6, %v6702_v8 }
0x6fad   :  { %v6771_v33 = vpop.f32.mrb[50].mxu1 }
0x6fae   :  { %v6772_v53 = vadd.f32 %v8575_v28, %v6771_v33  ;;  %v7585_v63 = vpop.f32.mrb[51].mxu1 }
0x6fb0   :  { %v6775_v47 = vsel %vm4541_vm5, %v6772_v53, -inf }
0x6fb1   :  { %6776 = vmax.xlane.f32.xlu1 %v6775_v47 }
0x703e   :  { %v6777_v15 = vpop.xlane.xlu1 %6776 }
0x703f   :  { %v6778_v20 = vsub.f32 %v6772_v53, %v6777_v15 }
0x7041   :  { %v6779_v55 = vmul.f32 1.442695, %v6778_v20 }
0x7043   :  { %8571 = vpow2.f32 %v6779_v55 }
0x704d   :  { %v8572_v11 = vpop.eup %8571 }
0x704e   :  { %v6781_v52 = vsel %vm4541_vm5, %v8572_v11, 0.0 }
0x704f   :  { %6782 = vadd.xlane.f32.xlu0 %v6781_v52 }
0x70dc   :  { %v6783_v34 = vpop.xlane.xlu0 %6782 }
0x70dd   :  { %8573 = vlog2.f32 %v6783_v34 }
0x70e7   :  { %v8574_v35 = vpop.eup %8573 }
0x70e8   :  { %v6785_v44 = vmul.f32 0.6931472, %v8574_v35 }
0x70ea   :  { %v6786_v36 = vadd.f32 %v6785_v44, %v6777_v15 }
0x70ec   :  { %v6787_v0 = vsub.f32 %v6772_v53, %v6786_v36 }
0x70ee   :  { %6789 = vst.msk [vmem:[#allocation30 + $0xa] sm:$0x3] %vm4541_vm5, %v6787_v0 }
0x70ef   :  { %8939 = shalt.err (!%p8936_p6)
}
0x70f0   :  { %s10576_s18 = sld [smem:[#allocation46_spill]] }
0x70f6   :  { %s8940_s5 = scalar_lea.hbm %s10576_s18, 192 }
0x70f7   :  { %p8941_p7 = scmp.ne.s32.totalorder %s10576_s18, %s8940_s5  ;;  %p8944_p8 = scmp.lt.u32.totalorder %s8940_s5, %s10576_s18 }
0x70f9   :  { %p8946_p9 = pnand %p8944_p8, %p8941_p7 }
0x70fb   :  { %8949 = shalt.err (!%p8946_p9)
}
0x70fc   :  { %6801 = dma.vmem_to_hbm [thread:$0]  %s6796_s2, 192, %s10576_s18, [#allocation6], %s8982_s14, %s8982_s14, %s8983_s3  }
0x70fd   :  { %8968 = dma.done.wait [#allocation6], 192  }
0x70fe   :  { %8969 = vsyncadd [#allocation6], 4294967104 }
0x70ff   :  { %6805 = vsyncpa [#allocation5], 1 }
0x7100   :  { %6806 = vsyncpa [#allocation8], 1 }
0x7101   :  { %6807 = vsyncpa [#allocation11], 1 }
0x7102   :  { %6808 = vsyncpa [#allocation14], 1 }
0x7103   :  { %6809 = vsyncpa [#allocation17], 1 }
0x7104   :  { %6810 = vsyncpa [#allocation20], 1 }
0x7105   :  { %6811 = vsyncpa [#allocation23], 1 }
0x7106   :  { %6812 = vsyncpa [#allocation26], 1 }
0x7107   :  { %6813 = vsyncpa [#allocation29], 1 }
0x7108   :  { %6814 = vsyncpa [#allocation6], 1 }

</bundles_post_ra>
